<compile_context>
chip_gen: v7x
topology: tpu7x:2x2x1
jax: 0.10.0
libtpu: 0.0.40
codegen_flags: <defaults>
</compile_context>

<pallas_src>
import functools

import jax
import jax.numpy as jnp
from jax import lax
from jax.experimental import pallas as pl
from jax.experimental.pallas import tpu as pltpu

_LANE = 128   # output-channel dim padded to a multiple of the TPU lane width


def _round_up(x, mult):
    return (x + mult - 1) // mult * mult


def _pick_tile_n(cout_p):
    # <=256 -> single lane-dense block; otherwise 256-wide MXU-filling blocks
    # when they divide evenly, else 128-wide blocks.
    if cout_p <= 256:
        return cout_p
    if cout_p % 256 == 0:
        return 256
    return 128


# -----------------------------------------------------------------------------
# Kernel 1: fused-im2col conv (sum of row-shifted matmuls on the MXU, bf16
# operands / f32 VMEM accumulator) + per-block partial BN statistics.
# One grid step = (one image) x (one cout tile); both grid axes are parallel.
# -----------------------------------------------------------------------------
def _conv_stats_kernel(x_ref, w_ref, y_ref, st_ref, acc_ref, *,
                       tap_offsets, m_out, row_pitch, valid_cols):
    # x_ref : (m_in, K)        bf16   flat padded input rows (one image)
    # w_ref : (taps, K, tn)    bf16   per-tap weights
    # y_ref : (m_out, tn)      bf16   conv output (padded-width flat layout)
    # st_ref: (2, tn)          f32    [sum, sumsq] per channel (valid rows only)
    # acc_ref: (m_out, tn)     f32    VMEM accumulator
    for t, off in enumerate(tap_offsets):          # static unroll over taps
        xs = x_ref[pl.ds(off, m_out), :]           # pure row shift, static offset
        contrib = jnp.dot(xs, w_ref[t], preferred_element_type=jnp.float32)
        if t == 0:
            acc_ref[...] = contrib
        else:
            acc_ref[...] += contrib

    acc = acc_ref[...]
    y_ref[...] = acc.astype(y_ref.dtype)           # bf16 store (half the bytes)

    # BN partial stats.  Rows whose flat position has (q mod row_pitch) >=
    # valid_cols are padded-width junk columns -> mask them out of the sums.
    if valid_cols < row_pitch:
        q = lax.broadcasted_iota(jnp.int32, acc.shape, 0)
        acc = jnp.where((q % row_pitch) < valid_cols, acc, 0.0)
    st_ref[0:1, :] = jnp.sum(acc, axis=0, keepdims=True)
    st_ref[1:2, :] = jnp.sum(acc * acc, axis=0, keepdims=True)


# -----------------------------------------------------------------------------
# Kernel 2: BatchNorm as one fused multiply-add with precomputed per-channel
# scale/bias.  bf16 in / bf16 out, output aliases the conv-output HBM buffer.
# -----------------------------------------------------------------------------
def _bn_kernel(y_ref, scale_ref, bias_ref, o_ref):
    y = y_ref[...].astype(jnp.float32)
    o_ref[...] = (y * scale_ref[...] + bias_ref[...]).astype(o_ref.dtype)


# -----------------------------------------------------------------------------
# stride>1 fallback: im2col in plain JAX (bf16 patches), fed to the same
# kernel as a single tap with K = Cin*KH*KW.
# -----------------------------------------------------------------------------
def _im2col(x_nchw, kh, kw, stride, padding, dilation):
    n, c, h, w = x_nchw.shape
    xp = jnp.pad(x_nchw, ((0, 0), (0, 0), (padding, padding), (padding, padding)))
    oh = (h + 2 * padding - dilation * (kh - 1) - 1) // stride + 1
    ow = (w + 2 * padding - dilation * (kw - 1) - 1) // stride + 1
    cols = []
    for i in range(kh):
        for j in range(kw):
            cols.append(xp[:, :,
                           i * dilation: i * dilation + stride * (oh - 1) + 1: stride,
                           j * dilation: j * dilation + stride * (ow - 1) + 1: stride])
    patches = jnp.stack(cols, axis=2)                   # (N, C, KH*KW, OH, OW)
    patches = jnp.transpose(patches, (0, 3, 4, 1, 2))   # (N, OH, OW, C, KH*KW)
    return patches.reshape(n, oh * ow, c * kh * kw), oh, ow


def basic_conv2d(x_nchw, weight_oihw, gamma, beta, *, stride=1, padding=0,
                 dilation=1, eps=1e-5, nchw_out=True):
    n, cin, h, w = x_nchw.shape
    cout, _, kh, kw = weight_oihw.shape
    oh = (h + 2 * padding - dilation * (kh - 1) - 1) // stride + 1
    ow = (w + 2 * padding - dilation * (kw - 1) - 1) // stride + 1

    cout_p = _round_up(cout, _LANE)
    tile_n = _pick_tile_n(cout_p)
    n_ct = cout_p // tile_n

    if stride == 1:
        # ---- fused path: each (i, j) tap is a row shift of the flat input ----
        hp, wp = h + 2 * padding, w + 2 * padding
        xp = jnp.pad(x_nchw, ((0, 0), (0, 0), (padding, padding),
                              (padding, padding))).astype(jnp.bfloat16)
        xflat = jnp.transpose(xp, (0, 2, 3, 1)).reshape(n, hp * wp, cin)
        m_out = oh * wp                              # includes (wp-ow) junk cols/row
        m_in = hp * wp + (kw - 1) * dilation         # farthest tap offset + m_out
        xflat = jnp.pad(xflat, ((0, 0), (0, m_in - hp * wp), (0, 0)))
        tap_offsets = tuple(i * dilation * wp + j * dilation
                            for i in range(kh) for j in range(kw))
        w_taps = jnp.transpose(weight_oihw, (2, 3, 1, 0)).reshape(kh * kw, cin, cout)
        row_pitch, k_dim = wp, cin
    else:
        # ---- fallback path: materialized patches, single tap ----------------
        xflat, _, _ = _im2col(x_nchw.astype(jnp.bfloat16), kh, kw, stride,
                              padding, dilation)
        m_out = m_in = oh * ow
        tap_offsets = (0,)
        w_taps = weight_oihw.reshape(cout, cin * kh * kw).T[None]   # (1, K, Cout)
        row_pitch, k_dim = ow, cin * kh * kw

    w_taps = w_taps.astype(jnp.bfloat16)
    if cout_p != cout:
        w_taps = jnp.pad(w_taps, ((0, 0), (0, 0), (0, cout_p - cout)))

    # 32 MiB scoped VMEM is safe on v5e/v6e (128 MiB physical) and within the
    # recommended 32-48 MiB cap for v7x (64 MiB physical).
    cparams = pltpu.CompilerParams(
        dimension_semantics=("parallel", "parallel"),
        vmem_limit_bytes=32 * 1024 * 1024,
    )

    conv_kernel = functools.partial(
        _conv_stats_kernel, tap_offsets=tap_offsets, m_out=m_out,
        row_pitch=row_pitch, valid_cols=ow)

    # --- pass 1: conv (fused im2col) + per-block partial BN stats ------------
    y_flat, stats = pl.pallas_call(
        conv_kernel,
        out_shape=(
            jax.ShapeDtypeStruct((n, m_out, cout_p), jnp.bfloat16),
            jax.ShapeDtypeStruct((n, 2, cout_p), jnp.float32),
        ),
        grid_spec=pltpu.PrefetchScalarGridSpec(
            num_scalar_prefetch=0,
            grid=(n, n_ct),
            in_specs=[
                pl.BlockSpec((None, m_in, k_dim), lambda b, c: (b, 0, 0)),
                pl.BlockSpec((len(tap_offsets), k_dim, tile_n),
                             lambda b, c: (0, 0, c)),
            ],
            out_specs=[
                pl.BlockSpec((None, m_out, tile_n), lambda b, c: (b, 0, c)),
                pl.BlockSpec((None, 2, tile_n), lambda b, c: (b, 0, c)),
            ],
            scratch_shapes=[pltpu.VMEM((m_out, tile_n), jnp.float32)],
        ),
        compiler_params=cparams,
    )(xflat, w_taps)

    # --- tiny cross-block stats combine + BN scale/bias (plain JAX) ----------
    count = float(n * oh * ow)                         # real (unpadded) elements
    s = stats.sum(axis=0)                              # (2, cout_p)
    mean = s[0] / count
    var = jnp.maximum(s[1] / count - mean * mean, 0.0)  # biased (PyTorch BN fwd), >=0 guard
    gamma_p = jnp.pad(gamma.astype(jnp.float32), (0, cout_p - cout))
    beta_p = jnp.pad(beta.astype(jnp.float32), (0, cout_p - cout))
    scale = gamma_p * lax.rsqrt(var + eps)
    bias = beta_p - mean * scale

    # --- pass 2: BN fused multiply-add, bf16, aliases the conv output buffer -
    out_flat = pl.pallas_call(
        _bn_kernel,
        out_shape=jax.ShapeDtypeStruct((n, m_out, cout_p), jnp.bfloat16),
        grid_spec=pltpu.PrefetchScalarGridSpec(
            num_scalar_prefetch=0,
            grid=(n, n_ct),
            in_specs=[
                pl.BlockSpec((None, m_out, tile_n), lambda b, c: (b, 0, c)),
                pl.BlockSpec((1, tile_n), lambda b, c: (0, c)),
                pl.BlockSpec((1, tile_n), lambda b, c: (0, c)),
            ],
            out_specs=pl.BlockSpec((None, m_out, tile_n), lambda b, c: (b, 0, c)),
        ),
        compiler_params=cparams,
        input_output_aliases={0: 0},                   # reuse y_flat's HBM buffer
    )(y_flat, scale.reshape(1, cout_p), bias.reshape(1, cout_p))

    # Drop junk columns / channel padding; f32 output for module parity.
    out = out_flat.reshape(n, oh, row_pitch, cout_p)[:, :, :ow, :cout]
    out = out.astype(jnp.float32)
    if not nchw_out:
        return out                                     # NHWC: skip the transpose
    return jnp.transpose(out, (0, 3, 1, 2))


if __name__ == "__main__":
    key = jax.random.PRNGKey(0)
    kx, kw_key = jax.random.split(key)

    # Small shapes consistent with the module: BasicConv2d(4, 8, 3, padding=1)
    N, Cin, H, W = 2, 4, 16, 16
    Cout, KH, KW = 8, 3, 3
    stride, padding, dilation = 1, 1, 1
    eps = 1e-5

    x = jax.random.normal(kx, (N, Cin, H, W), dtype=jnp.float32)

    # kaiming_normal_(mode='fan_in', nonlinearity='relu'): std = sqrt(2 / fan_in)
    fan_in = Cin * KH * KW
    weight = jax.random.normal(kw_key, (Cout, Cin, KH, KW), dtype=jnp.float32) * jnp.sqrt(
        2.0 / fan_in)
    gamma = jnp.ones((Cout,), dtype=jnp.float32)   # BatchNorm2d default weight
    beta = jnp.zeros((Cout,), dtype=jnp.float32)   # BatchNorm2d default bias

    out = basic_conv2d(x, weight, gamma, beta, stride=stride, padding=padding,
                       dilation=dilation, eps=eps)
    out = jax.block_until_ready(out)
    assert out.shape == (N, Cout, H, W)

    # Reference: full-f32 conv + PyTorch training-mode BN (biased batch var).
    conv = lax.conv_general_dilated(
        x, weight, window_strides=(stride, stride),
        padding=((padding, padding), (padding, padding)),
        rhs_dilation=(dilation, dilation),
        dimension_numbers=("NCHW", "OIHW", "NCHW"))
    mu = conv.mean(axis=(0, 2, 3), keepdims=True)
    var = conv.var(axis=(0, 2, 3), keepdims=True)
    ref = (conv - mu) * lax.rsqrt(var + eps) * gamma.reshape(1, Cout, 1, 1) \
          + beta.reshape(1, Cout, 1, 1)

    # Tolerance covers bf16 MXU operands + bf16 conv/BN intermediates.
    assert jnp.allclose(out, ref, atol=7.5e-2, rtol=7.5e-2), "mismatch vs f32 reference"

    print("KERNEL_OK")
</pallas_src>

<mosaic_0001>
module attributes {stable_mosaic.version = 11 : i64} {
  func.func @_conv_stats_kernel(%arg0: i32, %arg1: i32, %arg2: memref<1x326x4xbf16, #tpu.memory_space<vmem>>, %arg3: memref<9x4x128xbf16, #tpu.memory_space<vmem>>, %arg4: memref<1x288x128xbf16, #tpu.memory_space<vmem>>, %arg5: memref<1x2x128xf32, #tpu.memory_space<vmem>>, %arg6: memref<288x128xf32, #tpu.memory_space<vmem>>) attributes {dimension_semantics = [#tpu.dimension_semantics<parallel>, #tpu.dimension_semantics<parallel>], iteration_bounds = array<i64: 2, 1>, scalar_prefetch = 0 : i64, scratch_operands = 1 : i64, tpu.core_type = #tpu.core_type<tc>, window_params = [{transform_indices = @transform_0, window_bounds = array<i64: 1, 326, 4>}, {transform_indices = @transform_1, window_bounds = array<i64: 9, 4, 128>}, {transform_indices = @transform_2, window_bounds = array<i64: 1, 288, 128>}, {transform_indices = @transform_3, window_bounds = array<i64: 1, 2, 128>}]} {
    %c0 = arith.constant 0 : index
    %c0_0 = arith.constant 0 : index
    %c0_1 = arith.constant 0 : index
    %0 = vector.load %arg2[%c0, %c0_0, %c0_1] : memref<1x326x4xbf16, #tpu.memory_space<vmem>>, vector<1x288x4xbf16>
    %1 = vector.shape_cast %0 : vector<1x288x4xbf16> to vector<288x4xbf16>
    %c0_2 = arith.constant 0 : index
    %c0_3 = arith.constant 0 : index
    %c0_4 = arith.constant 0 : index
    %2 = vector.load %arg3[%c0_2, %c0_3, %c0_4] : memref<9x4x128xbf16, #tpu.memory_space<vmem>>, vector<1x4x128xbf16>
    %3 = vector.shape_cast %2 : vector<1x4x128xbf16> to vector<4x128xbf16>
    %cst = arith.constant dense<0.000000e+00> : vector<288x128xf32>
    %4 = tpu.matmul %1, %3, %cst {dimension_numbers = #tpu.dot_dimension_numbers<[1], [0], [0], [1], [0, 0, 1, 1], [], []>} : vector<288x4xbf16>, vector<4x128xbf16>, vector<288x128xf32> -> vector<288x128xf32>
    %c0_5 = arith.constant 0 : index
    %c0_6 = arith.constant 0 : index
    %5 = vector.load %arg6[%c0_5, %c0_6] : memref<288x128xf32, #tpu.memory_space<vmem>>, vector<288x128xf32>
    tpu.vector_store %arg6[%c0_5, %c0_6], %4 {strides = array<i32>} : memref<288x128xf32, #tpu.memory_space<vmem>>, vector<288x128xf32>,
    %c0_7 = arith.constant 0 : index
    %c1 = arith.constant 1 : index
    %c0_8 = arith.constant 0 : index
    %6 = vector.load %arg2[%c0_7, %c1, %c0_8] : memref<1x326x4xbf16, #tpu.memory_space<vmem>>, vector<1x288x4xbf16>
    %7 = vector.shape_cast %6 : vector<1x288x4xbf16> to vector<288x4xbf16>
    %c1_9 = arith.constant 1 : index
    %c0_10 = arith.constant 0 : index
    %c0_11 = arith.constant 0 : index
    %8 = vector.load %arg3[%c1_9, %c0_10, %c0_11] : memref<9x4x128xbf16, #tpu.memory_space<vmem>>, vector<1x4x128xbf16>
    %9 = vector.shape_cast %8 : vector<1x4x128xbf16> to vector<4x128xbf16>
    %cst_12 = arith.constant dense<0.000000e+00> : vector<288x128xf32>
    %10 = tpu.matmul %7, %9, %cst_12 {dimension_numbers = #tpu.dot_dimension_numbers<[1], [0], [0], [1], [0, 0, 1, 1], [], []>} : vector<288x4xbf16>, vector<4x128xbf16>, vector<288x128xf32> -> vector<288x128xf32>
    %c0_13 = arith.constant 0 : index
    %c0_14 = arith.constant 0 : index
    %11 = vector.load %arg6[%c0_13, %c0_14] : memref<288x128xf32, #tpu.memory_space<vmem>>, vector<288x128xf32>
    %12 = arith.addf %11, %10 : vector<288x128xf32>
    %c0_15 = arith.constant 0 : index
    %c0_16 = arith.constant 0 : index
    %13 = vector.load %arg6[%c0_15, %c0_16] : memref<288x128xf32, #tpu.memory_space<vmem>>, vector<288x128xf32>
    tpu.vector_store %arg6[%c0_15, %c0_16], %12 {strides = array<i32>} : memref<288x128xf32, #tpu.memory_space<vmem>>, vector<288x128xf32>,
    %c0_17 = arith.constant 0 : index
    %c2 = arith.constant 2 : index
    %c0_18 = arith.constant 0 : index
    %14 = vector.load %arg2[%c0_17, %c2, %c0_18] : memref<1x326x4xbf16, #tpu.memory_space<vmem>>, vector<1x288x4xbf16>
    %15 = vector.shape_cast %14 : vector<1x288x4xbf16> to vector<288x4xbf16>
    %c2_19 = arith.constant 2 : index
    %c0_20 = arith.constant 0 : index
    %c0_21 = arith.constant 0 : index
    %16 = vector.load %arg3[%c2_19, %c0_20, %c0_21] : memref<9x4x128xbf16, #tpu.memory_space<vmem>>, vector<1x4x128xbf16>
    %17 = vector.shape_cast %16 : vector<1x4x128xbf16> to vector<4x128xbf16>
    %cst_22 = arith.constant dense<0.000000e+00> : vector<288x128xf32>
    %18 = tpu.matmul %15, %17, %cst_22 {dimension_numbers = #tpu.dot_dimension_numbers<[1], [0], [0], [1], [0, 0, 1, 1], [], []>} : vector<288x4xbf16>, vector<4x128xbf16>, vector<288x128xf32> -> vector<288x128xf32>
    %c0_23 = arith.constant 0 : index
    %c0_24 = arith.constant 0 : index
    %19 = vector.load %arg6[%c0_23, %c0_24] : memref<288x128xf32, #tpu.memory_space<vmem>>, vector<288x128xf32>
    %20 = arith.addf %19, %18 : vector<288x128xf32>
    %c0_25 = arith.constant 0 : index
    %c0_26 = arith.constant 0 : index
    %21 = vector.load %arg6[%c0_25, %c0_26] : memref<288x128xf32, #tpu.memory_space<vmem>>, vector<288x128xf32>
    tpu.vector_store %arg6[%c0_25, %c0_26], %20 {strides = array<i32>} : memref<288x128xf32, #tpu.memory_space<vmem>>, vector<288x128xf32>,
    %c0_27 = arith.constant 0 : index
    %c18 = arith.constant 18 : index
    %c0_28 = arith.constant 0 : index
    %22 = vector.load %arg2[%c0_27, %c18, %c0_28] : memref<1x326x4xbf16, #tpu.memory_space<vmem>>, vector<1x288x4xbf16>
    %23 = vector.shape_cast %22 : vector<1x288x4xbf16> to vector<288x4xbf16>
    %c3 = arith.constant 3 : index
    %c0_29 = arith.constant 0 : index
    %c0_30 = arith.constant 0 : index
    %24 = vector.load %arg3[%c3, %c0_29, %c0_30] : memref<9x4x128xbf16, #tpu.memory_space<vmem>>, vector<1x4x128xbf16>
    %25 = vector.shape_cast %24 : vector<1x4x128xbf16> to vector<4x128xbf16>
    %cst_31 = arith.constant dense<0.000000e+00> : vector<288x128xf32>
    %26 = tpu.matmul %23, %25, %cst_31 {dimension_numbers = #tpu.dot_dimension_numbers<[1], [0], [0], [1], [0, 0, 1, 1], [], []>} : vector<288x4xbf16>, vector<4x128xbf16>, vector<288x128xf32> -> vector<288x128xf32>
    %c0_32 = arith.constant 0 : index
    %c0_33 = arith.constant 0 : index
    %27 = vector.load %arg6[%c0_32, %c0_33] : memref<288x128xf32, #tpu.memory_space<vmem>>, vector<288x128xf32>
    %28 = arith.addf %27, %26 : vector<288x128xf32>
    %c0_34 = arith.constant 0 : index
    %c0_35 = arith.constant 0 : index
    %29 = vector.load %arg6[%c0_34, %c0_35] : memref<288x128xf32, #tpu.memory_space<vmem>>, vector<288x128xf32>
    tpu.vector_store %arg6[%c0_34, %c0_35], %28 {strides = array<i32>} : memref<288x128xf32, #tpu.memory_space<vmem>>, vector<288x128xf32>,
    %c0_36 = arith.constant 0 : index
    %c19 = arith.constant 19 : index
    %c0_37 = arith.constant 0 : index
    %30 = vector.load %arg2[%c0_36, %c19, %c0_37] : memref<1x326x4xbf16, #tpu.memory_space<vmem>>, vector<1x288x4xbf16>
    %31 = vector.shape_cast %30 : vector<1x288x4xbf16> to vector<288x4xbf16>
    %c4 = arith.constant 4 : index
    %c0_38 = arith.constant 0 : index
    %c0_39 = arith.constant 0 : index
    %32 = vector.load %arg3[%c4, %c0_38, %c0_39] : memref<9x4x128xbf16, #tpu.memory_space<vmem>>, vector<1x4x128xbf16>
    %33 = vector.shape_cast %32 : vector<1x4x128xbf16> to vector<4x128xbf16>
    %cst_40 = arith.constant dense<0.000000e+00> : vector<288x128xf32>
    %34 = tpu.matmul %31, %33, %cst_40 {dimension_numbers = #tpu.dot_dimension_numbers<[1], [0], [0], [1], [0, 0, 1, 1], [], []>} : vector<288x4xbf16>, vector<4x128xbf16>, vector<288x128xf32> -> vector<288x128xf32>
    %c0_41 = arith.constant 0 : index
    %c0_42 = arith.constant 0 : index
    %35 = vector.load %arg6[%c0_41, %c0_42] : memref<288x128xf32, #tpu.memory_space<vmem>>, vector<288x128xf32>
    %36 = arith.addf %35, %34 : vector<288x128xf32>
    %c0_43 = arith.constant 0 : index
    %c0_44 = arith.constant 0 : index
    %37 = vector.load %arg6[%c0_43, %c0_44] : memref<288x128xf32, #tpu.memory_space<vmem>>, vector<288x128xf32>
    tpu.vector_store %arg6[%c0_43, %c0_44], %36 {strides = array<i32>} : memref<288x128xf32, #tpu.memory_space<vmem>>, vector<288x128xf32>,
    %c0_45 = arith.constant 0 : index
    %c20 = arith.constant 20 : index
    %c0_46 = arith.constant 0 : index
    %38 = vector.load %arg2[%c0_45, %c20, %c0_46] : memref<1x326x4xbf16, #tpu.memory_space<vmem>>, vector<1x288x4xbf16>
    %39 = vector.shape_cast %38 : vector<1x288x4xbf16> to vector<288x4xbf16>
    %c5 = arith.constant 5 : index
    %c0_47 = arith.constant 0 : index
    %c0_48 = arith.constant 0 : index
    %40 = vector.load %arg3[%c5, %c0_47, %c0_48] : memref<9x4x128xbf16, #tpu.memory_space<vmem>>, vector<1x4x128xbf16>
    %41 = vector.shape_cast %40 : vector<1x4x128xbf16> to vector<4x128xbf16>
    %cst_49 = arith.constant dense<0.000000e+00> : vector<288x128xf32>
    %42 = tpu.matmul %39, %41, %cst_49 {dimension_numbers = #tpu.dot_dimension_numbers<[1], [0], [0], [1], [0, 0, 1, 1], [], []>} : vector<288x4xbf16>, vector<4x128xbf16>, vector<288x128xf32> -> vector<288x128xf32>
    %c0_50 = arith.constant 0 : index
    %c0_51 = arith.constant 0 : index
    %43 = vector.load %arg6[%c0_50, %c0_51] : memref<288x128xf32, #tpu.memory_space<vmem>>, vector<288x128xf32>
    %44 = arith.addf %43, %42 : vector<288x128xf32>
    %c0_52 = arith.constant 0 : index
    %c0_53 = arith.constant 0 : index
    %45 = vector.load %arg6[%c0_52, %c0_53] : memref<288x128xf32, #tpu.memory_space<vmem>>, vector<288x128xf32>
    tpu.vector_store %arg6[%c0_52, %c0_53], %44 {strides = array<i32>} : memref<288x128xf32, #tpu.memory_space<vmem>>, vector<288x128xf32>,
    %c0_54 = arith.constant 0 : index
    %c36 = arith.constant 36 : index
    %c0_55 = arith.constant 0 : index
    %46 = vector.load %arg2[%c0_54, %c36, %c0_55] : memref<1x326x4xbf16, #tpu.memory_space<vmem>>, vector<1x288x4xbf16>
    %47 = vector.shape_cast %46 : vector<1x288x4xbf16> to vector<288x4xbf16>
    %c6 = arith.constant 6 : index
    %c0_56 = arith.constant 0 : index
    %c0_57 = arith.constant 0 : index
    %48 = vector.load %arg3[%c6, %c0_56, %c0_57] : memref<9x4x128xbf16, #tpu.memory_space<vmem>>, vector<1x4x128xbf16>
    %49 = vector.shape_cast %48 : vector<1x4x128xbf16> to vector<4x128xbf16>
    %cst_58 = arith.constant dense<0.000000e+00> : vector<288x128xf32>
    %50 = tpu.matmul %47, %49, %cst_58 {dimension_numbers = #tpu.dot_dimension_numbers<[1], [0], [0], [1], [0, 0, 1, 1], [], []>} : vector<288x4xbf16>, vector<4x128xbf16>, vector<288x128xf32> -> vector<288x128xf32>
    %c0_59 = arith.constant 0 : index
    %c0_60 = arith.constant 0 : index
    %51 = vector.load %arg6[%c0_59, %c0_60] : memref<288x128xf32, #tpu.memory_space<vmem>>, vector<288x128xf32>
    %52 = arith.addf %51, %50 : vector<288x128xf32>
    %c0_61 = arith.constant 0 : index
    %c0_62 = arith.constant 0 : index
    %53 = vector.load %arg6[%c0_61, %c0_62] : memref<288x128xf32, #tpu.memory_space<vmem>>, vector<288x128xf32>
    tpu.vector_store %arg6[%c0_61, %c0_62], %52 {strides = array<i32>} : memref<288x128xf32, #tpu.memory_space<vmem>>, vector<288x128xf32>,
    %c0_63 = arith.constant 0 : index
    %c37 = arith.constant 37 : index
    %c0_64 = arith.constant 0 : index
    %54 = vector.load %arg2[%c0_63, %c37, %c0_64] : memref<1x326x4xbf16, #tpu.memory_space<vmem>>, vector<1x288x4xbf16>
    %55 = vector.shape_cast %54 : vector<1x288x4xbf16> to vector<288x4xbf16>
    %c7 = arith.constant 7 : index
    %c0_65 = arith.constant 0 : index
    %c0_66 = arith.constant 0 : index
    %56 = vector.load %arg3[%c7, %c0_65, %c0_66] : memref<9x4x128xbf16, #tpu.memory_space<vmem>>, vector<1x4x128xbf16>
    %57 = vector.shape_cast %56 : vector<1x4x128xbf16> to vector<4x128xbf16>
    %cst_67 = arith.constant dense<0.000000e+00> : vector<288x128xf32>
    %58 = tpu.matmul %55, %57, %cst_67 {dimension_numbers = #tpu.dot_dimension_numbers<[1], [0], [0], [1], [0, 0, 1, 1], [], []>} : vector<288x4xbf16>, vector<4x128xbf16>, vector<288x128xf32> -> vector<288x128xf32>
    %c0_68 = arith.constant 0 : index
    %c0_69 = arith.constant 0 : index
    %59 = vector.load %arg6[%c0_68, %c0_69] : memref<288x128xf32, #tpu.memory_space<vmem>>, vector<288x128xf32>
    %60 = arith.addf %59, %58 : vector<288x128xf32>
    %c0_70 = arith.constant 0 : index
    %c0_71 = arith.constant 0 : index
    %61 = vector.load %arg6[%c0_70, %c0_71] : memref<288x128xf32, #tpu.memory_space<vmem>>, vector<288x128xf32>
    tpu.vector_store %arg6[%c0_70, %c0_71], %60 {strides = array<i32>} : memref<288x128xf32, #tpu.memory_space<vmem>>, vector<288x128xf32>,
    %c0_72 = arith.constant 0 : index
    %c38 = arith.constant 38 : index
    %c0_73 = arith.constant 0 : index
    %62 = vector.load %arg2[%c0_72, %c38, %c0_73] : memref<1x326x4xbf16, #tpu.memory_space<vmem>>, vector<1x288x4xbf16>
    %63 = vector.shape_cast %62 : vector<1x288x4xbf16> to vector<288x4xbf16>
    %c8 = arith.constant 8 : index
    %c0_74 = arith.constant 0 : index
    %c0_75 = arith.constant 0 : index
    %64 = vector.load %arg3[%c8, %c0_74, %c0_75] : memref<9x4x128xbf16, #tpu.memory_space<vmem>>, vector<1x4x128xbf16>
    %65 = vector.shape_cast %64 : vector<1x4x128xbf16> to vector<4x128xbf16>
    %cst_76 = arith.constant dense<0.000000e+00> : vector<288x128xf32>
    %66 = tpu.matmul %63, %65, %cst_76 {dimension_numbers = #tpu.dot_dimension_numbers<[1], [0], [0], [1], [0, 0, 1, 1], [], []>} : vector<288x4xbf16>, vector<4x128xbf16>, vector<288x128xf32> -> vector<288x128xf32>
    %c0_77 = arith.constant 0 : index
    %c0_78 = arith.constant 0 : index
    %67 = vector.load %arg6[%c0_77, %c0_78] : memref<288x128xf32, #tpu.memory_space<vmem>>, vector<288x128xf32>
    %68 = arith.addf %67, %66 : vector<288x128xf32>
    %c0_79 = arith.constant 0 : index
    %c0_80 = arith.constant 0 : index
    %69 = vector.load %arg6[%c0_79, %c0_80] : memref<288x128xf32, #tpu.memory_space<vmem>>, vector<288x128xf32>
    tpu.vector_store %arg6[%c0_79, %c0_80], %68 {strides = array<i32>} : memref<288x128xf32, #tpu.memory_space<vmem>>, vector<288x128xf32>,
    %c0_81 = arith.constant 0 : index
    %c0_82 = arith.constant 0 : index
    %70 = vector.load %arg6[%c0_81, %c0_82] : memref<288x128xf32, #tpu.memory_space<vmem>>, vector<288x128xf32>
    %71 = arith.truncf %70 : vector<288x128xf32> to vector<288x128xbf16>
    %c0_83 = arith.constant 0 : index
    %c0_84 = arith.constant 0 : index
    %c0_85 = arith.constant 0 : index
    %72 = vector.load %arg4[%c0_83, %c0_84, %c0_85] : memref<1x288x128xbf16, #tpu.memory_space<vmem>>, vector<1x288x128xbf16>
    %73 = vector.shape_cast %72 : vector<1x288x128xbf16> to vector<288x128xbf16>
    %74 = vector.shape_cast %71 : vector<288x128xbf16> to vector<1x288x128xbf16>
    tpu.vector_store %arg4[%c0_83, %c0_84, %c0_85], %74 {strides = array<i32>} : memref<1x288x128xbf16, #tpu.memory_space<vmem>>, vector<1x288x128xbf16>,
    %75 = tpu.iota {dimensions = array<i32: 0>} : vector<288x128xi32>
    %c18_i32 = arith.constant 18 : i32
    %c0_i32 = arith.constant 0 : i32
    %76 = arith.cmpi eq, %c18_i32, %c0_i32 : i32
    %c1_i32 = arith.constant 1 : i32
    %77 = arith.select %76, %c1_i32, %c18_i32 : i32
    %78 = vector.broadcast %77 : i32 to vector<288x128xi32>
    %79 = arith.remsi %75, %78 : vector<288x128xi32>
    %c0_i32_86 = arith.constant 0 : i32
    %80 = vector.broadcast %c0_i32_86 : i32 to vector<288x128xi32>
    %81 = arith.cmpi ne, %79, %80 : vector<288x128xi32>
    %c0_i32_87 = arith.constant 0 : i32
    %82 = vector.broadcast %c0_i32_87 : i32 to vector<288x128xi32>
    %83 = arith.cmpi slt, %79, %82 : vector<288x128xi32>
    %c0_i32_88 = arith.constant 0 : i32
    %84 = arith.cmpi slt, %77, %c0_i32_88 : i32
    %85 = vector.broadcast %84 : i1 to vector<288x128xi1>
    %86 = vector.broadcast %85 : vector<288x128xi1> to vector<288x128xi1>
    %87 = arith.xori %83, %86 : vector<288x128xi1>
    %88 = arith.andi %87, %81 : vector<288x128xi1>
    %89 = vector.broadcast %77 : i32 to vector<288x128xi32>
    %90 = arith.addi %79, %89 : vector<288x128xi32>
    %91 = arith.select %88, %90, %79 : vector<288x128xi1>, vector<288x128xi32>
    %c16_i32 = arith.constant 16 : i32
    %92 = vector.broadcast %c16_i32 : i32 to vector<288x128xi32>
    %93 = arith.cmpi slt, %91, %92 : vector<288x128xi32>
    %cst_89 = arith.constant 0.000000e+00 : f32
    %94 = vector.broadcast %cst_89 : f32 to vector<288x128xf32>
    %95 = arith.select %93, %70, %94 : vector<288x128xi1>, vector<288x128xf32>
    %cst_90 = arith.constant dense<0.000000e+00> : vector<128xf32>
    %96 = vector.multi_reduction <add>, %95, %cst_90 [0] : vector<288x128xf32> to vector<128xf32>
    %97 = vector.shape_cast %96 : vector<128xf32> to vector<1x128xf32>
    %c0_91 = arith.constant 0 : index
    %c0_92 = arith.constant 0 : index
    %c0_93 = arith.constant 0 : index
    %98 = vector.load %arg5[%c0_91, %c0_92, %c0_93] : memref<1x2x128xf32, #tpu.memory_space<vmem>>, vector<1x1x128xf32>
    %99 = vector.shape_cast %98 : vector<1x1x128xf32> to vector<1x128xf32>
    %100 = vector.shape_cast %97 : vector<1x128xf32> to vector<1x1x128xf32>
    tpu.vector_store %arg5[%c0_91, %c0_92, %c0_93], %100 {strides = array<i32>} : memref<1x2x128xf32, #tpu.memory_space<vmem>>, vector<1x1x128xf32>,
    %101 = arith.mulf %95, %95 : vector<288x128xf32>
    %cst_94 = arith.constant dense<0.000000e+00> : vector<128xf32>
    %102 = vector.multi_reduction <add>, %101, %cst_94 [0] : vector<288x128xf32> to vector<128xf32>
    %103 = vector.shape_cast %102 : vector<128xf32> to vector<1x128xf32>
    %c0_95 = arith.constant 0 : index
    %c1_96 = arith.constant 1 : index
    %c0_97 = arith.constant 0 : index
    %104 = vector.load %arg5[%c0_95, %c1_96, %c0_97] : memref<1x2x128xf32, #tpu.memory_space<vmem>>, vector<1x1x128xf32>
    %105 = vector.shape_cast %104 : vector<1x1x128xf32> to vector<1x128xf32>
    %106 = vector.shape_cast %103 : vector<1x128xf32> to vector<1x1x128xf32>
    tpu.vector_store %arg5[%c0_95, %c1_96, %c0_97], %106 {strides = array<i32>} : memref<1x2x128xf32, #tpu.memory_space<vmem>>, vector<1x1x128xf32>,
    return
  }
  func.func @transform_0(%arg0: i32, %arg1: i32) -> (i32, i32, i32) {
    %c0_i32 = arith.constant 0 : i32
    %c0_i32_0 = arith.constant 0 : i32
    %c0_i32_1 = arith.constant 0 : i32
    return %arg0, %c0_i32, %c0_i32_0 : i32, i32, i32
  }
  func.func @transform_1(%arg0: i32, %arg1: i32) -> (i32, i32, i32) {
    %c0_i32 = arith.constant 0 : i32
    %c0_i32_0 = arith.constant 0 : i32
    %c0_i32_1 = arith.constant 0 : i32
    return %c0_i32, %c0_i32_0, %arg1 : i32, i32, i32
  }
  func.func @transform_2(%arg0: i32, %arg1: i32) -> (i32, i32, i32) {
    %c0_i32 = arith.constant 0 : i32
    %c0_i32_0 = arith.constant 0 : i32
    return %arg0, %c0_i32, %arg1 : i32, i32, i32
  }
  func.func @transform_3(%arg0: i32, %arg1: i32) -> (i32, i32, i32) {
    %c0_i32 = arith.constant 0 : i32
    %c0_i32_0 = arith.constant 0 : i32
    return %arg0, %c0_i32, %arg1 : i32, i32, i32
  }
}

</mosaic_0001>

<bundles_post_ra>
// kernel: tpu_custom_call.1
= control target key start
LH: loop header
LB: loop body
LE: loop exit
PB: predicated region body
PF: predicated region fallthrough
CT: control target
= control target key end

     0   :  { %9 = vsyncpa [#allocation4], 0  ;;  %s10201_s0 = inlined_call_operand.vmem [shape: bf16[2,326,4], index: 0, kind: input, shape index: {}]   ;;  %s10202_s1 = inlined_call_operand.vmem [shape: bf16[9,4,128], index: 1, kind: input, shape index: {}]   ;;  %s10203_s2 = inlined_call_operand.hbm [shape: bf16[2,288,128], index: 2, kind: output, shape index: {0}]   ;;  %s10204_s3 = inlined_call_operand.hbm [shape: f32[2,2,128], index: 3, kind: output, shape index: {1}]  }
   0x1   :  { %11 = vsyncpa [#allocation4 + $0x1], 0 }
   0x2   :  { %12 = vsyncpa [#allocation6], 0 }
   0x3   :  { %14 = vsyncpa [#allocation6 + $0x1], 0  ;;  %s8048_s12 = smov 0   ;;  %s8050_s13 = smov 0  }
   0x4   :  { %s8052_s14 = smov 0   ;;  %s8054_s15 = smov 0  }
   0x5   :  { %s8056_s16 = smov 0   ;;  %s8058_s17 = smov 0  }
   0x6 LB: > { %s6259_s18 = sadd.s32 4294967295, %s8022_s17   ;;  %s6260_s19 = sadd.s32 4294967294, %s8022_s17   ;;  %s8022_s17 = sphi %s8058_s17, %s20_s17   ;;  %s8018_s16 = sphi %s8056_s16, %s10583_s16   ;;  %s8014_s15 = sphi %s8054_s15, %s10582_s15   ;;  %s8010_s14 = sphi %s8052_s14, %s10581_s14   ;;  %s8006_s13 = sphi %s8050_s13, %s10580_s13   ;;  %s8002_s12 = sphi %s8048_s12, %s10579_s12  }
   0x7   : > { %s32_s20 = sadd.s32 1, %s8018_s16  ;;  %s93_s21 = sadd.s32 1, %s8010_s14 }
   0x8   : > { %p34_p0 = scmp.ge.s32.totalorder %s32_s20, 2  ;;  %p103_p1 = scmp.ne.s32.totalorder %s8010_s14, %s8006_s13 }
   0x9   : > { %p104_p2 = scmp.eq.s32.totalorder %s6259_s18, 1  ;;  %p109_p3 = scmp.ne.s32.totalorder %s8006_s13, %s8002_s12 }
   0xa   : > { %s10585_s20 = smov (%p34_p0, %s32_s20), 0  ;;  %p110_p5 = scmp.eq.s32.totalorder %s6260_s19, 1 }
   0xb   : > { %p8088_p4 = por %p104_p2, %p103_p1  ;;  %s88_s23 = ssub.s32 %s8018_s16, %s10585_s20 }
   0xc   : > { %p6264_p6 = scmp.ge.s32.totalorder %s8022_s17, 1  ;;  %p91_p7 = scmp.eq.s32.totalorder %s88_s23, 0 }
   0xd   : > { %p8095_p8 = por %p110_p5, %p109_p3  ;;  %p171_p9 = scmp.lt.s32.totalorder %s8022_s17, 3 }
   0xe   : > { %s8101_s25 = scalar_select %p91_p7, %s8010_s14, %s93_s21  }
   0xf   : > { %p172_p10 = pnand %p6264_p6, %p171_p9 }
  0x11   : > { %175 = sbr.rel (%p172_p10) target bundleno = 643 (0x283), region = 28 }
  0x18   : > { %v250_v0 = vld [vmem:[%s10202_s1] sm:$0x3]  ;;  %vm396_vm0 = vcmask 1041408   ;;  %p204_p11 = scmp.lt.s32.totalorder %s8014_s15, 1  ;;  %v6417_v2 = vld [vmem:[%s10202_s1 + $0x8] sm:$0x3] }
  0x19   : > { %7594 = vmatprep.subr.msk.bf16.mxu1 %vm396_vm0, %v250_v0  ;;  %v398_v1 = vsel %vm396_vm0, %v250_v0, 0  ;;  %7598 = vmatprep.subr.msk.bf16.mxu0 %vm396_vm0, %v6417_v2  ;;  %v8115_v3 = vsel %vm396_vm0, %v6417_v2, 0  ;;  %v6455_v4 = vld [vmem:[%s10202_s1 + $0xa] sm:$0x3]  ;;  %v6303_v5 = vld [vmem:[%s10202_s1 + $0x2] sm:$0x3] }
  0x1a   : > { %6963 = vmatpush3.bf16.msra.mxu1 %v398_v1  ;;  %s205_s30 = scalar_select %p204_p11, %s8014_s15, 1  ;;  %7115 = vmatpush3.bf16.msra.mxu0 %v8115_v3  ;;  %vm341_vm1 = vcmask 31744   ;;  %vm2391_vm2 = vsmask.f32 6400  ;;  %v8135_v7 = vld [vmem:[%s10202_s1 + $0x4] sm:$0x3] }
  0x1b   : > { %7595 = vmatprep.subr.msk.bf16.mxu1 %vm396_vm0, %v6303_v5  ;;  %7600 = vmatprep.subr.msk.bf16.mxu0 %vm396_vm0, %v6455_v4  ;;  %v949_v9 = vsel %vm396_vm0, %v6303_v5, 0  ;;  %v3129_v18 = vsel %vm396_vm0, %v6455_v4, 0  ;;  %v8160_v40 = vld [vmem:[%s10202_s1 + $0xc] sm:$0x3]  ;;  %vm3036_vm3 = vcmask 1045504   ;;  %vm1368_vm5 = vcmask 1046528  }
  0x1c   : > { %s7605_s8 = smul.u32 164, %s205_s30  ;;  %vm745_vm4 = vsmask.f32 7424  ;;  %vm4059_vm6 = vsmask.f32 5376  ;;  %vm4704_vm7 = vcmask 1044480  }
  0x1d   : > { %s9382_s7 = sand.u32 1, %s8006_s13   ;;  %s7678_s10 = smul.u32 2304, %s8014_s15 }
  0x1e   : > { %s8129_s11 = scalar_lea.vmem %s10201_s0, %s7605_s8  ;;  %s7604_s8 = smul.u32 144, %s9382_s7 }
  0x1f   : > { %v7741_v6 = vld [vmem:[%s8129_s11] sm:$0xff]   ;;  %v7742_v8 = vld [vmem:[%s8129_s11 + $0x8] sm:$0xff]   ;;  %v7744_v11 = vld [vmem:[%s8129_s11 + $0x10] sm:$0xff]   ;;  %s10120_s21 = scalar_lea.hbm %s10203_s2, %s7678_s10  ;;  %s6106_s23 = scalar_lea.sflag [#allocation4], %s9382_s7 }
  0x20   : > { %6964 = vmatprep.mubr.msk.bf16.mxu1 %vm341_vm1, %v7741_v6  ;;  %v7743_v10 = vld [vmem:[%s8129_s11 + $0x8] sm:$0xfe]   ;;  %v7745_v12 = vld [vmem:[%s8129_s11 + $0x10] sm:$0xff]   ;;  %v2401_v15 = vshrl.u32 %v7744_v11, 16  ;;  %v2404_v16 = vshll.u32 %v7744_v11, 16  ;;  %v7746_v17 = vld [vmem:[%s8129_s11 + $0x18] sm:$0xff]  }
  0x21   : > { %6965 = vmatmul.mubr.msk.bf16.vlgmr.msra.gmra.mrb[0].mxu1 %vm341_vm1, %v7742_v8  ;;  %v2393_v13 = vshrl.u32 %v7743_v10, 16  ;;  %v2396_v14 = vshll.u32 %v7743_v10, 16  ;;  %v2410_v23 = vshrl.u32 %v7746_v17, 16  ;;  %v2413_v24 = vshll.u32 %v7746_v17, 16  ;;  %v7747_v25 = vld [vmem:[%s8129_s11 + $0x18] sm:$0xff]   ;;  %v7748_v26 = vld [vmem:[%s8129_s11 + $0x20] sm:$0xff]  }
  0x22   : > { %7001 = vmatpush3.bf16.msra.mxu1 %v949_v9  ;;  %6968 = vmatprep.mubr.msk.bf16.mxu1 %vm341_vm1, %v7745_v12  ;;  %v2403_v21 = vrot.slane %v2401_v15, 1  ;;  %v2406_v22 = vrot.slane %v2404_v16, 2  ;;  %v2419_v31 = vshrl.u32 %v7748_v26, 16  ;;  %v2422_v32 = vshll.u32 %v7748_v26, 16  ;;  %v7749_v33 = vld [vmem:[%s8129_s11 + $0x20] sm:$0xff]   ;;  %v7750_v34 = vld [vmem:[%s8129_s11 + $0x28] sm:$0xff]  }
  0x23   : > { %7596 = vmatprep.subr.msk.bf16.mxu1 %vm396_vm0, %v8135_v7  ;;  %v2395_v19 = vrot.slane %v2393_v13, 1  ;;  %v2398_v20 = vrot.slane %v2396_v14, 2  ;;  %v2412_v29 = vrot.slane %v2410_v23, 1  ;;  %v2415_v30 = vrot.slane %v2413_v24, 2  ;;  %v7751_v42 = vld [vmem:[%s8129_s11 + $0x28] sm:$0xff]   ;;  %v7752_v43 = vld [vmem:[%s8129_s11 + $0x30] sm:$0xff]  }
  0x24   : > { %v2407_v28 = vor.u32 %v2406_v22, %v2403_v21  ;;  %v2421_v37 = vrot.slane %v2419_v31, 1  ;;  %v2424_v38 = vrot.slane %v2422_v32, 2  ;;  %v2428_v39 = vshrl.u32 %v7750_v34, 16  ;;  %v7753_v47 = vld [vmem:[%s8129_s11 + $0x30] sm:$0xff]   ;;  %v7754_v51 = vld [vmem:[%s8129_s11 + $0x38] sm:$0xff]   ;;  %v7756_v58 = vld [vmem:[%s8129_s11 + $0x40] sm:$0xff]  }
  0x25   : > { %v2399_v27 = vor.u32 %v2398_v20, %v2395_v19  ;;  %v2416_v36 = vor.u32 %v2415_v30, %v2412_v29  ;;  %v2431_v41 = vshll.u32 %v7750_v34, 16  ;;  %v2437_v49 = vshrl.u32 %v7752_v43, 16  ;;  %v7758_v1 = vld [vmem:[%s8129_s11 + $0x48] sm:$0xff]   ;;  %v7755_v4 = vld [vmem:[%s8129_s11 + $0x38] sm:$0xff]   ;;  %v7760_v8 = vld [vmem:[%s8129_s11 + $0x50] sm:$0xff]   ;;  %s9541_s9 = scalar_lea.vmem [#allocation3], %s7604_s8 }
  0x26   : > { %v2425_v45 = vor.u32 %v2424_v38, %v2421_v37  ;;  %v2430_v46 = vrot.slane %v2428_v39, 1  ;;  %v2440_v50 = vshll.u32 %v7752_v43, 16  ;;  %v2446_v56 = vshrl.u32 %v7754_v51, 16  ;;  %v7757_v12 = vld [vmem:[%s8129_s11 + $0x40] sm:$0xff]   ;;  %v7759_v23 = vld [vmem:[%s8129_s11 + $0x48] sm:$0xff]   ;;  %v7761_v24 = vld [vmem:[%s8129_s11 + $0x50] sm:$0xff]  }
  0x27   : > { %v2408_v35 = vsel %vm2391_vm2, %v2399_v27, %v2407_v28  ;;  %v2417_v44 = vsel %vm2391_vm2, %v2407_v28, %v2416_v36  ;;  %v2433_v48 = vrot.slane %v2431_v41, 2  ;;  %v2439_v54 = vrot.slane %v2437_v49, 1  ;;  %v7765_v29 = vld [vmem:[%s8129_s11 + $0x10] sm:$0xff]   ;;  %v7764_v34 = vld [vmem:[%s8129_s11 + $0x8] sm:$0xfc]   ;;  %v7766_v37 = vld [vmem:[%s8129_s11 + $0x60] sm:$0xff]  }
  0x28   : > { %7116 = vmatprep.mubr.msk.bf16.mxu0 %vm341_vm1, %v2408_v35  ;;  %v2426_v52 = vsel %vm2391_vm2, %v2416_v36, %v2425_v45  ;;  %v2442_v55 = vrot.slane %v2440_v50, 2  ;;  %v2449_v57 = vshll.u32 %v7754_v51, 16  ;;  %v2448_v60 = vrot.slane %v2446_v56, 1  ;;  %v7763_v35 = vld [vmem:[%s8129_s11 + $0x58] sm:$0xff]   ;;  %v7778_v49 = vld [vmem:[%s8129_s11] sm:$0xff]   ;;  %v7771_v50 = vld [vmem:[%s8129_s11 + $0x28] sm:$0xff]  }
  0x29   : > { %6969 = vmatmul.mubr.msk.bf16.gmra.mrb[4].mxu1 %vm341_vm1, %v7747_v25  ;;  %7117 = vmatmul.mubr.msk.bf16.vlgmr.msra.gmra.mrb[0].mxu0 %vm341_vm1, %v2417_v44  ;;  %v2434_v53 = vor.u32 %v2433_v48, %v2430_v46  ;;  %v2455_v63 = vshrl.u32 %v7756_v58, 16  ;;  %v2458_v0 = vshll.u32 %v7756_v58, 16  ;;  %v2464_v9 = vshrl.u32 %v7758_v1, 16  ;;  %v7769_v44 = vld [vmem:[%s8129_s11 + $0x20] sm:$0xff]   ;;  %s8024_s27 = smov [#allocation3]  }
  0x2a   : > { %6972 = vmatprep.mubr.msk.bf16.mxu1 %vm341_vm1, %v7749_v33  ;;  %7153 = vmatpush3.bf16.msra.mxu0 %v3129_v18  ;;  %v2443_v59 = vor.u32 %v2442_v55, %v2439_v54  ;;  %v2451_v62 = vrot.slane %v2449_v57, 2  ;;  %v2467_v10 = vshll.u32 %v7758_v1, 16  ;;  %v2473_v14 = vshrl.u32 %v7760_v8, 16  ;;  %v7762_v18 = vld [vmem:[%s8129_s11 + $0x58] sm:$0xff]   ;;  %v7773_v55 = vld [vmem:[%s8129_s11 + $0x30] sm:$0xff]   ;;  %s7916_s28 = sshll.u32 %s8024_s27, 4  ;;  %s7917_s28 = int_to_ptr.vmem [resolvable:$false] %s7916_s28 }
  0x2b   : > { %7120 = vmatprep.mubr.msk.bf16.mxu0 %vm341_vm1, %v2426_v52  ;;  %7601 = vmatprep.subr.msk.bf16.mxu0 %vm396_vm0, %v8160_v40  ;;  %v2435_v61 = vsel %vm2391_vm2, %v2425_v45, %v2434_v53  ;;  %v2457_v5 = vrot.slane %v2455_v63, 1  ;;  %v2460_v6 = vrot.slane %v2458_v0, 2  ;;  %v2476_v15 = vshll.u32 %v7760_v8, 16  ;;  %v7768_v45 = vld [vmem:[%s8129_s11 + $0x68] sm:$0xff]   ;;  %v7775_v0 = vld [vmem:[%s8129_s11 + $0x38] sm:$0xff]   ;;  %v7781_v1 = vld [vmem:[%s8129_s11 + $0x10] sm:$0xff]  }
  0x2c   : > { %v2444_v2 = vsel %vm2391_vm2, %v2434_v53, %v2443_v59  ;;  %v2452_v11 = vor.u32 %v2451_v62, %v2448_v60  ;;  %v2466_v16 = vrot.slane %v2464_v9, 1  ;;  %v2469_v17 = vrot.slane %v2467_v10, 2  ;;  %v7779_v53 = vld [vmem:[%s8129_s11 + $0x8] sm:$0xff]   ;;  %s7918_s29 = scalar_lea.vmem %s7917_s28, 4608 }
  0x2d   : > { %v2461_v13 = vor.u32 %v2460_v6, %v2457_v5  ;;  %v2475_v21 = vrot.slane %v2473_v14, 1  ;;  %v2478_v22 = vrot.slane %v2476_v15, 2  ;;  %v2482_v26 = vshrl.u32 %v7762_v18, 16  ;;  %v8228_v57 = vld [vmem:[%s10202_s1 + $0xe] sm:$0x3]  ;;  %v7783_v6 = vld [vmem:[%s8129_s11 + $0x18] sm:$0xff]  }
  0x2e   : > { %v2453_v19 = vsel %vm2391_vm2, %v2443_v59, %v2452_v11  ;;  %v2470_v25 = vor.u32 %v2469_v17, %v2466_v16  ;;  %v2485_v27 = vshll.u32 %v7762_v18, 16  ;;  %v3037_v38 = vrot.slane %v7764_v34, 2  ;;  %v7772_v59 = vld [vmem:[%s8129_s11 + $0x78] sm:$0xff]   ;;  %v7776_v10 = vld [vmem:[%s8129_s11 + $0x88] sm:$0xff]  }
  0x2f   : > { %v2462_v20 = vsel %vm2391_vm2, %v2452_v11, %v2461_v13  ;;  %v2479_v28 = vor.u32 %v2478_v22, %v2475_v21  ;;  %v2484_v31 = vrot.slane %v2482_v26, 1  ;;  %v3038_v39 = vrot.slane %v7765_v29, 2  ;;  %v7780_v18 = vld [vmem:[%s8129_s11 + $0x48] sm:$0xff]  }
  0x30   : > { %v2471_v30 = vsel %vm2391_vm2, %v2461_v13, %v2470_v25  ;;  %v2487_v32 = vrot.slane %v2485_v27, 2  ;;  %v3042_v48 = vrot.slane %v7769_v44, 2  ;;  %v3640_v52 = vsel %vm396_vm0, %v8160_v40, 0  ;;  %v7774_v40 = vld [vmem:[%s8129_s11 + $0x80] sm:$0xff]   ;;  %v7787_v27 = vld [vmem:[%s8129_s11 + $0x28] sm:$0xff]   ;;  %v7791_v44 = vld [vmem:[%s8129_s11 + $0x38] sm:$0xff]  }
  0x31   : > { %6973 = vmatmul.mubr.msk.bf16.gmra.mrb[8].mxu1 %vm341_vm1, %v7751_v42  ;;  %7121 = vmatmul.mubr.msk.bf16.gmra.mrb[4].mxu0 %vm341_vm1, %v2435_v61  ;;  %v2480_v33 = vsel %vm2391_vm2, %v2470_v25, %v2479_v28  ;;  %v7767_v42 = vld [vmem:[%s8129_s11 + $0x18] sm:$0xff]   ;;  %v3039_v43 = vsel %vm3036_vm3, %v3037_v38, %v3038_v39  ;;  %v749_v56 = vshll.u32 %v7778_v49, 16  ;;  %v3044_v58 = vrot.slane %v7771_v50, 2 }
  0x32   : > { %6976 = vmatprep.mubr.msk.bf16.mxu1 %vm341_vm1, %v7753_v47  ;;  %7124 = vmatprep.mubr.msk.bf16.mxu0 %vm341_vm1, %v2444_v2  ;;  %v8201_v36 = vor.u32 %v2487_v32, %v2484_v31  ;;  %v3040_v46 = vrot.slane %v7767_v42, 2  ;;  %v7770_v47 = vld [vmem:[%s8129_s11 + $0x70] sm:$0xff]   ;;  %v754_v60 = vshll.u32 %v7779_v53, 16  ;;  %v3046_v61 = vrot.slane %v7773_v55, 2  ;;  %v7784_v38 = vld [vmem:[%s8129_s11 + $0x58] sm:$0xff]  }
  0x33   : > { %v747_v62 = vshrl.u32 %v7778_v49, 16  ;;  %v751_v63 = vrot.slane %v749_v56, 1  ;;  %v3045_v2 = vsel %vm3036_vm3, %v3042_v48, %v3044_v58  ;;  %v762_v11 = vshll.u32 %v7781_v1, 16  ;;  %v7788_v56 = vld [vmem:[%s8129_s11 + $0x68] sm:$0xff]  }
  0x34   : > { %v2489_v41 = vsel %vm2391_vm2, %v2479_v28, %v8201_v36  ;;  %v3041_v51 = vsel %vm3036_vm3, %v3038_v39, %v3040_v46  ;;  %v3043_v54 = vsel %vm3036_vm3, %v3040_v46, %v3042_v48  ;;  %v756_v5 = vrot.slane %v754_v60, 1 }
  0x35   : > { %v3047_v8 = vsel %vm3036_vm3, %v3044_v58, %v3046_v61  ;;  %v752_v9 = vor.u32 %v751_v63, %v747_v62  ;;  %v758_v13 = vshrl.u32 %v7779_v53, 16  ;;  %v766_v16 = vshrl.u32 %v7781_v1, 16  ;;  %v7795_v1 = vld [vmem:[%s8129_s11 + $0x48] sm:$0xff]  }
  0x36   : > { %v770_v17 = vshll.u32 %v7783_v6, 16  ;;  %v1461_v28 = vsel %vm396_vm0, %v8135_v7, 0  ;;  %v3052_v29 = vrot.slane %v7780_v18, 2  ;;  %v7786_v7 = vld [vmem:[%s8129_s11 + $0x60] sm:$0xff]   ;;  %v3056_v48 = vrot.slane %v7784_v38, 2 }
  0x37   : > { %v757_v15 = vsel %vm745_vm4, %v752_v9, %v756_v5  ;;  %v760_v22 = vor.u32 %v758_v13, %v756_v5  ;;  %v3058_v49 = vrot.slane %v7786_v7, 2 }
  0x38   : > { %v772_v26 = vrot.slane %v770_v17, 1  ;;  %v7794_v17 = vld [vmem:[%s8129_s11 + $0x80] sm:$0xff]  }
  0x39   : > { %6977 = vmatmul.mubr.msk.bf16.gmra.mrb[12].mxu1 %vm341_vm1, %v7755_v4  ;;  %7125 = vmatmul.mubr.msk.bf16.gmra.mrb[8].mxu0 %vm341_vm1, %v2453_v19  ;;  %v7777_v4 = vld [vmem:[%s8129_s11 + $0x40] sm:$0xff]   ;;  %v764_v19 = vrot.slane %v762_v11, 1  ;;  %v3059_v62 = vsel %vm3036_vm3, %v3056_v48, %v3058_v49  ;;  %v818_v11 = vshll.u32 %v7795_v1, 16 }
  0x3a   : > { %6980 = vmatprep.mubr.msk.bf16.mxu1 %vm341_vm1, %v7757_v12  ;;  %7128 = vmatprep.mubr.msk.bf16.mxu0 %vm341_vm1, %v2462_v20  ;;  %v3048_v12 = vrot.slane %v7775_v0, 2  ;;  %v3050_v14 = vrot.slane %v7777_v4, 2  ;;  %v7785_v20 = vld [vmem:[%s8129_s11 + $0x20] sm:$0xff]  }
  0x3b   : > { %v768_v25 = vor.u32 %v766_v16, %v764_v19  ;;  %v765_v31 = vsel %vm745_vm4, %v760_v22, %v764_v19  ;;  %v8297_v22 = vld [vmem:[%s10202_s1 + $0x6] sm:$0x3] }
  0x3c   : > { %v3049_v21 = vsel %vm3036_vm3, %v3046_v61, %v3048_v12  ;;  %v3053_v42 = vsel %vm3036_vm3, %v3050_v14, %v3052_v29  ;;  %v7790_v61 = vld [vmem:[%s8129_s11 + $0x70] sm:$0xff]  }
  0x3d   : > { %v773_v34 = vsel %vm745_vm4, %v768_v25, %v772_v26 }
  0x41   : > { %6981 = vmatmul.mubr.msk.bf16.gmra.mrb[16].mxu1 %vm341_vm1, %v7759_v23  ;;  %7129 = vmatmul.mubr.msk.bf16.gmra.mrb[12].mxu0 %vm341_vm1, %v2471_v30  ;;  %v7782_v23 = vld [vmem:[%s8129_s11 + $0x50] sm:$0xff]   ;;  %v778_v30 = vshll.u32 %v7785_v20, 16 }
  0x42   : > { %6984 = vmatprep.mubr.msk.bf16.mxu1 %vm341_vm1, %v7761_v24  ;;  %7132 = vmatprep.mubr.msk.bf16.mxu0 %vm341_vm1, %v2480_v33  ;;  %v3051_v24 = vsel %vm3036_vm3, %v3048_v12, %v3050_v14  ;;  %v3054_v32 = vrot.slane %v7782_v23, 2  ;;  %v774_v33 = vshrl.u32 %v7783_v6, 16  ;;  %v3062_v6 = vrot.slane %v7790_v61, 2  ;;  %v7792_v12 = vld [vmem:[%s8129_s11 + $0x78] sm:$0xff]   ;;  %v7797_v14 = vld [vmem:[%s8129_s11 + $0x50] sm:$0xff]  }
  0x43   : > { %v780_v39 = vrot.slane %v778_v30, 1  ;;  %v826_v23 = vshll.u32 %v7797_v14, 16 }
  0x49   : > { %6985 = vmatmul.mubr.msk.bf16.gmra.mrb[20].mxu1 %vm341_vm1, %v7763_v35  ;;  %7133 = vmatmul.mubr.msk.bf16.gmra.mrb[16].mxu0 %vm341_vm1, %v2489_v41  ;;  %v782_v35 = vshrl.u32 %v7785_v20, 16  ;;  %v7789_v41 = vld [vmem:[%s8129_s11 + $0x30] sm:$0xff]   ;;  %v820_v20 = vrot.slane %v818_v11, 1  ;;  %v7805_v11 = vld [vmem:[%s8129_s11 + $0x20] sm:$0xff]  }
  0x4a   : > { %6988 = vmatprep.mubr.msk.bf16.mxu1 %vm341_vm1, %v7766_v37  ;;  %7154 = vmatprep.mubr.msk.bf16.mxu0 %vm341_vm1, %v3039_v43  ;;  %v786_v37 = vshll.u32 %v7787_v27, 16  ;;  %v776_v43 = vor.u32 %v774_v33, %v772_v26  ;;  %v794_v50 = vshll.u32 %v7789_v41, 16  ;;  %v798_v53 = vshrl.u32 %v7789_v41, 16  ;;  %v7801_v33 = vld [vmem:[%s8129_s11 + $0x60] sm:$0xff]   ;;  %v7804_v41 = vld [vmem:[%s8129_s11 + $0x68] sm:$0xff]  }
  0x4b   : > { %v784_v46 = vor.u32 %v782_v35, %v780_v39  ;;  %v3066_v26 = vrot.slane %v7794_v17, 2  ;;  %v7812_v17 = vld [vmem:[%s8129_s11 + $0x88] sm:$0xff]  }
  0x4c   : > { %v796_v58 = vrot.slane %v794_v50, 1  ;;  %v850_v50 = vshll.u32 %v7804_v41, 16 }
  0x4e   : > { %v800_v63 = vor.u32 %v798_v53, %v796_v58 }
  0x51   : > { %6989 = vmatmul.mubr.msk.bf16.gmra.mrb[24].mxu1 %vm341_vm1, %v7768_v45  ;;  %7155 = vmatmul.mubr.msk.bf16.vlgmr.msra.gmra.mrb[0].mxu0 %vm341_vm1, %v3041_v51  ;;  %v3055_v45 = vsel %vm3036_vm3, %v3052_v29, %v3054_v32  ;;  %v781_v51 = vsel %vm745_vm4, %v776_v43, %v780_v39  ;;  %v830_v29 = vshrl.u32 %v7797_v14, 16  ;;  %v842_v43 = vshll.u32 %v7801_v33, 16 }
  0x52   : > { %6992 = vmatprep.mubr.msk.bf16.mxu1 %vm341_vm1, %v7770_v47  ;;  %7191 = vmatpush3.bf16.msra.mxu0 %v3640_v52  ;;  %v788_v47 = vrot.slane %v786_v37, 1  ;;  %v790_v52 = vshrl.u32 %v7787_v27, 16  ;;  %v822_v27 = vshrl.u32 %v7795_v1, 16  ;;  %v7798_v37 = vld [vmem:[%s8129_s11 + $0x90] sm:$0xff]   ;;  %v854_v1 = vshrl.u32 %v7804_v41, 16 }
  0x53   : > { %7158 = vmatprep.mubr.msk.bf16.mxu0 %vm341_vm1, %v3043_v54  ;;  %7602 = vmatprep.subr.msk.bf16.mxu0 %vm396_vm0, %v8228_v57  ;;  %v802_v54 = vshll.u32 %v7791_v44, 16 }
  0x54   : > { %v789_v55 = vsel %vm745_vm4, %v784_v46, %v788_v47  ;;  %v792_v60 = vor.u32 %v790_v52, %v788_v47  ;;  %v824_v35 = vor.u32 %v822_v27, %v820_v20  ;;  %v7806_v52 = vld [vmem:[%s8129_s11 + $0x70] sm:$0xff]  }
  0x55   : > { %v804_v0 = vrot.slane %v802_v54, 1  ;;  %v7809_v27 = vld [vmem:[%s8129_s11 + $0x30] sm:$0xff]  }
  0x56   : > { %v797_v5 = vsel %vm745_vm4, %v792_v60, %v796_v58  ;;  %v7802_v58 = vld [vmem:[%s8129_s11 + $0x10] sm:$0xfc]   ;;  %v7808_v60 = vld [vmem:[%s8129_s11 + $0x78] sm:$0xff]  }
  0x57   : > { %v805_v9 = vsel %vm745_vm4, %v800_v63, %v804_v0 }
  0x59   : > { %6993 = vmatmul.mubr.msk.bf16.gmra.mrb[28].mxu1 %vm341_vm1, %v7772_v59  ;;  %7159 = vmatmul.mubr.msk.bf16.gmra.mrb[4].mxu0 %vm341_vm1, %v3045_v2  ;;  %v7793_v59 = vld [vmem:[%s8129_s11 + $0x40] sm:$0xff]   ;;  %v3060_v2 = vrot.slane %v7788_v56, 2 }
  0x5a   : > { %6996 = vmatprep.mubr.msk.bf16.mxu1 %vm341_vm1, %v7774_v40  ;;  %7162 = vmatprep.mubr.msk.bf16.mxu0 %vm341_vm1, %v3047_v8  ;;  %v3057_v40 = vsel %vm3036_vm3, %v3054_v32, %v3056_v48  ;;  %v810_v4 = vshll.u32 %v7793_v59, 16  ;;  %v806_v8 = vshrl.u32 %v7791_v44, 16  ;;  %v828_v32 = vrot.slane %v826_v23, 1  ;;  %v7800_v48 = vld [vmem:[%s8129_s11 + $0x98] ss:$0 sps:$4 sm:$0x33]  }
  0x5b   : > { %v3063_v18 = vsel %vm3036_vm3, %v3060_v2, %v3062_v6  ;;  %v3072_v61 = vrot.slane %v7800_v48, 2  ;;  %v870_v23 = vshrl.u32 %v7808_v60, 16 }
  0x5c   : > { %v812_v13 = vrot.slane %v810_v4, 1  ;;  %v808_v16 = vor.u32 %v806_v8, %v804_v0  ;;  %v832_v39 = vor.u32 %v830_v29, %v828_v32  ;;  %v829_v44 = vsel %vm745_vm4, %v824_v35, %v828_v32  ;;  %v7810_v8 = vld [vmem:[%s8129_s11 + $0x80] sm:$0xff]   ;;  %v7814_v29 = vld [vmem:[%s8129_s11 + $0x90] ss:$0 sps:$4 sm:$0x11]   ;;  %v7811_v32 = vld [vmem:[%s8129_s11 + $0x38] sm:$0xff]  }
  0x5d   : > { %v3557_v41 = vrot.slane %v7811_v32, 2  ;;  %v7831_v32 = vld [vmem:[%s8129_s11 + $0x40] sm:$0xff]  }
  0x5e   : > { %v813_v25 = vsel %vm745_vm4, %v808_v16, %v812_v13 }
  0x61   : > { %6997 = vmatmul.mubr.msk.bf16.gmra.mrb[32].mxu1 %vm341_vm1, %v7776_v10  ;;  %7163 = vmatmul.mubr.msk.bf16.gmra.mrb[8].mxu0 %vm341_vm1, %v3049_v21  ;;  %v814_v10 = vshrl.u32 %v7793_v59, 16  ;;  %v7799_v21 = vld [vmem:[%s8129_s11 + $0x58] sm:$0xff]  }
  0x62   : > { %7002 = vmatprep.mubr.msk.bf16.mxu1 %vm341_vm1, %v757_v15  ;;  %7166 = vmatprep.mubr.msk.bf16.mxu0 %vm341_vm1, %v3051_v24  ;;  %v3061_v15 = vsel %vm3036_vm3, %v3058_v49, %v3060_v2  ;;  %v3064_v24 = vrot.slane %v7792_v12, 2  ;;  %v834_v30 = vshll.u32 %v7799_v21, 16  ;;  %v838_v46 = vshrl.u32 %v7799_v21, 16 }
  0x63   : > { %v816_v19 = vor.u32 %v814_v10, %v812_v13  ;;  %v846_v49 = vshrl.u32 %v7801_v33, 16  ;;  %v3548_v2 = vrot.slane %v7802_v58, 2  ;;  %v7807_v13 = vld [vmem:[%s8129_s11 + $0x28] sm:$0xff]   ;;  %v4285_v33 = vsel %vm396_vm0, %v8228_v57, 0 }
  0x64   : > { %v3067_v38 = vsel %vm3036_vm3, %v3064_v24, %v3066_v26  ;;  %v836_v7 = vrot.slane %v834_v30, 1  ;;  %v3553_v21 = vrot.slane %v7807_v13, 2 }
  0x66   : > { %v837_v47 = vsel %vm745_vm4, %v832_v39, %v836_v7  ;;  %v840_v54 = vor.u32 %v838_v46, %v836_v7  ;;  %v890_v39 = vshll.u32 %v7814_v29, 16  ;;  %v3555_v7 = vrot.slane %v7809_v27, 2  ;;  %v7813_v46 = vld [vmem:[%s8129_s11 + $0x40] sm:$0xff]  }
  0x68   : > { %v3556_v48 = vsel %vm3036_vm3, %v3553_v21, %v3555_v7 }
  0x69   : > { %7003 = vmatmul.mubr.msk.bf16.vlgmr.msra.gmra.mrb[0].mxu1 %vm341_vm1, %v765_v31  ;;  %7167 = vmatmul.mubr.msk.bf16.gmra.mrb[12].mxu0 %vm341_vm1, %v3053_v42  ;;  %v7796_v31 = vld [vmem:[%s8129_s11 + $0x88] sm:$0xff]  }
  0x6a   : > { %7006 = vmatprep.mubr.msk.bf16.mxu1 %vm341_vm1, %v773_v34  ;;  %7039 = vmatpush3.bf16.msra.mxu1 %v1461_v28  ;;  %v821_v28 = vsel %vm745_vm4, %v816_v19, %v820_v20  ;;  %v3065_v34 = vsel %vm3036_vm3, %v3062_v6, %v3064_v24  ;;  %v3068_v42 = vrot.slane %v7796_v31, 2  ;;  %v866_v6 = vshll.u32 %v7808_v60, 16  ;;  %v7818_v60 = vld [vmem:[%s8129_s11 + $0x50] sm:$0xff]  }
  0x6b   : > { %7170 = vmatprep.mubr.msk.bf16.mxu0 %vm341_vm1, %v3055_v45  ;;  %7597 = vmatprep.subr.msk.bf16.mxu1 %vm396_vm0, %v8297_v22  ;;  %v3070_v45 = vrot.slane %v7798_v37, 2  ;;  %v3551_v19 = vrot.slane %v7805_v11, 2 }
  0x6c   : > { %v3069_v53 = vsel %vm3036_vm3, %v3066_v26, %v3068_v42  ;;  %v868_v16 = vrot.slane %v866_v6, 1  ;;  %v882_v26 = vshll.u32 %v7812_v17, 16  ;;  %v7823_v6 = vld [vmem:[%s8129_s11 + $0x20] sm:$0xff]  }
  0x6d   : > { %v3071_v56 = vsel %vm3036_vm3, %v3068_v42, %v3070_v45  ;;  %v3073_v10 = vsel %vm3036_vm3, %v3070_v45, %v3072_v61  ;;  %v886_v42 = vshrl.u32 %v7812_v17, 16  ;;  %v7816_v45 = vld [vmem:[%s8129_s11] sm:$0xfe]   ;;  %v1376_v13 = vrot.slane %v7823_v6, 1 }
  0x6e   : > { %v872_v31 = vor.u32 %v870_v23, %v868_v16  ;;  %v884_v37 = vrot.slane %v882_v26, 1  ;;  %v7829_v23 = vld [vmem:[%s8129_s11 + $0x38] sm:$0xff]   ;;  %v7843_v6 = vld [vmem:[%s8129_s11 + $0x20] sm:$0xff]  }
  0x6f   : > { %v1382_v29 = vrot.slane %v7829_v23, 1 }
  0x71   : > { %7007 = vmatmul.mubr.msk.bf16.gmra.mrb[4].mxu1 %vm341_vm1, %v781_v51  ;;  %7171 = vmatmul.mubr.msk.bf16.gmra.mrb[16].mxu0 %vm341_vm1, %v3057_v40  ;;  %v844_v51 = vrot.slane %v842_v43, 1  ;;  %v852_v40 = vrot.slane %v850_v50, 1  ;;  %v7817_v43 = vld [vmem:[%s8129_s11 + $0x8] sm:$0xff]   ;;  %v3558_v50 = vsel %vm3036_vm3, %v3555_v7, %v3557_v41  ;;  %v1384_v7 = vrot.slane %v7831_v32, 1 }
  0x72   : > { %7010 = vmatprep.mubr.msk.bf16.mxu1 %vm341_vm1, %v789_v55  ;;  %7174 = vmatprep.mubr.msk.bf16.mxu0 %vm341_vm1, %v3059_v62  ;;  %v7803_v55 = vld [vmem:[%s8129_s11 + $0x18] sm:$0xff]   ;;  %v858_v62 = vshll.u32 %v7806_v52, 16 }
  0x73   : > { %v848_v59 = vor.u32 %v846_v49, %v844_v51  ;;  %v845_v63 = vsel %vm745_vm4, %v840_v54, %v844_v51  ;;  %v3549_v0 = vrot.slane %v7803_v55, 2  ;;  %v856_v12 = vor.u32 %v854_v1, %v852_v40  ;;  %v7815_v51 = vld [vmem:[%s8129_s11 + $0x48] sm:$0xff]  }
  0x74   : > { %v888_v49 = vor.u32 %v886_v42, %v884_v37  ;;  %v3559_v54 = vrot.slane %v7813_v46, 2  ;;  %v3561_v58 = vrot.slane %v7815_v51, 2 }
  0x75   : > { %v853_v4 = vsel %vm745_vm4, %v848_v59, %v852_v40  ;;  %v3550_v14 = vsel %vm3036_vm3, %v3548_v2, %v3549_v0  ;;  %v3552_v30 = vsel %vm3036_vm3, %v3549_v0, %v3551_v19  ;;  %v7821_v40 = vld [vmem:[%s8129_s11 + $0x18] sm:$0xff]   ;;  %v3563_v2 = vrot.slane %v7818_v60, 2 }
  0x76   : > { %v3560_v61 = vsel %vm3036_vm3, %v3557_v41, %v3559_v54  ;;  %v3562_v0 = vsel %vm3036_vm3, %v3559_v54, %v3561_v58  ;;  %v1374_v1 = vrot.slane %v7821_v40, 1  ;;  %v7832_v41 = vld [vmem:[%s8129_s11 + $0x88] sm:$0xff]   ;;  %v7836_v54 = vld [vmem:[%s8129_s11 + $0x98] sm:$0xff]  }
  0x77   : > { %v3564_v11 = vsel %vm3036_vm3, %v3561_v58, %v3563_v2  ;;  %v3577_v46 = vrot.slane %v7832_v41, 2  ;;  %v7839_v58 = vld [vmem:[%s8129_s11 + $0x60] sm:$0xff]   ;;  %v7842_v40 = vld [vmem:[%s8129_s11 + $0x68] sm:$0xff]  }
  0x79   : > { %7011 = vmatmul.mubr.msk.bf16.gmra.mrb[8].mxu1 %vm341_vm1, %v797_v5  ;;  %7175 = vmatmul.mubr.msk.bf16.gmra.mrb[20].mxu0 %vm341_vm1, %v3061_v15  ;;  %v862_v5 = vshrl.u32 %v7806_v52, 16  ;;  %v1369_v52 = vrot.slane %v7816_v45, 1  ;;  %v7835_v45 = vld [vmem:[%s8129_s11 + $0x50] sm:$0xff]  }
  0x7a   : > { %7014 = vmatprep.mubr.msk.bf16.mxu1 %vm341_vm1, %v805_v9  ;;  %7178 = vmatprep.mubr.msk.bf16.mxu0 %vm341_vm1, %v3063_v18  ;;  %v860_v9 = vrot.slane %v858_v62, 1  ;;  %v874_v18 = vshll.u32 %v7810_v8, 16  ;;  %v1388_v51 = vrot.slane %v7835_v45, 1 }
  0x7c   : > { %v864_v15 = vor.u32 %v862_v5, %v860_v9  ;;  %v861_v20 = vsel %vm745_vm4, %v856_v12, %v860_v9  ;;  %v7825_v9 = vld [vmem:[%s8129_s11 + $0x28] sm:$0xff]   ;;  %v7822_v12 = vld [vmem:[%s8129_s11 + $0x60] sm:$0xff]  }
  0x7d   : > { %v3567_v17 = vrot.slane %v7822_v12, 2  ;;  %v7845_v12 = vld [vmem:[%s8129_s11 + $0x28] sm:$0xff]  }
  0x7e   : > { %v869_v24 = vsel %vm745_vm4, %v864_v15, %v868_v16  ;;  %v7824_v15 = vld [vmem:[%s8129_s11 + $0x68] sm:$0xff]   ;;  %v1378_v16 = vrot.slane %v7825_v9, 1 }
  0x81   : > { %7015 = vmatmul.mubr.msk.bf16.gmra.mrb[12].mxu1 %vm341_vm1, %v813_v25  ;;  %7179 = vmatmul.mubr.msk.bf16.gmra.mrb[24].mxu0 %vm341_vm1, %v3065_v34  ;;  %v878_v25 = vshrl.u32 %v7810_v8, 16  ;;  %v3554_v34 = vsel %vm3036_vm3, %v3551_v19, %v3553_v21  ;;  %v7827_v19 = vld [vmem:[%s8129_s11 + $0x30] sm:$0xff]   ;;  %v1379_v21 = vsel %vm1368_vm5, %v1376_v13, %v1378_v16 }
  0x82   : > { %7018 = vmatprep.mubr.msk.bf16.mxu1 %vm341_vm1, %v821_v28  ;;  %7182 = vmatprep.mubr.msk.bf16.mxu0 %vm341_vm1, %v3067_v38  ;;  %v876_v28 = vrot.slane %v874_v18, 1  ;;  %v8354_v38 = vld [vmem:[%s10202_s1 + $0x10] sm:$0x3]  ;;  %v1377_v18 = vsel %vm1368_vm5, %v1374_v1, %v1376_v13  ;;  %v1380_v26 = vrot.slane %v7827_v19, 1  ;;  %v4081_v19 = vshll.u32 %v7843_v6, 16 }
  0x84   : > { %v880_v35 = vor.u32 %v878_v25, %v876_v28  ;;  %v877_v57 = vsel %vm745_vm4, %v872_v31, %v876_v28  ;;  %v7826_v25 = vld [vmem:[%s8129_s11 + $0x70] sm:$0xff]   ;;  %v7828_v28 = vld [vmem:[%s8129_s11 + $0x78] sm:$0xff]   ;;  %v1381_v31 = vsel %vm1368_vm5, %v1378_v16, %v1380_v26 }
  0x89   : > { %7019 = vmatmul.mubr.msk.bf16.gmra.mrb[16].mxu1 %vm341_vm1, %v829_v44  ;;  %7183 = vmatmul.mubr.msk.bf16.gmra.mrb[28].mxu0 %vm341_vm1, %v3069_v53  ;;  %v885_v44 = vsel %vm745_vm4, %v880_v35, %v884_v37  ;;  %v1370_v53 = vrot.slane %v7817_v43, 1  ;;  %v7833_v35 = vld [vmem:[%s8129_s11 + $0x48] sm:$0xff]  }
  0x8a   : > { %7022 = vmatprep.mubr.msk.bf16.mxu1 %vm341_vm1, %v837_v47  ;;  %7186 = vmatprep.mubr.msk.bf16.mxu0 %vm341_vm1, %v3071_v56  ;;  %v892_v47 = vrot.slane %v890_v39, 1  ;;  %v7819_v56 = vld [vmem:[%s8129_s11 + $0x10] sm:$0xff]   ;;  %v7830_v39 = vld [vmem:[%s8129_s11 + $0x80] sm:$0xff]   ;;  %v1386_v42 = vrot.slane %v7833_v35, 1 }
  0x8b   : > { %v1371_v59 = vsel %vm1368_vm5, %v1369_v52, %v1370_v53  ;;  %v1372_v62 = vrot.slane %v7819_v56, 1  ;;  %v3575_v43 = vrot.slane %v7830_v39, 2  ;;  %v7841_v52 = vld [vmem:[%s8129_s11 + $0x18] sm:$0xff]   ;;  %v7840_v56 = vld [vmem:[%s8129_s11 + $0x10] sm:$0xfc]   ;;  %v7848_v39 = vld [vmem:[%s8129_s11 + $0x80] sm:$0xff]  }
  0x8c   : > { %v893_v55 = vsel %vm745_vm4, %v888_v49, %v892_v47  ;;  %v1387_v47 = vsel %vm1368_vm5, %v1384_v7, %v1386_v42  ;;  %v7834_v49 = vld [vmem:[%s8129_s11 + $0x90] sm:$0xff]   ;;  %v1389_v60 = vsel %vm1368_vm5, %v1386_v42, %v1388_v51 }
  0x8d   : > { %v1375_v8 = vsel %vm1368_vm5, %v1372_v62, %v1374_v1 }
  0x91   : > { %7023 = vmatmul.mubr.msk.bf16.gmra.mrb[20].mxu1 %vm341_vm1, %v845_v63  ;;  %7187 = vmatmul.mubr.msk.bf16.gmra.mrb[32].mxu0 %vm341_vm1, %v3073_v10  ;;  %v7820_v63 = vld [vmem:[%s8129_s11 + $0x58] sm:$0xff]   ;;  %v1972_v10 = vsel %vm396_vm0, %v8297_v22, 0  ;;  %v7911_v22 = vld [vmem:[%s10202_s1 + $0x8] sm:$0x3] }
  0x92   : > { %7026 = vmatprep.mubr.msk.bf16.mxu1 %vm341_vm1, %v853_v4  ;;  %7192 = vmatprep.mubr.msk.bf16.mxu0 %vm341_vm1, %v3550_v14  ;;  %v1373_v4 = vsel %vm1368_vm5, %v1370_v53, %v1372_v62  ;;  %v3565_v5 = vrot.slane %v7820_v63, 2  ;;  %v3578_v53 = vsel %vm3036_vm3, %v3575_v43, %v3577_v46  ;;  %v4069_v62 = vshrl.u32 %v7841_v52, 16 }
  0x93   : > { %v4072_v63 = vshll.u32 %v7841_v52, 16 }
  0x94   : > { %v3566_v14 = vsel %vm3036_vm3, %v3563_v2, %v3565_v5  ;;  %v4061_v2 = vshrl.u32 %v7840_v56, 16  ;;  %v4071_v9 = vrot.slane %v4069_v62, 2 }
  0x99   : > { %7027 = vmatmul.mubr.msk.bf16.gmra.mrb[24].mxu1 %vm341_vm1, %v861_v20  ;;  %7193 = vmatmul.mubr.msk.bf16.vlgmr.msra.gmra.mrb[0].mxu0 %vm341_vm1, %v3552_v30  ;;  %v3569_v20 = vrot.slane %v7824_v15, 2  ;;  %v3571_v30 = vrot.slane %v7826_v25, 2  ;;  %v4090_v25 = vshll.u32 %v7845_v12, 16 }
  0x9a   : > { %7030 = vmatprep.mubr.msk.bf16.mxu1 %vm341_vm1, %v869_v24  ;;  %7229 = vmatpush3.bf16.msra.mxu0 %v4285_v33  ;;  %v3568_v24 = vsel %vm3036_vm3, %v3565_v5, %v3567_v17  ;;  %v3573_v33 = vrot.slane %v7828_v28, 2  ;;  %v1392_v5 = vrot.slane %v7839_v58, 1  ;;  %v7847_v28 = vld [vmem:[%s8129_s11 + $0x30] sm:$0xff]  }
  0x9b   : > { %7196 = vmatprep.mubr.msk.bf16.mxu0 %vm341_vm1, %v3554_v34  ;;  %7603 = vmatprep.subr.msk.bf16.mxu0 %vm396_vm0, %v8354_v38  ;;  %v3570_v27 = vsel %vm3036_vm3, %v3567_v17, %v3569_v20  ;;  %v1383_v34 = vsel %vm1368_vm5, %v1380_v26, %v1382_v29  ;;  %v3572_v37 = vsel %vm3036_vm3, %v3569_v20, %v3571_v30  ;;  %v7844_v17 = vld [vmem:[%s8129_s11 + $0x70] sm:$0xff]   ;;  %v4087_v20 = vshrl.u32 %v7845_v12, 16  ;;  %v7846_v26 = vld [vmem:[%s8129_s11 + $0x78] sm:$0xff]  }
  0x9c   : > { %v4092_v35 = vrot.slane %v4090_v25, 3  ;;  %v7856_v12 = vld [vmem:[%s8129_s11 + $0x50] sm:$0xff]  }
  0x9d   : > { %v4089_v32 = vrot.slane %v4087_v20, 2  ;;  %v4135_v20 = vshll.u32 %v7856_v12, 16 }
  0x9f   : > { %v4093_v45 = vor.u32 %v4092_v35, %v4089_v32  ;;  %v7860_v32 = vld [vmem:[%s8129_s11 + $0x60] sm:$0xff]  }
  0xa1   : > { %7031 = vmatmul.mubr.msk.bf16.gmra.mrb[28].mxu1 %vm341_vm1, %v877_v57  ;;  %7197 = vmatmul.mubr.msk.bf16.gmra.mrb[4].mxu0 %vm341_vm1, %v3556_v48  ;;  %v3574_v57 = vsel %vm3036_vm3, %v3571_v30, %v3573_v33  ;;  %v7837_v48 = vld [vmem:[%s8129_s11 + $0x58] sm:$0xff]  }
  0xa2   : > { %7034 = vmatprep.mubr.msk.bf16.mxu1 %vm341_vm1, %v885_v44  ;;  %7200 = vmatprep.mubr.msk.bf16.mxu0 %vm341_vm1, %v3558_v50  ;;  %v1385_v44 = vsel %vm1368_vm5, %v1382_v29, %v1384_v7  ;;  %v3576_v50 = vsel %vm3036_vm3, %v3573_v33, %v3575_v43  ;;  %v7849_v33 = vld [vmem:[%s8129_s11 + $0x38] sm:$0xff]   ;;  %v4096_v7 = vshrl.u32 %v7847_v28, 16 }
  0xa3   : > { %v4105_v43 = vshrl.u32 %v7849_v33, 16 }
  0xa9   : > { %7035 = vmatmul.mubr.msk.bf16.gmra.mrb[32].mxu1 %vm341_vm1, %v893_v55  ;;  %7201 = vmatmul.mubr.msk.bf16.gmra.mrb[8].mxu0 %vm341_vm1, %v3560_v61  ;;  %v1390_v55 = vrot.slane %v7837_v48, 1  ;;  %v7838_v61 = vld [vmem:[%s8129_s11 + $0xa0] ss:$0 sps:$4 sm:$0x33]   ;;  %v4098_v48 = vrot.slane %v4096_v7, 2 }
  0xaa   : > { %7040 = vmatprep.mubr.msk.bf16.mxu1 %vm341_vm1, %v1371_v59  ;;  %7204 = vmatprep.mubr.msk.bf16.mxu0 %vm341_vm1, %v3562_v0  ;;  %v3579_v59 = vrot.slane %v7834_v49, 2  ;;  %v3581_v0 = vrot.slane %v7836_v54, 2  ;;  %v3583_v16 = vrot.slane %v7838_v61, 2 }
  0xab   : > { %v1391_v1 = vsel %vm1368_vm5, %v1388_v51, %v1390_v55  ;;  %v7851_v51 = vld [vmem:[%s8129_s11 + $0x40] sm:$0xff]  }
  0xac   : > { %v3582_v13 = vsel %vm3036_vm3, %v3579_v59, %v3581_v0  ;;  %v3584_v29 = vsel %vm3036_vm3, %v3581_v0, %v3583_v16  ;;  %v4114_v62 = vshrl.u32 %v7851_v51, 16  ;;  %v7852_v0 = vld [vmem:[%s8129_s11 + $0x90] ss:$0 sps:$4 sm:$0x11]  }
  0xb1   : > { %7041 = vmatmul.mubr.msk.bf16.vlgmr.msra.gmra.mrb[0].mxu1 %vm341_vm1, %v1373_v4  ;;  %7205 = vmatmul.mubr.msk.bf16.gmra.mrb[12].mxu0 %vm341_vm1, %v3564_v11  ;;  %v4064_v4 = vshll.u32 %v7840_v56, 16  ;;  %v1394_v11 = vrot.slane %v7842_v40, 1 }
  0xb2   : > { %7044 = vmatprep.mubr.msk.bf16.mxu1 %vm341_vm1, %v1375_v8  ;;  %7077 = vmatpush3.bf16.msra.mxu1 %v1972_v10  ;;  %v3580_v8 = vsel %vm3036_vm3, %v3577_v46, %v3579_v59  ;;  %v4074_v10 = vrot.slane %v4072_v63, 3  ;;  %v7853_v59 = vld [vmem:[%s8129_s11 + $0x48] sm:$0xff]   ;;  %v4117_v63 = vshll.u32 %v7851_v51, 16 }
  0xb3   : > { %7599 = vmatprep.subr.msk.bf16.mxu1 %vm396_vm0, %v7911_v22  ;;  %7208 = vmatprep.mubr.msk.bf16.mxu0 %vm341_vm1, %v3566_v14  ;;  %v4063_v14 = vrot.slane %v4061_v2, 2  ;;  %v4066_v15 = vrot.slane %v4064_v4, 3  ;;  %v4078_v22 = vshrl.u32 %v7843_v6, 16  ;;  %v4126_v2 = vshll.u32 %v7853_v59, 16  ;;  %v7854_v4 = vld [vmem:[%s8129_s11 + $0x8] sm:$0xfe]  }
  0xb4   : > { %v4075_v23 = vor.u32 %v4074_v10, %v4071_v9  ;;  %v4116_v9 = vrot.slane %v4114_v62, 2  ;;  %v4119_v10 = vrot.slane %v4117_v63, 3  ;;  %v7865_v63 = vld [vmem:[%s8129_s11 + $0x38] sm:$0xff]  }
  0xb5   : > { %v4080_v30 = vrot.slane %v4078_v22, 2  ;;  %v7858_v22 = vld [vmem:[%s8129_s11 + $0x58] sm:$0xff]  }
  0xb6   : > { %v4141_v25 = vshrl.u32 %v7858_v22, 16 }
  0xb9   : > { %7045 = vmatmul.mubr.msk.bf16.gmra.mrb[4].mxu1 %vm341_vm1, %v1377_v18  ;;  %7209 = vmatmul.mubr.msk.bf16.gmra.mrb[16].mxu0 %vm341_vm1, %v3568_v24  ;;  %v1393_v18 = vsel %vm1368_vm5, %v1390_v55, %v1392_v5  ;;  %v1395_v24 = vsel %vm1368_vm5, %v1392_v5, %v1394_v11  ;;  %v4797_v55 = vsel %vm396_vm0, %v8354_v38, 0  ;;  %v7855_v5 = vld [vmem:[%s8129_s11 + $0x10] sm:$0xff]  }
  0xba   : > { %7048 = vmatprep.mubr.msk.bf16.mxu1 %vm341_vm1, %v1379_v21  ;;  %7212 = vmatprep.mubr.msk.bf16.mxu0 %vm341_vm1, %v3570_v27  ;;  %v4067_v21 = vor.u32 %v4066_v15, %v4063_v14  ;;  %v1396_v27 = vrot.slane %v7844_v17, 1  ;;  %v4128_v14 = vrot.slane %v4126_v2, 3  ;;  %v1880_v15 = vrot.slane %v7854_v4, 1  ;;  %v7867_v2 = vld [vmem:[%s8129_s11 + $0x40] sm:$0xff]  }
  0xbb   : > { %v1881_v16 = vrot.slane %v7855_v5, 1  ;;  %v4120_v17 = vor.u32 %v4119_v10, %v4116_v9  ;;  %v7868_v9 = vld [vmem:[%s8129_s11 + $0x80] sm:$0xff]  }
  0xbc   : > { %v1397_v42 = vsel %vm1368_vm5, %v1394_v11, %v1396_v27  ;;  %v1404_v11 = vrot.slane %v7852_v0, 1 }
  0xc1   : > { %7049 = vmatmul.mubr.msk.bf16.gmra.mrb[8].mxu1 %vm341_vm1, %v1381_v31  ;;  %7213 = vmatmul.mubr.msk.bf16.gmra.mrb[20].mxu0 %vm341_vm1, %v3572_v37  ;;  %v4083_v31 = vrot.slane %v4081_v19, 3  ;;  %v1398_v37 = vrot.slane %v7846_v26, 1  ;;  %v4132_v19 = vshrl.u32 %v7856_v12, 16  ;;  %v4144_v26 = vshll.u32 %v7858_v22, 16 }
  0xc2   : > { %7052 = vmatprep.mubr.msk.bf16.mxu1 %vm341_vm1, %v1383_v34  ;;  %7216 = vmatprep.mubr.msk.bf16.mxu0 %vm341_vm1, %v3574_v57  ;;  %v4076_v34 = vsel %vm4059_vm6, %v4067_v21, %v4075_v23  ;;  %v4099_v57 = vshll.u32 %v7847_v28, 16  ;;  %v7857_v21 = vld [vmem:[%s8129_s11 + $0x18] sm:$0xff]   ;;  %v4186_v22 = vshrl.u32 %v7868_v9, 16 }
  0xc3   : > { %v4084_v41 = vor.u32 %v4083_v31, %v4080_v30  ;;  %v1399_v46 = vsel %vm1368_vm5, %v1396_v27, %v1398_v37  ;;  %v7859_v27 = vld [vmem:[%s8129_s11 + $0x20] sm:$0xff]   ;;  %v4137_v30 = vrot.slane %v4135_v20, 3  ;;  %v1883_v31 = vrot.slane %v7857_v21, 1 }
  0xc4   : > { %v4101_v49 = vrot.slane %v4099_v57, 3  ;;  %v4146_v35 = vrot.slane %v4144_v26, 3  ;;  %v4188_v26 = vrot.slane %v4186_v22, 2 }
  0xc5   : > { %v4085_v52 = vsel %vm4059_vm6, %v4075_v23, %v4084_v41  ;;  %v4094_v56 = vsel %vm4059_vm6, %v4084_v41, %v4093_v45  ;;  %v1884_v57 = vsel %vm1368_vm5, %v1881_v16, %v1883_v31  ;;  %v4150_v41 = vshrl.u32 %v7860_v32, 16 }
  0xc6   : > { %v4102_v40 = vor.u32 %v4101_v49, %v4098_v48  ;;  %v7863_v48 = vld [vmem:[%s8129_s11 + $0x30] sm:$0xff]  }
  0xc8   : > { %v4103_v6 = vsel %vm4059_vm6, %v4093_v45, %v4102_v40 }
  0xc9   : > { %7053 = vmatmul.mubr.msk.bf16.gmra.mrb[12].mxu1 %vm341_vm1, %v1385_v44  ;;  %7217 = vmatmul.mubr.msk.bf16.gmra.mrb[24].mxu0 %vm341_vm1, %v3576_v50  ;;  %v4108_v44 = vshll.u32 %v7849_v33, 16  ;;  %v1400_v50 = vrot.slane %v7848_v39, 1  ;;  %v7862_v39 = vld [vmem:[%s8129_s11 + $0x68] sm:$0xff]  }
  0xca   : > { %7056 = vmatprep.mubr.msk.bf16.mxu1 %vm341_vm1, %v1387_v47  ;;  %7220 = vmatprep.mubr.msk.bf16.mxu0 %vm341_vm1, %v3578_v53  ;;  %v7850_v47 = vld [vmem:[%s8129_s11 + $0x88] sm:$0xff]   ;;  %v4107_v53 = vrot.slane %v4105_v43, 2 }
  0xcb   : > { %v4110_v54 = vrot.slane %v4108_v44, 3  ;;  %v1402_v58 = vrot.slane %v7850_v47, 1  ;;  %v7861_v43 = vld [vmem:[%s8129_s11 + $0x28] sm:$0xff]   ;;  %v4162_v47 = vshll.u32 %v7862_v39, 16 }
  0xcd   : > { %v4111_v61 = vor.u32 %v4110_v54, %v4107_v53  ;;  %v1403_v38 = vsel %vm1368_vm5, %v1400_v50, %v1402_v58  ;;  %v7864_v53 = vld [vmem:[%s8129_s11 + $0x70] sm:$0xff]  }
  0xce   : > { %v4171_v62 = vshll.u32 %v7864_v53, 16 }
  0xcf   : > { %v4121_v28 = vsel %vm4059_vm6, %v4111_v61, %v4120_v17 }
  0xd1   : > { %7057 = vmatmul.mubr.msk.bf16.gmra.mrb[16].mxu1 %vm341_vm1, %v1389_v60  ;;  %7221 = vmatmul.mubr.msk.bf16.gmra.mrb[28].mxu0 %vm341_vm1, %v3580_v8  ;;  %v1401_v60 = vsel %vm1368_vm5, %v1398_v37, %v1400_v50  ;;  %v4112_v8 = vsel %vm4059_vm6, %v4102_v40, %v4111_v61  ;;  %v1885_v37 = vrot.slane %v7859_v27, 1  ;;  %v4152_v50 = vrot.slane %v4150_v41, 2 }
  0xd2   : > { %7060 = vmatprep.mubr.msk.bf16.mxu1 %vm341_vm1, %v1391_v1  ;;  %7224 = vmatprep.mubr.msk.bf16.mxu0 %vm341_vm1, %v3582_v13  ;;  %v4123_v1 = vshrl.u32 %v7853_v59, 16  ;;  %v7866_v59 = vld [vmem:[%s8129_s11 + $0x78] sm:$0xff]   ;;  %v4168_v61 = vshrl.u32 %v7864_v53, 16 }
  0xd3   : > { %v1886_v45 = vsel %vm1368_vm5, %v1883_v31, %v1885_v37 }
  0xd4   : > { %v4125_v13 = vrot.slane %v4123_v1, 2  ;;  %v4180_v1 = vshll.u32 %v7866_v59, 16  ;;  %v4170_v5 = vrot.slane %v4168_v61, 2 }
  0xd6   : > { %v4129_v23 = vor.u32 %v4128_v14, %v4125_v13  ;;  %v4182_v12 = vrot.slane %v4180_v1, 3  ;;  %v1893_v13 = vrot.slane %v7867_v2, 1  ;;  %v7870_v14 = vld [vmem:[%s8129_s11 + $0x88] sm:$0xff]   ;;  %v7878_v2 = vld [vmem:[%s8129_s11 + $0x10] sm:$0xf8]  }
  0xd7   : > { %v4195_v21 = vshrl.u32 %v7870_v14, 16 }
  0xd8   : > { %v4130_v33 = vsel %vm4059_vm6, %v4120_v17, %v4129_v23  ;;  %v4189_v17 = vshll.u32 %v7868_v9, 16  ;;  %v7882_v9 = vld [vmem:[%s8129_s11 + $0x78] sm:$0xff]  }
  0xd9   : > { %7061 = vmatmul.mubr.msk.bf16.gmra.mrb[20].mxu1 %vm341_vm1, %v1393_v18  ;;  %7225 = vmatmul.mubr.msk.bf16.gmra.mrb[32].mxu0 %vm341_vm1, %v3584_v29  ;;  %v1405_v18 = vsel %vm1368_vm5, %v1402_v58, %v1404_v11  ;;  %v4134_v29 = vrot.slane %v4132_v19, 2  ;;  %v1889_v58 = vrot.slane %v7863_v48, 1  ;;  %v4197_v31 = vrot.slane %v4195_v21, 2  ;;  %v7886_v21 = vld [vmem:[%s8129_s11 + $0x88] sm:$0xff]  }
  0xda   : > { %7064 = vmatprep.mubr.msk.bf16.mxu1 %vm341_vm1, %v1395_v24  ;;  %7230 = vmatprep.mubr.msk.bf16.mxu0 %vm341_vm1, %v4076_v34  ;;  %v1882_v24 = vsel %vm1368_vm5, %v1880_v15, %v1881_v16  ;;  %v4143_v34 = vrot.slane %v4141_v25, 2  ;;  %v4191_v27 = vrot.slane %v4189_v17, 3  ;;  %v7883_v17 = vld [vmem:[%s8129_s11 + $0x28] sm:$0xff]  }
  0xdb   : > { %v4138_v7 = vor.u32 %v4137_v30, %v4134_v29  ;;  %v7872_v29 = vld [vmem:[%s8129_s11 + $0x90] sm:$0xff]  }
  0xdc   : > { %v4147_v44 = vor.u32 %v4146_v35, %v4143_v34  ;;  %v7874_v34 = vld [vmem:[%s8129_s11 + $0x98] sm:$0xff]   ;;  %v4192_v35 = vor.u32 %v4191_v27, %v4188_v26  ;;  %v7892_v26 = vld [vmem:[%s8129_s11 + $0x60] sm:$0xff]  }
  0xdd   : > { %v4139_v49 = vsel %vm4059_vm6, %v4129_v23, %v4138_v7  ;;  %v4198_v23 = vshll.u32 %v7870_v14, 16 }
  0xde   : > { %v4148_v54 = vsel %vm4059_vm6, %v4138_v7, %v4147_v44  ;;  %v4207_v7 = vshll.u32 %v7872_v29, 16 }
  0xe0   : > { %v4209_v48 = vrot.slane %v4207_v7, 3  ;;  %v7894_v7 = vld [vmem:[%s8129_s11 + $0x68] sm:$0xff]  }
  0xe1   : > { %7065 = vmatmul.mubr.msk.bf16.gmra.mrb[24].mxu1 %vm341_vm1, %v1397_v42  ;;  %7231 = vmatmul.mubr.msk.bf16.vlgmr.msra.gmra.mrb[0].mxu0 %vm341_vm1, %v4085_v52  ;;  %v4153_v42 = vshll.u32 %v7860_v32, 16  ;;  %v1887_v52 = vrot.slane %v7861_v43, 1  ;;  %v4200_v32 = vrot.slane %v4198_v23, 3  ;;  %v4213_v43 = vshrl.u32 %v7874_v34, 16 }
  0xe2   : > { %7068 = vmatprep.mubr.msk.bf16.mxu1 %vm341_vm1, %v1399_v46  ;;  %7267 = vmatpush3.bf16.msra.mxu0 %v4797_v55  ;;  %v4159_v46 = vshrl.u32 %v7862_v39, 16  ;;  %v4204_v39 = vshrl.u32 %v7872_v29, 16  ;;  %v4710_v23 = vrot.slane %v7883_v17, 3  ;;  %v1911_v29 = vrot.slane %v7886_v21, 1 }
  0xe3   : > { %7234 = vmatprep.mubr.msk.bf16.mxu0 %vm341_vm1, %v4094_v56  ;;  %v4155_v51 = vrot.slane %v4153_v42, 3  ;;  %v4164_v56 = vrot.slane %v4162_v47, 3  ;;  %v1890_v0 = vsel %vm1368_vm5, %v1887_v52, %v1889_v58  ;;  %v4201_v41 = vor.u32 %v4200_v32, %v4197_v31  ;;  %v7887_v31 = vld [vmem:[%s8129_s11 + $0x38] sm:$0xff]  }
  0xe4   : > { %v4161_v55 = vrot.slane %v4159_v46, 2  ;;  %v4206_v47 = vrot.slane %v4204_v39, 2  ;;  %v7890_v39 = vld [vmem:[%s8129_s11 + $0x98] ss:$0 sps:$4 sm:$0x11]  }
  0xe5   : > { %v4156_v40 = vor.u32 %v4155_v51, %v4152_v50  ;;  %v7876_v50 = vld [vmem:[%s8129_s11 + $0xa0] ss:$0 sps:$4 sm:$0x77]   ;;  %v4202_v51 = vsel %vm4059_vm6, %v4192_v35, %v4201_v41 }
  0xe7   : > { %v4157_v4 = vsel %vm4059_vm6, %v4147_v44, %v4156_v40  ;;  %v4216_v44 = vshll.u32 %v7874_v34, 16  ;;  %v2494_v34 = vshll.u32 %v7892_v26, 16 }
  0xe9   : > { %7069 = vmatmul.mubr.msk.bf16.gmra.mrb[28].mxu1 %vm341_vm1, %v1401_v60  ;;  %7235 = vmatmul.mubr.msk.bf16.gmra.mrb[4].mxu0 %vm341_vm1, %v4103_v6  ;;  %v1888_v60 = vsel %vm1368_vm5, %v1885_v37, %v1887_v52  ;;  %v4173_v6 = vrot.slane %v4171_v62, 3  ;;  %v4215_v52 = vrot.slane %v4213_v43, 2  ;;  %v4218_v53 = vrot.slane %v4216_v44, 3  ;;  %v7880_v62 = vld [vmem:[%s8129_s11 + $0x70] sm:$0xff]  }
  0xea   : > { %7072 = vmatprep.mubr.msk.bf16.mxu1 %vm341_vm1, %v1403_v38  ;;  %7238 = vmatprep.mubr.msk.bf16.mxu0 %vm341_vm1, %v4112_v8  ;;  %v4177_v38 = vshrl.u32 %v7866_v59, 16  ;;  %v1891_v8 = vrot.slane %v7865_v63, 1  ;;  %v4225_v59 = vshll.u32 %v7876_v50, 16  ;;  %v2496_v43 = vrot.slane %v2494_v34, 2  ;;  %v7896_v44 = vld [vmem:[%s8129_s11 + $0x70] sm:$0xff]  }
  0xeb   : > { %v4174_v15 = vor.u32 %v4173_v6, %v4170_v5  ;;  %v1905_v5 = vrot.slane %v7880_v62, 1  ;;  %v7906_v34 = vld [vmem:[%s8129_s11 + $0x98] ss:$0 sps:$4 sm:$0x33]  }
  0xec   : > { %v4179_v11 = vrot.slane %v4177_v38, 2  ;;  %v1892_v16 = vsel %vm1368_vm5, %v1889_v58, %v1891_v8  ;;  %v1894_v20 = vsel %vm1368_vm5, %v1891_v8, %v1893_v13  ;;  %v4222_v58 = vshrl.u32 %v7876_v50, 16 }
  0xee   : > { %v4183_v19 = vor.u32 %v4182_v12, %v4179_v11 }
  0xf0   : > { %v4184_v30 = vsel %vm4059_vm6, %v4174_v15, %v4183_v19  ;;  %v4193_v46 = vsel %vm4059_vm6, %v4183_v19, %v4192_v35 }
  0xf1   : > { %7073 = vmatmul.mubr.msk.bf16.gmra.mrb[32].mxu1 %vm341_vm1, %v1405_v18  ;;  %7239 = vmatmul.mubr.msk.bf16.gmra.mrb[8].mxu0 %vm341_vm1, %v4121_v28  ;;  %v7869_v18 = vld [vmem:[%s8129_s11 + $0x48] sm:$0xff]  }
  0xf2   : > { %7078 = vmatprep.mubr.msk.bf16.mxu1 %vm341_vm1, %v1882_v24  ;;  %7242 = vmatprep.mubr.msk.bf16.mxu0 %vm341_vm1, %v4130_v33  ;;  %v7871_v24 = vld [vmem:[%s8129_s11 + $0x50] sm:$0xff]   ;;  %v1895_v28 = vrot.slane %v7869_v18, 1 }
  0xf3   : > { %v1897_v33 = vrot.slane %v7871_v24, 1 }
  0xf4   : > { %v1896_v37 = vsel %vm1368_vm5, %v1893_v13, %v1895_v28  ;;  %v7884_v13 = vld [vmem:[%s8129_s11 + $0x80] sm:$0xff]  }
  0xf5   : > { %v1898_v42 = vsel %vm1368_vm5, %v1895_v28, %v1897_v33  ;;  %v1909_v18 = vrot.slane %v7884_v13, 1  ;;  %v7885_v28 = vld [vmem:[%s8129_s11 + $0x30] sm:$0xff]  }
  0xf6   : > { %v4712_v35 = vrot.slane %v7885_v28, 3 }
  0xf9   : > { %7079 = vmatmul.mubr.msk.bf16.vlgmr.msra.gmra.mrb[0].mxu1 %vm341_vm1, %v1884_v57  ;;  %7243 = vmatmul.mubr.msk.bf16.gmra.mrb[12].mxu0 %vm341_vm1, %v4139_v49  ;;  %v7873_v57 = vld [vmem:[%s8129_s11 + $0x58] sm:$0xff]  }
  0xfa   : > { %7082 = vmatprep.mubr.msk.bf16.mxu1 %vm341_vm1, %v1886_v45  ;;  %7305 = vmatpush3.bf16.msra.mxu1 %v8115_v3  ;;  %v4165_v3 = vor.u32 %v4164_v56, %v4161_v55  ;;  %v7875_v45 = vld [vmem:[%s8129_s11 + $0x60] sm:$0xff]   ;;  %v1899_v49 = vrot.slane %v7873_v57, 1  ;;  %v4210_v55 = vor.u32 %v4209_v48, %v4206_v47  ;;  %v4714_v57 = vrot.slane %v7887_v31, 3 }
  0xfb   : > { %7246 = vmatprep.mubr.msk.bf16.mxu0 %vm341_vm1, %v4148_v54  ;;  %v1901_v54 = vrot.slane %v7875_v45, 1  ;;  %v4713_v45 = vsel %vm4704_vm7, %v4710_v23, %v4712_v35  ;;  %v1915_v47 = vrot.slane %v7890_v39, 1  ;;  %v2500_v48 = vshrl.u32 %v7894_v7, 16 }
  0xfc   : > { %v4166_v10 = vsel %vm4059_vm6, %v4156_v40, %v4165_v3  ;;  %v4175_v25 = vsel %vm4059_vm6, %v4165_v3, %v4174_v15  ;;  %v1900_v56 = vsel %vm1368_vm5, %v1897_v33, %v1899_v49  ;;  %v7877_v40 = vld [vmem:[%s8129_s11 + $0x68] sm:$0xff]   ;;  %v4211_v63 = vsel %vm4059_vm6, %v4201_v41, %v4210_v55  ;;  %v7881_v15 = vld [vmem:[%s8129_s11 + $0x20] sm:$0xff]  }
  0xfd   : > { %v1902_v61 = vsel %vm1368_vm5, %v1899_v49, %v1901_v54  ;;  %v4224_v3 = vrot.slane %v4222_v58, 2  ;;  %v1903_v38 = vrot.slane %v7877_v40, 1  ;;  %v4708_v19 = vrot.slane %v7881_v15, 3  ;;  %v7898_v40 = vld [vmem:[%s8129_s11 + $0x78] sm:$0xff]  }
  0xfe   : > { %v2491_v33 = vshrl.u32 %v7892_v26, 16  ;;  %v2503_v49 = vshll.u32 %v7894_v7, 16  ;;  %v4715_v50 = vsel %vm4704_vm7, %v4712_v35, %v4714_v57  ;;  %v2502_v58 = vrot.slane %v2500_v48, 1  ;;  %v7899_v26 = vld [vmem:[%s8129_s11 + $0x68] sm:$0xff]  }
  0xff   : > { %v1904_v8 = vsel %vm1368_vm5, %v1901_v54, %v1903_v38  ;;  %v1906_v12 = vsel %vm1368_vm5, %v1903_v38, %v1905_v5  ;;  %v2512_v54 = vshll.u32 %v7896_v44, 16  ;;  %v7893_v38 = vld [vmem:[%s8129_s11 + $0x50] sm:$0xff]   ;;  %v4726_v35 = vrot.slane %v7899_v26, 3 }
 0x101   : > { %7083 = vmatmul.mubr.msk.bf16.gmra.mrb[4].mxu1 %vm341_vm1, %v1888_v60  ;;  %7247 = vmatmul.mubr.msk.bf16.gmra.mrb[16].mxu0 %vm341_vm1, %v4157_v4  ;;  %v4219_v60 = vor.u32 %v4218_v53, %v4215_v52  ;;  %v7879_v4 = vld [vmem:[%s8129_s11 + $0x18] sm:$0xff]   ;;  %v2509_v53 = vshrl.u32 %v7896_v44, 16  ;;  %v2557_v44 = vshll.u32 %v7906_v34, 16 }
 0x102   : > { %7086 = vmatprep.mubr.msk.bf16.mxu1 %vm341_vm1, %v1890_v0  ;;  %7250 = vmatprep.mubr.msk.bf16.mxu0 %vm341_vm1, %v4166_v10  ;;  %v4227_v0 = vrot.slane %v4225_v59, 3  ;;  %v4705_v10 = vrot.slane %v7878_v2, 3  ;;  %v4706_v11 = vrot.slane %v7879_v4, 3  ;;  %v2505_v59 = vrot.slane %v2503_v49, 2 }
 0x103   : > { %v4220_v1 = vsel %vm4059_vm6, %v4210_v55, %v4219_v60  ;;  %v2511_v62 = vrot.slane %v2509_v53, 1  ;;  %v2518_v2 = vshrl.u32 %v7898_v40, 16  ;;  %v2521_v4 = vshll.u32 %v7898_v40, 16 }
 0x104   : > { %v4228_v6 = vor.u32 %v4227_v0, %v4224_v3  ;;  %v4707_v22 = vsel %vm4704_vm7, %v4705_v10, %v4706_v11  ;;  %v4709_v27 = vsel %vm4704_vm7, %v4706_v11, %v4708_v19  ;;  %v7900_v3 = vld [vmem:[%s8129_s11 + $0x80] sm:$0xff]   ;;  %v4720_v10 = vrot.slane %v7893_v38, 3 }
 0x105   : > { %v2523_v13 = vrot.slane %v2521_v4, 2  ;;  %v7910_v4 = vld [vmem:[%s8129_s11 + $0xa0] ss:$0 sps:$4 sm:$0x77]  }
 0x106   : > { %v4229_v14 = vsel %vm4059_vm6, %v4219_v60, %v4228_v6  ;;  %v7895_v6 = vld [vmem:[%s8129_s11 + $0x58] sm:$0xff]  }
 0x107   : > { %v4722_v15 = vrot.slane %v7895_v6, 3  ;;  %v4740_v6 = vrot.slane %v7910_v4, 3 }
 0x109   : > { %7087 = vmatmul.mubr.msk.bf16.gmra.mrb[8].mxu1 %vm341_vm1, %v1892_v16  ;;  %7251 = vmatmul.mubr.msk.bf16.gmra.mrb[20].mxu0 %vm341_vm1, %v4175_v25  ;;  %v1907_v16 = vrot.slane %v7882_v9, 1  ;;  %v7888_v25 = vld [vmem:[%s8129_s11 + $0x90] sm:$0xff]   ;;  %v2530_v9 = vshll.u32 %v7900_v3, 16 }
 0x10a   : > { %7090 = vmatprep.mubr.msk.bf16.mxu1 %vm341_vm1, %v1894_v20  ;;  %7254 = vmatprep.mubr.msk.bf16.mxu0 %vm341_vm1, %v4184_v30  ;;  %v4711_v30 = vsel %vm4704_vm7, %v4708_v19, %v4710_v23  ;;  %v1913_v32 = vrot.slane %v7888_v25, 1  ;;  %v4723_v25 = vsel %vm4704_vm7, %v4720_v10, %v4722_v15 }
 0x10b   : > { %v1908_v20 = vsel %vm1368_vm5, %v1905_v5, %v1907_v16  ;;  %v1910_v24 = vsel %vm1368_vm5, %v1907_v16, %v1909_v18  ;;  %v2532_v17 = vrot.slane %v2530_v9, 2 }
 0x10c   : > { %v1914_v41 = vsel %vm1368_vm5, %v1911_v29, %v1913_v32 }
 0x111   : > { %7091 = vmatmul.mubr.msk.bf16.gmra.mrb[12].mxu1 %vm341_vm1, %v1896_v37  ;;  %7255 = vmatmul.mubr.msk.bf16.gmra.mrb[24].mxu0 %vm341_vm1, %v4193_v46  ;;  %v1912_v37 = vsel %vm1368_vm5, %v1909_v18, %v1911_v29  ;;  %v7889_v46 = vld [vmem:[%s8129_s11 + $0x40] sm:$0xff]   ;;  %v7904_v18 = vld [vmem:[%s8129_s11 + $0x90] sm:$0xff]  }
 0x112   : > { %7094 = vmatprep.mubr.msk.bf16.mxu1 %vm341_vm1, %v1898_v42  ;;  %7258 = vmatprep.mubr.msk.bf16.mxu0 %vm341_vm1, %v4202_v51  ;;  %v2493_v42 = vrot.slane %v2491_v33, 1  ;;  %v7891_v51 = vld [vmem:[%s8129_s11 + $0x48] sm:$0xff]   ;;  %v4716_v55 = vrot.slane %v7889_v46, 3  ;;  %v2545_v28 = vshrl.u32 %v7904_v18, 16  ;;  %v2548_v29 = vshll.u32 %v7904_v18, 16  ;;  %v7903_v46 = vld [vmem:[%s8129_s11 + $0x78] sm:$0xff]  }
 0x113   : > { %v4718_v60 = vrot.slane %v7891_v51, 3  ;;  %v2559_v51 = vrot.slane %v2557_v44, 2 }
 0x114   : > { %v2497_v52 = vor.u32 %v2496_v43, %v2493_v42  ;;  %v4717_v0 = vsel %vm4704_vm7, %v4714_v57, %v4716_v55  ;;  %v2547_v39 = vrot.slane %v2545_v28, 1  ;;  %v2550_v7 = vrot.slane %v2548_v29, 2 }
 0x115   : > { %v4719_v5 = vsel %vm4704_vm7, %v4716_v55, %v4718_v60  ;;  %v4721_v19 = vsel %vm4704_vm7, %v4718_v60, %v4720_v10  ;;  %v2554_v43 = vshrl.u32 %v7906_v34, 16  ;;  %v7905_v55 = vld [vmem:[%s8129_s11 + $0x80] sm:$0xff]  }
 0x116   : > { %v4732_v40 = vrot.slane %v7905_v55, 3 }
 0x119   : > { %7095 = vmatmul.mubr.msk.bf16.gmra.mrb[16].mxu1 %vm341_vm1, %v1900_v56  ;;  %7259 = vmatmul.mubr.msk.bf16.gmra.mrb[28].mxu0 %vm341_vm1, %v4211_v63  ;;  %v1916_v56 = vsel %vm1368_vm5, %v1913_v32, %v1915_v47  ;;  %v2514_v63 = vrot.slane %v2512_v54, 2  ;;  %v2551_v47 = vor.u32 %v2550_v7, %v2547_v39 }
 0x11a   : > { %7098 = vmatprep.mubr.msk.bf16.mxu1 %vm341_vm1, %v1902_v61  ;;  %7262 = vmatprep.mubr.msk.bf16.mxu0 %vm341_vm1, %v4220_v1  ;;  %v2498_v61 = vsel %vm2391_vm2, %v8201_v36, %v2497_v52  ;;  %v2506_v1 = vor.u32 %v2505_v59, %v2502_v58  ;;  %v2527_v36 = vshrl.u32 %v7900_v3, 16  ;;  %v7907_v59 = vld [vmem:[%s8129_s11 + $0x88] sm:$0xff]  }
 0x11c   : > { %v2507_v11 = vsel %vm2391_vm2, %v2497_v52, %v2506_v1  ;;  %v4730_v52 = vrot.slane %v7903_v46, 3 }
 0x121   : > { %7099 = vmatmul.mubr.msk.bf16.gmra.mrb[20].mxu1 %vm341_vm1, %v1904_v8  ;;  %7263 = vmatmul.mubr.msk.bf16.gmra.mrb[32].mxu0 %vm341_vm1, %v4229_v14  ;;  %v2515_v8 = vor.u32 %v2514_v63, %v2511_v62  ;;  %v7902_v14 = vld [vmem:[%s8129_s11 + $0x88] sm:$0xff]   ;;  %v4733_v62 = vsel %vm4704_vm7, %v4730_v52, %v4732_v40  ;;  %v7908_v63 = vld [vmem:[%s8129_s11 + $0x90] sm:$0xff]  }
 0x122   : > { %7102 = vmatprep.mubr.msk.bf16.mxu1 %vm341_vm1, %v1906_v12  ;;  %7268 = vmatprep.mubr.msk.bf16.mxu0 %vm341_vm1, %v4707_v22  ;;  %v2520_v12 = vrot.slane %v2518_v2, 1  ;;  %v2529_v22 = vrot.slane %v2527_v36, 1  ;;  %v2536_v23 = vshrl.u32 %v7902_v14, 16  ;;  %v4736_v38 = vrot.slane %v7908_v63, 3 }
 0x123   : > { %v2516_v16 = vsel %vm2391_vm2, %v2506_v1, %v2515_v8  ;;  %v5300_v36 = vlaneseq }
 0x124   : > { %v2524_v21 = vor.u32 %v2523_v13, %v2520_v12  ;;  %v2538_v32 = vrot.slane %v2536_v23, 1 }
 0x125   : > { %v8663_v9 = vshrl.u32 %v5300_v36, 7 }
 0x126   : > { %v2525_v31 = vsel %vm2391_vm2, %v2515_v8, %v2524_v21 }
 0x127   : > { %v5303_v10 = vadd.s32 16, %v8663_v9  ;;  %v5304_v13 = vadd.s32 24, %v8663_v9  ;;  %v5307_v18 = vadd.s32 48, %v8663_v9  ;;  %v5305_v23 = vadd.s32 32, %v8663_v9 }
 0x128   : > { %v8688_v26 = vadd.s32 56, %v8663_v9  ;;  %v8695_v29 = vadd.s32 80, %v8663_v9  ;;  %v8702_v34 = vadd.s32 64, %v8663_v9  ;;  %v8750_v63 = vadd.s32 72, %v8663_v9 }
 0x129   : > { %7103 = vmatmul.mubr.msk.bf16.gmra.mrb[24].mxu1 %vm341_vm1, %v1908_v20  ;;  %7269 = vmatmul.mubr.msk.bf16.vlgmr.msra.gmra.mrb[0].mxu0 %vm341_vm1, %v4709_v27  ;;  %v7897_v20 = vld [vmem:[%s8129_s11 + $0x60] sm:$0xff]   ;;  %v2533_v27 = vor.u32 %v2532_v17, %v2529_v22  ;;  %v8675_v22 = vmul.u32.u64.low 3817748708, %v5304_v13  ;;  %v8676_v17 = vmul.u32.u64.high 3817748708, %v5304_v13, %v8675_v22 }
 0x12a   : > { %7106 = vmatprep.mubr.msk.bf16.mxu1 %vm341_vm1, %v1910_v24  ;;  %7272 = vmatprep.mubr.msk.bf16.mxu0 %vm341_vm1, %v4711_v30  ;;  %v2539_v24 = vshll.u32 %v7902_v14, 16  ;;  %v4724_v30 = vrot.slane %v7897_v20, 3 }
 0x12c   : > { %v2541_v33 = vrot.slane %v2539_v24, 2  ;;  %v4725_v57 = vsel %vm4704_vm7, %v4722_v15, %v4724_v30  ;;  %v8671_v14 = vmul.u32.u64.low 3817748708, %v8663_v9  ;;  %v8672_v15 = vmul.u32.u64.high 3817748708, %v8663_v9, %v8671_v14 }
 0x12e   : > { %v2542_v42 = vor.u32 %v2541_v33, %v2538_v32  ;;  %v5343_v28 = vshrl.u32 %v8672_v15, 4  ;;  %v5376_v33 = vshrl.u32 %v8676_v17, 4 }
 0x130   : > { %v2543_v49 = vsel %vm2391_vm2, %v2533_v27, %v2542_v42  ;;  %v2552_v53 = vsel %vm2391_vm2, %v2542_v42, %v2551_v47 }
 0x131   : > { %7107 = vmatmul.mubr.msk.bf16.gmra.mrb[28].mxu1 %vm341_vm1, %v1912_v37  ;;  %7273 = vmatmul.mubr.msk.bf16.gmra.mrb[4].mxu0 %vm341_vm1, %v4713_v45  ;;  %v2534_v37 = vsel %vm2391_vm2, %v2524_v21, %v2533_v27  ;;  %v4727_v45 = vsel %vm4704_vm7, %v4724_v30, %v4726_v35  ;;  %v8691_v27 = vadd.s32 40, %v8663_v9 }
 0x132   : > { %7110 = vmatprep.mubr.msk.bf16.mxu1 %vm341_vm1, %v1914_v41  ;;  %7276 = vmatprep.mubr.msk.bf16.mxu0 %vm341_vm1, %v4715_v50  ;;  %v7901_v41 = vld [vmem:[%s8129_s11 + $0x70] sm:$0xff]   ;;  %v2556_v50 = vrot.slane %v2554_v43, 1  ;;  %v8714_v42 = vmul.u32.u64.low 3817748708, %v8695_v29  ;;  %v8715_v43 = vmul.u32.u64.high 3817748708, %v8695_v29, %v8714_v42 }
 0x133   : > { %v4728_v48 = vrot.slane %v7901_v41, 3  ;;  %v8709_v39 = vmul.u32.u64.low 3817748708, %v8691_v27  ;;  %v8710_v7 = vmul.u32.u64.high 3817748708, %v8691_v27, %v8709_v39 }
 0x134   : > { %v10375_v39 = vmov 0 }
 0x135   : > { %v4729_v54 = vsel %vm4704_vm7, %v4726_v35, %v4728_v48  ;;  %v4731_v58 = vsel %vm4704_vm7, %v4728_v48, %v4730_v52  ;;  %v8729_v52 = vadd.s32 88, %v8663_v9 }
 0x139   : > { %7111 = vmatmul.mubr.msk.bf16.gmra.mrb[32].mxu1 %vm341_vm1, %v1916_v56  ;;  %7277 = vmatmul.mubr.msk.bf16.gmra.mrb[8].mxu0 %vm341_vm1, %v4717_v0  ;;  %v2560_v56 = vor.u32 %v2559_v51, %v2556_v50  ;;  %v7909_v0 = vld [vmem:[%s8129_s11 + $0x98] sm:$0xff]   ;;  %s6125_s11 = sshll.u32 %s9541_s9, 4  ;;  %s10111_s11 = int_to_ptr.vmem [resolvable:$true] %s6125_s11 }
 0x13a   : > { %7136 = vmatprep.mubr.msk.bf16.mxu1 %vm341_vm1, %v2498_v61  ;;  %7280 = vmatprep.mubr.msk.bf16.mxu0 %vm341_vm1, %v4719_v5  ;;  %v4734_v61 = vrot.slane %v7907_v59, 3  ;;  %v4738_v1 = vrot.slane %v7909_v0, 3  ;;  %s7912_s26 = scalar_lea.vmem %s10111_s11, 2304  ;;  %p7919_p1 = scmp.lt.s32.totalorder %s10111_s11, %s7917_s28 }
 0x13b   : > { %v2561_v60 = vsel %vm2391_vm2, %v2551_v47, %v2560_v56  ;;  %v8721_v47 = vmul.u32.u64.low 3817748708, %v8702_v34  ;;  %v8722_v48 = vmul.u32.u64.high 3817748708, %v8702_v34, %v8721_v47  ;;  %p7913_p12 = scmp.ne.s32.totalorder %s10111_s11, %s7912_s26  ;;  %p7920_p2 = scmp.lt.s32.totalorder %s7918_s29, %s7912_s26 }
 0x13c   : > { %v4735_v3 = vsel %vm4704_vm7, %v4732_v40, %v4734_v61  ;;  %v4737_v2 = vsel %vm4704_vm7, %v4734_v61, %v4736_v38  ;;  %v4739_v5 = vsel %vm4704_vm7, %v4736_v38, %v4738_v1  ;;  %v4741_v8 = vsel %vm4704_vm7, %v4738_v1, %v4740_v6 }
 0x13d   : > { %v5453_v40 = vshrl.u32 %v8715_v43, 4  ;;  %v5431_v38 = vshrl.u32 %v8722_v48, 4  ;;  %p7914_p13 = pnand %p7913_p12, %p8088_p4  ;;  %p7921_p3 = por %p7920_p2, %p7919_p1 }
 0x13f   : > { %v5454_v36 = vmul.u32 18, %v5453_v40  ;;  %v5432_v22 = vmul.u32 18, %v5431_v38  ;;  %v10288_v40 = vmov 0  ;;  %v9011_v38 = vadd.s32 136, %v8663_v9  ;;  %p7915_p0 = pneg %p7914_p13 }
 0x141   : > { %7137 = vmatmul.mubr.msk.bf16.vlgmr.msra.gmra.mrb[20].mxu1 %vm341_vm1, %v2507_v11  ;;  %7281 = vmatmul.mubr.msk.bf16.gmra.mrb[12].mxu0 %vm341_vm1, %v4721_v19  ;;  %v8666_v11 = vmul.u32.u64.low 3817748708, %v5303_v10  ;;  %v8667_v12 = vmul.u32.u64.high 3817748708, %v5303_v10, %v8666_v11  ;;  %p7922_p5 = pnand %p7921_p3, %p7915_p0 }
 0x142   : > { %7140 = vmatprep.mubr.msk.bf16.mxu1 %vm341_vm1, %v2516_v16  ;;  %7284 = vmatprep.mubr.msk.bf16.mxu0 %vm341_vm1, %v4723_v25  ;;  %v5302_v16 = vadd.s32 8, %v8663_v9  ;;  %v8684_v24 = vmul.u32.u64.low 3817748708, %v5307_v18  ;;  %v8685_v25 = vmul.u32.u64.high 3817748708, %v5307_v18, %v8684_v24 }
 0x143   : > { %v5365_v21 = vshrl.u32 %v8667_v12, 4 }
 0x144   : > { %v8679_v19 = vmul.u32.u64.low 3817748708, %v5302_v16  ;;  %v8680_v20 = vmul.u32.u64.high 3817748708, %v5302_v16, %v8679_v19  ;;  %v5409_v46 = vshrl.u32 %v8685_v25, 4 }
 0x145   : > { %v5366_v30 = vmul.u32 18, %v5365_v21 }
 0x146   : > { %v5354_v41 = vshrl.u32 %v8680_v20, 4 }
 0x147   : > { %v8717_v44 = vsub.s32 %v5303_v10, %v5366_v30  ;;  %v8772_v10 = vadd.s32 96, %v8663_v9  ;;  %v8832_v30 = vadd.s32 104, %v8663_v9 }
 0x148   : > { %v5355_v50 = vmul.u32 18, %v5354_v41 }
 0x149   : > { %7141 = vmatmul.mubr.msk.bf16.gmra.mrb[24].mxu1 %vm341_vm1, %v2525_v31  ;;  %7285 = vmatmul.mubr.msk.bf16.gmra.mrb[16].mxu0 %vm341_vm1, %v4725_v57  ;;  %v8697_v31 = vmul.u32.u64.low 3817748708, %v5305_v23  ;;  %v8698_v32 = vmul.u32.u64.high 3817748708, %v5305_v23, %v8697_v31  ;;  %v5344_v57 = vmul.u32 18, %v5343_v28  ;;  %vm5735_vm8 = vcmp.ne.s32.totalorder %v8717_v44, 0 }
 0x14a   : > { %7144 = vmatprep.mubr.msk.bf16.mxu1 %vm341_vm1, %v2534_v37  ;;  %7288 = vmatprep.mubr.msk.bf16.mxu0 %vm341_vm1, %v4727_v45  ;;  %v8705_v35 = vmul.u32.u64.low 3817748708, %v8688_v26  ;;  %v8706_v37 = vmul.u32.u64.high 3817748708, %v8688_v26, %v8705_v35  ;;  %v5377_v45 = vmul.u32 18, %v5376_v33  ;;  %vm5771_vm9 = vcmp.lt.s32.totalorder %v8717_v44, 0 }
 0x14b   : > { %v5387_v51 = vshrl.u32 %v8698_v32, 4  ;;  %v8736_v55 = vadd.s32 18, %v8717_v44  ;;  %v8742_v59 = vsub.s32 %v5302_v16, %v5355_v50  ;;  %vm8804_vm2 = vmand %vm5771_vm9, %vm5735_vm8  ;;  %v8847_v33 = vsub.s32 %v8702_v34, %v5432_v22 }
 0x14c   : > { %v5420_v56 = vshrl.u32 %v8706_v37, 4  ;;  %v8812_v24 = vmul.u32.u64.low 3817748708, %v8772_v10  ;;  %v8813_v25 = vmul.u32.u64.high 3817748708, %v8772_v10, %v8812_v24  ;;  %v8850_v35 = vadd.s32 144, %v8663_v9 }
 0x14d   : > { %vm5734_vm14 = vcmp.ne.s32.totalorder %v8742_v59, 0  ;;  %vm5770_vm15 = vcmp.lt.s32.totalorder %v8742_v59, 0  ;;  %v8786_v16 = vadd.s32 18, %v8742_v59  ;;  %10273 = vst [vmem:[#allocation13_spill] sm:$0xff] %v8847_v33  ;;  %v10296_v22 = vmov 0 }
 0x14e   : > { %vm8858_vm7 = vmand %vm5770_vm15, %vm5734_vm14  ;;  %v8894_v47 = vmul.u32.u64.low 3817748708, %v8832_v30  ;;  %v8895_v48 = vmul.u32.u64.high 3817748708, %v8832_v30, %v8894_v47  ;;  %v9001_v24 = vadd.s32 152, %v8663_v9 }
 0x151   : > { %7145 = vmatmul.mubr.msk.bf16.gmra.mrb[28].mxu1 %vm341_vm1, %v2543_v49  ;;  %7289 = vmatmul.mubr.msk.bf16.gmra.mrb[20].mxu0 %vm341_vm1, %v4729_v54  ;;  %v8725_v49 = vsub.s32 %v8663_v9, %v5344_v57  ;;  %v5410_v54 = vmul.u32 18, %v5409_v46 }
 0x152   : > { %7148 = vmatprep.mubr.msk.bf16.mxu1 %vm341_vm1, %v2552_v53  ;;  %7292 = vmatprep.mubr.msk.bf16.mxu0 %vm341_vm1, %v4731_v58  ;;  %v8732_v53 = vsub.s32 %v5304_v13, %v5377_v45  ;;  %v5398_v58 = vshrl.u32 %v8710_v7, 4  ;;  %v8780_v13 = vmul.u32.u64.low 3817748708, %v8750_v63  ;;  %v8781_v14 = vmul.u32.u64.high 3817748708, %v8750_v63, %v8780_v13 }
 0x153   : > { %vm5733_vm10 = vcmp.ne.s32.totalorder %v8725_v49, 0  ;;  %vm5769_vm11 = vcmp.lt.s32.totalorder %v8725_v49, 0  ;;  %v8756_v0 = vsub.s32 %v5307_v18, %v5410_v54  ;;  %v10278_v7 = vmov 0 }
 0x154   : > { %vm5736_vm12 = vcmp.ne.s32.totalorder %v8732_v53, 0  ;;  %vm5772_vm13 = vcmp.lt.s32.totalorder %v8732_v53, 0  ;;  %v5399_v4 = vmul.u32 18, %v5398_v58  ;;  %vm8822_vm3 = vmand %vm5769_vm11, %vm5733_vm10  ;;  %v5442_v46 = vshrl.u32 %v8781_v14, 4  ;;  %v10423_v21 = vld [vmem:[#allocation13_spill] sm:$0xff] }
 0x155   : > { %vm5739_vm0 = vcmp.ne.s32.totalorder %v8756_v0, 0  ;;  %v8827_v28 = vadd.s32 18, %v8756_v0  ;;  %vm8838_vm5 = vmand %vm5772_vm13, %vm5736_vm12 }
 0x156   : > { %v8794_v18 = vsub.s32 %v8691_v27, %v5399_v4  ;;  %v8944_v4 = vadd.s32 18, %v8847_v33 }
 0x158   : > { %10265 = vst [vmem:[#allocation11_spill] sm:$0xff] %v8794_v18  ;;  %vm5738_vm10 = vcmp.ne.s32.totalorder %v8794_v18, 0  ;;  %vm5774_vm11 = vcmp.lt.s32.totalorder %v8794_v18, 0  ;;  %10295 = vst [vmem:[#allocation23_spill] sm:$0xff] %v8944_v4 }
 0x159   : > { %7149 = vmatmul.mubr.msk.bf16.gmra.mrb[32].mxu1 %vm341_vm1, %v2561_v60  ;;  %7293 = vmatmul.mubr.msk.bf16.gmra.mrb[24].mxu0 %vm341_vm1, %v4733_v62  ;;  %v5388_v60 = vmul.u32 18, %v5387_v51  ;;  %v8746_v61 = vmul.u32.u64.low 3817748708, %v8729_v52  ;;  %v8747_v62 = vmul.u32.u64.high 3817748708, %v8729_v52, %v8746_v61  ;;  %v10284_v51 = vmov 0 }
 0x15a   : > { %7296 = vmatprep.mubr.msk.bf16.mxu0 %vm341_vm1, %v4735_v3  ;;  %v8753_v3 = vadd.s32 18, %v8725_v49 }
 0x15b   : > { %v8777_v12 = vsub.s32 %v5305_v23, %v5388_v60  ;;  %v8809_v23 = vsub.s32 %v8695_v29, %v5454_v36  ;;  %v5464_v29 = vshrl.u32 %v8747_v62, 4  ;;  %v8925_v60 = vadd.s32 18, %v8794_v18 }
 0x15c   : > { %v5475_v36 = vshrl.u32 %v8813_v25, 4  ;;  %v10338_v18 = vmov 0 }
 0x15d   : > { %10268 = vst [vmem:[#allocation12_spill] sm:$0xff] %v8809_v23  ;;  %vm5737_vm4 = vcmp.ne.s32.totalorder %v8777_v12, 0  ;;  %vm5773_vm6 = vcmp.lt.s32.totalorder %v8777_v12, 0  ;;  %v8844_v32 = vadd.s32 18, %v8777_v12  ;;  %vm5743_vm13 = vcmp.ne.s32.totalorder %v8809_v23, 0  ;;  %10290 = vst [vmem:[#allocation20_spill] sm:$0xff] %v8925_v60 }
 0x15e   : > { %vm5779_vm14 = vcmp.lt.s32.totalorder %v8809_v23, 0  ;;  %vm8888_vm15 = vmand %vm5773_vm6, %vm5737_vm4  ;;  %v5465_v45 = vmul.u32 18, %v5464_v29  ;;  %vm5777_vm4 = vcmp.lt.s32.totalorder %v8847_v33, 0  ;;  %v8928_v61 = vadd.s32 18, %v8809_v23 }
 0x15f   : > { %vm8920_vm6 = vmand %vm5774_vm11, %vm5738_vm10  ;;  %v5476_v14 = vmul.u32 18, %v5475_v36 }
 0x160   : > { %v10289_v40 = vsel %vm8920_vm6, 4294967295, %v10288_v40  ;;  %10291 = vst [vmem:[#allocation21_spill] sm:$0xff] %v8928_v61 }
 0x161   : > { %7297 = vmatmul.mubr.msk.bf16.gmra.mrb[28].mxu0 %vm341_vm1, %v4737_v2  ;;  %v5421_v2 = vmul.u32 18, %v5420_v56  ;;  %v8910_v54 = vmul.u32.u64.low 3817748708, %v8850_v35  ;;  %v8911_v56 = vmul.u32.u64.high 3817748708, %v8850_v35, %v8910_v54 }
 0x162   : > { %7300 = vmatprep.mubr.msk.bf16.mxu0 %vm341_vm1, %v4739_v5  ;;  %v8763_v5 = vadd.s32 112, %v8663_v9 }
 0x163   : > { %v8791_v17 = vsub.s32 %v8688_v26, %v5421_v2  ;;  %v8816_v26 = vadd.s32 120, %v8663_v9  ;;  %v10292_v2 = vmov 0  ;;  %v5541_v36 = vshrl.u32 %v8911_v56, 4 }
 0x164   : > { %v8797_v19 = vmul.u32.u64.low 3817748708, %v8763_v5  ;;  %v8798_v20 = vmul.u32.u64.high 3817748708, %v8763_v5, %v8797_v19  ;;  %v9034_v56 = vsub.s32 %v8772_v10, %v5476_v14  ;;  %v9052_v10 = vadd.s32 208, %v8663_v9 }
 0x165   : > { %10264 = vst [vmem:[#allocation10_spill] sm:$0xff] %v8791_v17  ;;  %vm5740_vm8 = vcmp.ne.s32.totalorder %v8791_v17, 0  ;;  %vm5776_vm9 = vcmp.lt.s32.totalorder %v8791_v17, 0  ;;  %v8879_v57 = vmul.u32.u64.low 3817748708, %v8816_v26  ;;  %v8880_v41 = vmul.u32.u64.high 3817748708, %v8816_v26, %v8879_v57 }
 0x166   : > { %v8914_v58 = vadd.s32 18, %v8791_v17  ;;  %v5497_v62 = vshrl.u32 %v8798_v20, 4  ;;  %v8962_v19 = vsub.s32 %v8729_v52, %v5465_v45  ;;  %v5443_v20 = vmul.u32 18, %v5442_v46 }
 0x167   : > { %v8977_v57 = vadd.s32 128, %v8663_v9  ;;  %v5508_v45 = vshrl.u32 %v8880_v41, 4 }
 0x168   : > { %10287 = vst [vmem:[#allocation19_spill] sm:$0xff] %v8914_v58  ;;  %10299 = vst [vmem:[#allocation25_spill] sm:$0xff] %v8962_v19  ;;  %v5498_v54 = vmul.u32 18, %v5497_v62  ;;  %vm5744_vm10 = vcmp.ne.s32.totalorder %v8962_v19, 0  ;;  %v9007_v47 = vsub.s32 %v8750_v63, %v5443_v20  ;;  %v5486_v62 = vshrl.u32 %v8895_v48, 4 }
 0x169   : > { %7301 = vmatmul.mubr.msk.bf16.gmra.mrb[32].mxu0 %vm341_vm1, %v4741_v8  ;;  %v8768_v8 = vadd.s32 18, %v8732_v53  ;;  %vm5775_vm1 = vcmp.lt.s32.totalorder %v8756_v0, 0  ;;  %v9017_v41 = vmul.u32.u64.low 3817748708, %v8977_v57  ;;  %v9018_v29 = vmul.u32.u64.high 3817748708, %v8977_v57, %v9017_v41 }
 0x16a   : > { %vm8872_vm12 = vmand %vm5775_vm1, %vm5739_vm0  ;;  %vm5741_vm1 = vcmp.ne.s32.totalorder %v8847_v33, 0  ;;  %10303 = vst [vmem:[#allocation29_spill] sm:$0xff] %v9007_v47  ;;  %vm5780_vm11 = vcmp.lt.s32.totalorder %v8962_v19, 0  ;;  %v9025_v63 = vsub.s32 %v8763_v5, %v5498_v54  ;;  %v9028_v48 = vadd.s32 160, %v8663_v9 }
 0x16b   : > { %v10279_v7 = vsel %vm8872_vm12, 4294967295, %v10278_v7  ;;  %vm8903_vm0 = vmand %vm5776_vm9, %vm5740_vm8  ;;  %v9031_v20 = vadd.s32 184, %v8663_v9  ;;  %v9045_v5 = vadd.s32 168, %v8663_v9  ;;  %v5542_v54 = vmul.u32 18, %v5541_v36 }
 0x16c   : > { %v10285_v51 = vsel %vm8903_vm0, 4294967295, %v10284_v51  ;;  %vm8939_vm8 = vmand %vm5779_vm14, %vm5743_vm13  ;;  %v9067_v36 = vadd.s32 18, %v8962_v19  ;;  %vm5742_vm13 = vcmp.ne.s32.totalorder %v9007_v47, 0  ;;  %vm10314_vm14 = vcmp.lt.s32.totalorder %v9007_v47, 0 }
 0x16d   : > { %10286 = vst [vmem:[#allocation18_spill] sm:$0xff] %v10285_v51  ;;  %v10293_v2 = vsel %vm8939_vm8, 4294967295, %v10292_v2  ;;  %vm8957_vm9 = vmand %vm5777_vm4, %vm5741_vm1  ;;  %vm10318_vm4 = vcmp.ne.s32.totalorder %v9025_v63, 0  ;;  %v10330_v51 = vmov 0 }
 0x16e   : > { %10294 = vst [vmem:[#allocation22_spill] sm:$0xff] %v10293_v2  ;;  %v10297_v22 = vsel %vm8957_vm9, 4294967295, %v10296_v22  ;;  %10307 = vst [vmem:[#allocation33_spill] sm:$0xff] %v9067_v36  ;;  %vm10319_vm9 = vcmp.lt.s32.totalorder %v9025_v63, 0 }
 0x16f   : > { %10298 = vst [vmem:[#allocation24_spill] sm:$0xff] %v10297_v22  ;;  %vm9106_vm1 = vmand %vm5780_vm11, %vm5744_vm10  ;;  %vm10323_vm11 = vcmp.ne.s32.totalorder %v9034_v56, 0  ;;  %vm10324_vm10 = vcmp.lt.s32.totalorder %v9034_v56, 0 }
 0x170   : > { %vm9120_vm8 = vmand %vm10314_vm14, %vm5742_vm13 }
 0x171   : > { %vm9134_vm0 = vmand %vm10319_vm9, %vm10318_vm4 }
 0x172   : > { %vm9147_vm6 = vmand %vm10324_vm10, %vm10323_vm11 }
 0x1cc   : > { %v8759_v1 = vpop.f32.mrb[0].mxu1 }
 0x1cd   : > { %v8765_v6 = vpop.f32.mrb[1].mxu1 }
 0x1ce   : > { %v8774_v11 = vpop.f32.mrb[2].mxu1 }
 0x1cf   : > { %v8783_v15 = vpop.f32.mrb[3].mxu1 }
 0x1d0   : > { %10263 = vst [vmem:[#allocation9_spill] sm:$0xff] %v8783_v15 }
 0x1d4   : > { %v8852_v37 = vpop.f32.mrb[4].mxu1 }
 0x1d5   : > { %10274 = vst [vmem:[#allocation14_spill] sm:$0xff] %v8852_v37  ;;  %v8866_v34 = vpop.f32.mrb[5].mxu1 }
 0x1d6   : > { %10277 = vst [vmem:[#allocation15_spill] sm:$0xff] %v8866_v34  ;;  %v8882_v42 = vpop.f32.mrb[6].mxu1 }
 0x1d7   : > { %10280 = vst [vmem:[#allocation16_spill] sm:$0xff] %v8882_v42  ;;  %v8897_v50 = vpop.f32.mrb[7].mxu1 }
 0x1d8   : > { %10283 = vst [vmem:[#allocation17_spill] sm:$0xff] %v8897_v50  ;;  %v9041_v50 = vmul.u32.u64.low 3817748708, %v9011_v38  ;;  %v9042_v23 = vmul.u32.u64.high 3817748708, %v9011_v38, %v9041_v50 }
 0x1dc   : > { %v8979_v52 = vpop.f32.mrb[8].mxu1 }
 0x1dd   : > { %10300 = vst [vmem:[#allocation26_spill] sm:$0xff] %v8979_v52  ;;  %v8993_v25 = vpop.f32.mrb[9].mxu1  ;;  %v5487_v52 = vmul.u32 18, %v5486_v62 }
 0x1de   : > { %10301 = vst [vmem:[#allocation27_spill] sm:$0xff] %v8993_v25  ;;  %v9003_v46 = vpop.f32.mrb[10].mxu1  ;;  %v9037_v41 = vmul.u32.u64.low 3817748708, %v9001_v24  ;;  %v9038_v25 = vmul.u32.u64.high 3817748708, %v9001_v24, %v9037_v41 }
 0x1df   : > { %10302 = vst [vmem:[#allocation28_spill] sm:$0xff] %v9003_v46  ;;  %v9013_v13 = vpop.f32.mrb[11].mxu1  ;;  %v9021_v46 = vadd.s32 176, %v8663_v9  ;;  %v9061_v41 = vmul.u32.u64.low 3817748708, %v9031_v20  ;;  %v9062_v50 = vmul.u32.u64.high 3817748708, %v9031_v20, %v9061_v41  ;;  %v9091_v4 = vsub.s32 %v8832_v30, %v5487_v52 }
 0x1e0   : > { %10304 = vst [vmem:[#allocation30_spill] sm:$0xff] %v9013_v13  ;;  %v5509_v13 = vmul.u32 18, %v5508_v45  ;;  %v9057_v45 = vmul.u32.u64.low 3817748708, %v9028_v48  ;;  %v9058_v62 = vmul.u32.u64.high 3817748708, %v9028_v48, %v9057_v45  ;;  %v5552_v30 = vshrl.u32 %v9038_v25, 4 }
 0x1e1   : > { %v9048_v61 = vmul.u32.u64.low 3817748708, %v9021_v46  ;;  %v9049_v2 = vmul.u32.u64.high 3817748708, %v9021_v46, %v9048_v61  ;;  %v9077_v45 = vadd.s32 18, %v9007_v47  ;;  %v10315_v52 = vmov 0 }
 0x1e2   : > { %v9072_v61 = vadd.s32 192, %v8663_v9  ;;  %v9080_v34 = vsub.s32 %v8816_v26, %v5509_v13  ;;  %v9096_v26 = vsub.s32 %v8850_v35, %v5542_v54  ;;  %v10316_v52 = vsel %vm9120_vm8, 4294967295, %v10315_v52 }
 0x1e3   : > { %10309 = vst [vmem:[#allocation35_spill] sm:$0xff] %v9077_v45  ;;  %v9099_v13 = vmul.u32.u64.low 3817748708, %v9052_v10  ;;  %v9100_v22 = vmul.u32.u64.high 3817748708, %v9052_v10, %v9099_v13  ;;  %10317 = vst [vmem:[#allocation38_spill] sm:$0xff] %v10316_v52  ;;  %v9125_v54 = vadd.s32 18, %v9025_v63  ;;  %v5530_v25 = vshrl.u32 %v9042_v23, 4 }
 0x1e4   : > { %v9054_v14 = vpop.f32.mrb[12].mxu1  ;;  %v10320_v13 = vmov 0  ;;  %vm5746_vm13 = vcmp.ne.s32.totalorder %v9091_v4, 0  ;;  %vm5782_vm14 = vcmp.lt.s32.totalorder %v9091_v4, 0  ;;  %v10325_v23 = vmov 0 }
 0x1e5   : > { %10305 = vst [vmem:[#allocation31_spill] sm:$0xff] %v9054_v14  ;;  %v9064_v42 = vpop.f32.mrb[13].mxu1  ;;  %v10321_v13 = vsel %vm9134_vm0, 4294967295, %v10320_v13  ;;  %v10326_v23 = vsel %vm9147_vm6, 4294967295, %v10325_v23  ;;  %v5563_v17 = vshrl.u32 %v9058_v62, 4  ;;  %vm10328_vm10 = vcmp.ne.s32.totalorder %v9080_v34, 0  ;;  %vm9181_vm4 = vmand %vm5782_vm14, %vm5746_vm13 }
 0x1e6   : > { %10306 = vst [vmem:[#allocation32_spill] sm:$0xff] %v9064_v42  ;;  %v9074_v14 = vpop.f32.mrb[14].mxu1  ;;  %v9083_v41 = vmul.u32.u64.low 3817748708, %v9045_v5  ;;  %v9084_v42 = vmul.u32.u64.high 3817748708, %v9045_v5, %v9083_v41  ;;  %vm10329_vm11 = vcmp.lt.s32.totalorder %v9080_v34, 0  ;;  %v9173_v62 = vadd.s32 18, %v9080_v34 }
 0x1e7   : > { %10308 = vst [vmem:[#allocation34_spill] sm:$0xff] %v9074_v14  ;;  %v9086_v33 = vpop.f32.mrb[15].mxu1  ;;  %v5519_v14 = vshrl.u32 %v9018_v29, 4  ;;  %v10311_v41 = vmov 0  ;;  %v9113_v29 = vmul.u32.u64.low 3817748708, %v9072_v61  ;;  %v9114_v35 = vmul.u32.u64.high 3817748708, %v9072_v61, %v9113_v29  ;;  %vm9168_vm9 = vmand %vm10329_vm11, %vm10328_vm10 }
 0x1e8   : > { %10310 = vst [vmem:[#allocation36_spill] sm:$0xff] %v9086_v33  ;;  %v10312_v41 = vsel %vm9106_vm1, 4294967295, %v10311_v41  ;;  %v5585_v33 = vshrl.u32 %v9049_v2, 4  ;;  %v10331_v51 = vsel %vm9168_vm9, 4294967295, %v10330_v51  ;;  %v10333_v2 = vmov 0 }
 0x1e9   : > { %10313 = vst [vmem:[#allocation37_spill] sm:$0xff] %v10312_v41  ;;  %v5520_v29 = vmul.u32 18, %v5519_v14  ;;  %v5596_v14 = vshrl.u32 %v9062_v50, 4  ;;  %v5553_v50 = vmul.u32 18, %v5552_v30  ;;  %v10334_v2 = vsel %vm9181_vm4, 4294967295, %v10333_v2 }
 0x1ea   : > { %v9186_v19 = vadd.s32 18, %v9091_v4  ;;  %v9189_v36 = vadd.s32 18, %v9096_v26  ;;  %v5531_v41 = vmul.u32 18, %v5530_v25  ;;  %v5574_v15 = vshrl.u32 %v9084_v42, 4 }
 0x1eb   : > { %vm10336_vm13 = vcmp.ne.s32.totalorder %v9096_v26, 0  ;;  %vm10337_vm14 = vcmp.lt.s32.totalorder %v9096_v26, 0  ;;  %v9207_v60 = vsub.s32 %v8977_v57, %v5520_v29  ;;  %v5586_v25 = vmul.u32 18, %v5585_v33 }
 0x1ec   : > { %v9141_v37 = vpop.f32.mrb[16].mxu1  ;;  %vm9202_vm10 = vmand %vm10337_vm14, %vm10336_vm13  ;;  %v9210_v42 = vadd.s32 216, %v8663_v9  ;;  %v5597_v47 = vmul.u32 18, %v5596_v14  ;;  %v5629_v45 = vshrl.u32 %v9100_v22, 4  ;;  %v9226_v57 = vsub.s32 %v9001_v24, %v5553_v50 }
 0x1ed   : > { %10322 = vst [vmem:[#allocation39_spill] sm:$0xff] %v9141_v37  ;;  %v9155_v58 = vpop.f32.mrb[17].mxu1  ;;  %v9162_v37 = vadd.s32 18, %v9034_v56  ;;  %v10339_v18 = vsel %vm9202_vm10, 4294967295, %v10338_v18  ;;  %v5607_v29 = vshrl.u32 %v9114_v35, 4  ;;  %v9238_v14 = vsub.s32 %v9011_v38, %v5531_v41 }
 0x1ee   : > { %10327 = vst [vmem:[#allocation40_spill] sm:$0xff] %v9155_v58  ;;  %v9175_v58 = vpop.f32.mrb[18].mxu1  ;;  %10340 = vst [vmem:[#allocation43_spill] sm:$0xff] %v9226_v57  ;;  %v9242_v24 = vsub.s32 %v9021_v46, %v5586_v25  ;;  %v9245_v35 = vmul.u32.u64.low 3817748708, %v9210_v42  ;;  %v9246_v50 = vmul.u32.u64.high 3817748708, %v9210_v42, %v9245_v35  ;;  %vm5785_vm13 = vcmp.lt.s32.totalorder %v9207_v60, 0 }
 0x1ef   : > { %10332 = vst [vmem:[#allocation41_spill] sm:$0xff] %v9175_v58  ;;  %v9192_v30 = vpop.f32.mrb[19].mxu1  ;;  %10341 = vst [vmem:[#allocation44_spill] sm:$0xff] %v9238_v14  ;;  %v5575_v58 = vmul.u32 18, %v5574_v15  ;;  %v9253_v22 = vsub.s32 %v9031_v20, %v5597_v47  ;;  %v5630_v38 = vmul.u32 18, %v5629_v45  ;;  %vm5752_vm14 = vcmp.ne.s32.totalorder %v9226_v57, 0 }
 0x1f0   : > { %10335 = vst [vmem:[#allocation42_spill] sm:$0xff] %v9192_v30  ;;  %v5564_v30 = vmul.u32 18, %v5563_v17  ;;  %10342 = vst [vmem:[#allocation45_spill] sm:$0xff] %v9242_v24  ;;  %vm5788_vm11 = vcmp.lt.s32.totalorder %v9226_v57, 0  ;;  %v5608_v15 = vmul.u32 18, %v5607_v29  ;;  %v9258_v46 = vadd.s32 200, %v8663_v9 }
 0x1f1   : > { %10344 = vst [vmem:[#allocation47_spill] sm:$0xff] %v9253_v22  ;;  %v9261_v41 = vadd.s32 18, %v9207_v60  ;;  %vm5786_vm9 = vcmp.lt.s32.totalorder %v9238_v14, 0  ;;  %vm10346_vm4 = vcmp.ne.s32.totalorder %v9207_v60, 0  ;;  %v9275_v20 = vadd.s32 18, %v9226_v57  ;;  %vm9282_vm1 = vmand %vm5788_vm11, %vm5752_vm14 }
 0x1f2   : > { %v9250_v33 = vsub.s32 %v9028_v48, %v5564_v30  ;;  %v9266_v48 = vsub.s32 %v9045_v5, %v5575_v58  ;;  %vm9270_vm0 = vmand %vm5785_vm13, %vm10346_vm4  ;;  %v9278_v45 = vadd.s32 18, %v9238_v14  ;;  %vm5755_vm6 = vcmp.ne.s32.totalorder %v9242_v24, 0 }
 0x1f3   : > { %10349 = vst [vmem:[#allocation49_spill] sm:$0xff] %v9275_v20  ;;  %vm5791_vm10 = vcmp.lt.s32.totalorder %v9242_v24, 0  ;;  %v10350_v30 = vmov 0  ;;  %v9290_v58 = vsub.s32 %v9052_v10, %v5630_v38  ;;  %v10354_v5 = vsel %vm8822_vm3, %v8753_v3, %v8725_v49 }
 0x1f4   : > { %10343 = vst [vmem:[#allocation46_spill] sm:$0xff] %v9250_v33  ;;  %10345 = vst [vmem:[#allocation48_spill] sm:$0xff] %v9266_v48  ;;  %v10351_v30 = vsel %vm9282_vm1, 4294967295, %v10350_v30  ;;  %vm5753_vm8 = vcmp.ne.s32.totalorder %v9250_v33, 0  ;;  %vm5789_vm4 = vcmp.lt.s32.totalorder %v9250_v33, 0  ;;  %vm9297_vm12 = vcmp.lt.s32.totalorder %v10354_v5, 16 }
 0x1f5   : > { %10352 = vst [vmem:[#allocation50_spill] sm:$0xff] %v10351_v30  ;;  %10353 = vst [vmem:[#allocation51_spill] sm:$0xff] %v9290_v58  ;;  %vm10357_vm11 = vcmp.ne.s32.totalorder %v9238_v14, 0  ;;  %v9309_v10 = vsub.s32 %v9072_v61, %v5608_v15  ;;  %v9312_v27 = vmul.u32.u64.low 3817748708, %v9258_v46  ;;  %v9313_v35 = vmul.u32.u64.high 3817748708, %v9258_v46, %v9312_v27 }
 0x1f6   : > { %vm9303_vm14 = vmand %vm5786_vm9, %vm10357_vm11  ;;  %v10361_v3 = vmov 0  ;;  %vm5754_vm9 = vcmp.ne.s32.totalorder %v9266_v48, 0  ;;  %v9326_v61 = vadd.s32 240, %v8663_v9  ;;  %v10364_v38 = vsel %vm8804_vm2, %v8736_v55, %v8717_v44  ;;  %v10512_v55 = vld [vmem:[#allocation41_spill] sm:$0xff] }
 0x1f7   : > { %10360 = vst [vmem:[#allocation52_spill] sm:$0xff] %v9309_v10  ;;  %vm9319_vm3 = vmand %vm5791_vm10, %vm5755_vm6  ;;  %vm9333_vm13 = vcmp.lt.s32.totalorder %v10364_v38, 16  ;;  %v10367_v5 = vsel %vm8858_vm7, %v8786_v16, %v8742_v59  ;;  %v9351_v44 = vadd.s32 18, %v9242_v24  ;;  %v9362_v59 = vadd.s32 18, %v9250_v33 }
 0x1f8   : > { %v10362_v3 = vsel %vm9319_vm3, 4294967295, %v10361_v3  ;;  %vm9342_vm6 = vcmp.lt.s32.totalorder %v10367_v5, 16  ;;  %vm9357_vm2 = vmand %vm5789_vm4, %vm5753_vm8  ;;  %v5640_v16 = vshrl.u32 %v9246_v50, 4  ;;  %vm10373_vm7 = vcmp.ne.s32.totalorder %v9253_v22, 0 }
 0x1f9   : > { %10363 = vst [vmem:[#allocation53_spill] sm:$0xff] %v10362_v3  ;;  %10370 = vst [vmem:[#allocation54_spill] sm:$0xff] %v9351_v44  ;;  %vm10374_vm10 = vcmp.lt.s32.totalorder %v9253_v22, 0  ;;  %v9374_v38 = vadd.s32 18, %v9253_v22  ;;  %v9377_v5 = vadd.s32 18, %v9266_v48  ;;  %vm5795_vm4 = vcmp.lt.s32.totalorder %v9290_v58, 0 }
 0x1fa   : > { %vm9369_vm11 = vmand %vm10374_vm10, %vm10373_vm7  ;;  %v10380_v50 = vsel %vm8838_vm5, %v8768_v8, %v8732_v53  ;;  %vm10383_vm10 = vcmp.lt.s32.totalorder %v9266_v48, 0  ;;  %v10384_v17 = vmov 0  ;;  %vm5757_vm5 = vcmp.ne.s32.totalorder %v9309_v10, 0 }
 0x1fb   : > { %v10376_v39 = vsel %vm9369_vm11, 4294967295, %v10375_v39  ;;  %10378 = vst [vmem:[#allocation56_spill] sm:$0xff] %v9374_v38  ;;  %10379 = vst [vmem:[#allocation57_spill] sm:$0xff] %v9377_v5  ;;  %vm9389_vm7 = vcmp.lt.s32.totalorder %v10380_v50, 16  ;;  %vm5793_vm1 = vcmp.lt.s32.totalorder %v9309_v10, 0  ;;  %v9408_v53 = vadd.s32 224, %v8663_v9 }
 0x1fc   : > { %10377 = vst [vmem:[#allocation55_spill] sm:$0xff] %v10376_v39  ;;  %vm9401_vm8 = vmand %vm10383_vm10, %vm5754_vm9  ;;  %v9411_v8 = vadd.s32 18, %v9290_v58  ;;  %v9414_v31 = vmul.u32.u64.low 3817748708, %v9326_v61  ;;  %v9415_v50 = vmul.u32.u64.high 3817748708, %v9326_v61, %v9414_v31  ;;  %v9418_v49 = vadd.s32 248, %v8663_v9  ;;  %v7270_v14 = vpop.f32.mrb[0].mxu0 }
 0x1fd   : > { %v10385_v17 = vsel %vm9401_vm8, 4294967295, %v10384_v17  ;;  %vm10388_vm9 = vcmp.ne.s32.totalorder %v9290_v58, 0  ;;  %v10389_v20 = vmov 0  ;;  %v9435_v31 = vadd.s32 18, %v9309_v10  ;;  %v4833_v22 = vpop.f32.mrb[1].mxu0 }
 0x1fe   : > { %10386 = vst [vmem:[#allocation58_spill] sm:$0xff] %v10385_v17  ;;  %10387 = vst [vmem:[#allocation59_spill] sm:$0xff] %v9411_v8  ;;  %v5641_v30 = vmul.u32 18, %v5640_v16  ;;  %v10393_v24 = vmov 0  ;;  %v9455_v16 = vadd.s32 232, %v8663_v9  ;;  %v9458_v44 = vadd.s32 272, %v8663_v9 }
 0x1ff   : > { %vm9430_vm10 = vmand %vm5795_vm4, %vm10388_vm9  ;;  %10392 = vst [vmem:[#allocation61_spill] sm:$0xff] %v9435_v31  ;;  %v7306_v52 = vadd.f32 %v7270_v14, %v8759_v1  ;;  %v10397_v57 = vsel %vm8888_vm15, %v8844_v32, %v8777_v12  ;;  %v5618_v39 = vshrl.u32 %v9313_v35, 4  ;;  %v7307_v17 = vadd.f32 %v4833_v22, %v8765_v6  ;;  %v7271_v3 = vpop.f32.mrb[2].mxu0  ;;  %v10405_v22 = vld [vmem:[#allocation20_spill] sm:$0xff] }
 0x200   : > { %v10390_v20 = vsel %vm9430_vm10, 4294967295, %v10389_v20  ;;  %vm9450_vm4 = vmand %vm5793_vm1, %vm5757_vm5  ;;  %10396 = vst [vmem:[#allocation63_spill] sm:$0xff] %v9458_v44  ;;  %vm9466_vm9 = vcmp.lt.s32.totalorder %v10397_v57, 16  ;;  %v9472_v48 = vmul.u32.u64.low 3817748708, %v9408_v53  ;;  %v9473_v5 = vmul.u32.u64.high 3817748708, %v9408_v53, %v9472_v48  ;;  %v4836_v57 = vpop.f32.mrb[3].mxu0 }
 0x201   : > { %10391 = vst [vmem:[#allocation60_spill] sm:$0xff] %v10390_v20  ;;  %v10394_v24 = vsel %vm9450_vm4, 4294967295, %v10393_v24  ;;  %v9481_v12 = vmul.u32.u64.low 3817748708, %v9418_v49  ;;  %v9482_v32 = vmul.u32.u64.high 3817748708, %v9418_v49, %v9481_v12  ;;  %v7308_v43 = vadd.f32 %v7271_v3, %v8774_v11  ;;  %v10406_v48 = vld [vmem:[#allocation11_spill] sm:$0xff]  ;;  %v10414_v11 = vld [vmem:[#allocation10_spill] sm:$0xff] }
 0x202   : > { %10395 = vst [vmem:[#allocation62_spill] sm:$0xff] %v10394_v24  ;;  %vm10400_vm15 = vnez %v10279_v7  ;;  %vm10404_vm5 = vnez %v10289_v40  ;;  %v5949_v7 = vsel %vm9297_vm12, %v7307_v17, 0.0  ;;  %v10410_v40 = vld [vmem:[#allocation9_spill] sm:$0xff]  ;;  %v10422_v20 = vld [vmem:[#allocation23_spill] sm:$0xff] }
 0x203   : > { %v10401_v14 = vsel %vm10400_vm15, %v8827_v28, %v8756_v0  ;;  %v10407_v35 = vsel %vm10404_vm5, %v10405_v22, %v10406_v48  ;;  %v9508_v0 = vsub.s32 %v9210_v42, %v5641_v30  ;;  %v9511_v28 = vadd.s32 256, %v8663_v9  ;;  %v10411_v48 = vld [vmem:[#allocation18_spill] sm:$0xff] }
 0x204   : > { %vm9490_vm1 = vcmp.lt.s32.totalorder %v10401_v14, 16  ;;  %vm9499_vm10 = vcmp.lt.s32.totalorder %v10407_v35, 16  ;;  %v7309_v3 = vadd.f32 %v4836_v57, %v10410_v40  ;;  %v6692_v22 = vpack.c.bf16 %v7308_v43, %v7306_v52  ;;  %v10413_v35 = vld [vmem:[#allocation19_spill] sm:$0xff] }
 0x205   : > { %v9517_v12 = vmul.u32.u64.low 3817748708, %v9455_v16  ;;  %v9518_v14 = vmul.u32.u64.high 3817748708, %v9455_v16, %v9517_v12  ;;  %vm10412_vm15 = vnez %v10411_v48  ;;  %v5619_v30 = vmul.u32 18, %v5618_v39 }
 0x206   : > { %v10415_v58 = vsel %vm10412_vm15, %v10413_v35, %v10414_v11  ;;  %v9530_v25 = vmul.u32.u64.low 3817748708, %v9458_v44  ;;  %v9531_v8 = vmul.u32.u64.high 3817748708, %v9458_v44, %v9530_v25  ;;  %v5951_v57 = vsel %vm9333_vm13, %v7306_v52, 0.0  ;;  %6774 = vst [vmem:[%s9541_s9 + $0x8] sm:$0xff] %v6692_v22   ;;  %v10427_v44 = vld [vmem:[#allocation15_spill] sm:$0xff] }
 0x207   : > { %vm9525_vm5 = vcmp.lt.s32.totalorder %v10415_v58, 16  ;;  %v6687_v40 = vpack.c.bf16 %v7309_v3, %v7307_v17  ;;  %v5950_v12 = vsel %vm9342_vm6, %v7309_v3, 0.0  ;;  %v5673_v48 = vshrl.u32 %v9415_v50, 4  ;;  %v7274_v17 = vpop.f32.mrb[4].mxu0 }
 0x208   : > { %v6027_v11 = vmul.f32 %v5949_v7, %v5949_v7  ;;  %v5985_v58 = vadd.f32 %v5950_v12, %v5949_v7  ;;  %v6028_v39 = vmul.f32 %v5950_v12, %v5950_v12  ;;  %v9545_v35 = vadd.s32 280, %v8663_v9  ;;  %v10419_v7 = vld [vmem:[#allocation14_spill] sm:$0xff]  ;;  %v4849_v25 = vpop.f32.mrb[5].mxu0  ;;  %v10420_v12 = vld [vmem:[#allocation24_spill] sm:$0xff] }
 0x209   : > { %v5952_v52 = vsel %vm9389_vm7, %v7308_v43, 0.0  ;;  %6688 = vst [vmem:[%s9541_s9] sm:$0xff] %v6687_v40   ;;  %v9553_v15 = vadd.s32 18, %v9508_v0  ;;  %v6029_v27 = vmul.f32 %v5951_v57, %v5951_v57  ;;  %v7310_v22 = vadd.f32 %v7274_v17, %v10419_v7  ;;  %v7275_v31 = vpop.f32.mrb[6].mxu0  ;;  %v10428_v7 = vld [vmem:[#allocation16_spill] sm:$0xff] }
 0x20a   : > { %10418 = vst [vmem:[#allocation20_spill] sm:$0xff] %v9545_v35  ;;  %v5986_v50 = vadd.f32 %v5985_v58, %v5951_v57  ;;  %v6063_v3 = vadd.f32 %v6028_v39, %v6027_v11  ;;  %vm10421_vm6 = vnez %v10420_v12  ;;  %v7311_v10 = vadd.f32 %v4849_v25, %v10427_v44  ;;  %v4852_v35 = vpop.f32.mrb[7].mxu0 }
 0x20b   : > { %v10424_v43 = vsel %vm10421_vm6, %v10422_v20, %v10423_v21  ;;  %v9567_v24 = vsub.s32 %v9258_v46, %v5619_v30  ;;  %v5674_v57 = vmul.u32 18, %v5673_v48  ;;  %v5651_v11 = vshrl.u32 %v9473_v5, 4  ;;  %v10429_v20 = vld [vmem:[#allocation22_spill] sm:$0xff]  ;;  %v10431_v21 = vld [vmem:[#allocation21_spill] sm:$0xff]  ;;  %v10438_v30 = vld [vmem:[#allocation35_spill] sm:$0xff] }
 0x20c   : > { %vm9561_vm7 = vcmp.lt.s32.totalorder %v10424_v43, 16  ;;  %v6030_v58 = vmul.f32 %v5952_v52, %v5952_v52  ;;  %v6064_v39 = vadd.f32 %v6063_v3, %v6029_v27  ;;  %v5987_v17 = vadd.f32 %v5986_v50, %v5952_v52  ;;  %v10432_v43 = vld [vmem:[#allocation12_spill] sm:$0xff]  ;;  %v10436_v46 = vld [vmem:[#allocation38_spill] sm:$0xff]  ;;  %v10439_v48 = vld [vmem:[#allocation29_spill] sm:$0xff]  ;;  %v7278_v6 = vpop.f32.mrb[8].mxu0 }
 0x20d   : > { %v7312_v12 = vadd.f32 %v7275_v31, %v10428_v7  ;;  %vm10430_vm15 = vnez %v10429_v20  ;;  %vm10437_vm13 = vnez %v10436_v46  ;;  %v5953_v31 = vsel %vm9466_vm9, %v7311_v10, 0.0  ;;  %v10443_v52 = vld [vmem:[#allocation17_spill] sm:$0xff] }
 0x20e   : > { %v10433_v33 = vsel %vm10430_vm15, %v10431_v21, %v10432_v43  ;;  %v10440_v5 = vsel %vm10437_vm13, %v10438_v30, %v10439_v48  ;;  %v7313_v50 = vadd.f32 %v4852_v35, %v10443_v52  ;;  %vm10444_vm15 = vcmp.ne.s32.totalorder %v9508_v0, 0  ;;  %v10448_v43 = vld [vmem:[#allocation37_spill] sm:$0xff] }
 0x20f   : > { %vm9576_vm6 = vcmp.lt.s32.totalorder %v10433_v33, 16  ;;  %vm9585_vm12 = vcmp.lt.s32.totalorder %v10440_v5, 16  ;;  %vm10445_vm4 = vcmp.lt.s32.totalorder %v9508_v0, 0  ;;  %v5684_v3 = vshrl.u32 %v9482_v32, 4  ;;  %v10450_v35 = vld [vmem:[#allocation33_spill] sm:$0xff] }
 0x210   : > { %vm9596_vm11 = vmand %vm10445_vm4, %vm10444_vm15  ;;  %v9602_v25 = vadd.s32 264, %v8663_v9  ;;  %v5988_v7 = vadd.f32 %v5987_v17, %v5953_v31  ;;  %v6031_v38 = vmul.f32 %v5953_v31, %v5953_v31  ;;  %v6065_v20 = vadd.f32 %v6064_v39, %v6030_v58  ;;  %v10451_v46 = vld [vmem:[#allocation25_spill] sm:$0xff] }
 0x211   : > { %v6702_v21 = vpack.c.bf16 %v7312_v12, %v7310_v22  ;;  %vm10449_vm9 = vnez %v10448_v43  ;;  %v5955_v32 = vsel %vm9490_vm1, %v7310_v22, 0.0  ;;  %v6697_v5 = vpack.c.bf16 %v7313_v50, %v7311_v10 }
 0x212   : > { %v10452_v30 = vsel %vm10449_vm9, %v10450_v35, %v10451_v46  ;;  %v5954_v9 = vsel %vm9499_vm10, %v7313_v50, 0.0  ;;  %v5652_v17 = vmul.u32 18, %v5651_v11  ;;  %v6066_v31 = vadd.f32 %v6065_v20, %v6031_v38  ;;  %v10455_v50 = vld [vmem:[#allocation26_spill] sm:$0xff]  ;;  %v4865_v38 = vpop.f32.mrb[9].mxu0  ;;  %v10460_v20 = vld [vmem:[#allocation27_spill] sm:$0xff] }
 0x213   : > { %vm9609_vm13 = vcmp.lt.s32.totalorder %v10452_v30, 16  ;;  %6776 = vst [vmem:[%s9541_s9 + $0x18] sm:$0xff] %v6702_v21   ;;  %v5989_v58 = vadd.f32 %v5988_v7, %v5954_v9  ;;  %v6032_v39 = vmul.f32 %v5954_v9, %v5954_v9  ;;  %v5904_v52 = vsel %vm9596_vm11, %v9553_v15, %v9508_v0  ;;  %6775 = vst [vmem:[%s9541_s9 + $0x10] sm:$0xff] %v6697_v5   ;;  %v7279_v35 = vpop.f32.mrb[10].mxu0 }
 0x214   : > { %v5956_v43 = vsel %vm9525_vm5, %v7312_v12, 0.0  ;;  %vm5758_vm4 = vcmp.ne.s32.totalorder %v9567_v24, 0  ;;  %v5662_v10 = vshrl.u32 %v9518_v14, 4  ;;  %v6033_v1 = vmul.f32 %v5955_v32, %v5955_v32  ;;  %v4868_v9 = vpop.f32.mrb[11].mxu0 }
 0x215   : > { %v5990_v22 = vadd.f32 %v5989_v58, %v5955_v32  ;;  %v6067_v11 = vadd.f32 %v6066_v31, %v6032_v39  ;;  %v7314_v7 = vadd.f32 %v7278_v6, %v10455_v50  ;;  %vm10456_vm10 = vnez %v10326_v23  ;;  %v7282_v44 = vpop.f32.mrb[12].mxu0 }
 0x216   : > { %v10457_v42 = vsel %vm10456_vm10, %v9162_v37, %v9034_v56  ;;  %v7315_v21 = vadd.f32 %v4865_v38, %v10460_v20  ;;  %v9640_v14 = vadd.s32 18, %v9567_v24  ;;  %v9643_v46 = vsub.s32 %v9326_v61, %v5674_v57  ;;  %v10461_v37 = vld [vmem:[#allocation28_spill] sm:$0xff] }
 0x217   : > { %vm9634_vm5 = vcmp.lt.s32.totalorder %v10457_v42, 16  ;;  %v9646_v30 = vsub.s32 %v9408_v53, %v5652_v17  ;;  %v6034_v23 = vmul.f32 %v5956_v43, %v5956_v43  ;;  %v6068_v32 = vadd.f32 %v6067_v11, %v6033_v1  ;;  %v10506_v1 = vld [vmem:[#allocation46_spill] sm:$0xff] }
 0x218   : > { %v5991_v5 = vadd.f32 %v5990_v22, %v5956_v43  ;;  %v7316_v56 = vadd.f32 %v7279_v35, %v10461_v37  ;;  %vm10462_vm15 = vnez %v10321_v13  ;;  %vm10466_vm10 = vnez %v10334_v2  ;;  %v10470_v13 = vld [vmem:[#allocation30_spill] sm:$0xff] }
 0x219   : > { %v10463_v31 = vsel %vm10462_vm15, %v9125_v54, %v9025_v63  ;;  %v10467_v61 = vsel %vm10466_vm10, %v9186_v19, %v9091_v4  ;;  %v5957_v57 = vsel %vm9561_vm7, %v7315_v21, 0.0  ;;  %v7317_v17 = vadd.f32 %v4868_v9, %v10470_v13  ;;  %v9670_v63 = vpop.f32.mrb[20].mxu1  ;;  %v10482_v9 = vld [vmem:[#allocation32_spill] sm:$0xff] }
 0x21a   : > { %vm9654_vm9 = vcmp.lt.s32.totalorder %v10463_v31, 16  ;;  %vm9663_vm1 = vcmp.lt.s32.totalorder %v10467_v61, 16  ;;  %v9673_v54 = vmul.u32.u64.low 3817748708, %v9511_v28  ;;  %v9674_v39 = vmul.u32.u64.high 3817748708, %v9511_v28, %v9673_v54  ;;  %v9677_v6 = vpop.f32.mrb[21].mxu1 }
 0x21b   : > { %v5992_v2 = vadd.f32 %v5991_v5, %v5957_v57  ;;  %v6035_v43 = vmul.f32 %v5957_v57, %v5957_v57  ;;  %v6069_v4 = vadd.f32 %v6068_v32, %v6034_v23  ;;  %v6712_v19 = vpack.c.bf16 %v7316_v56, %v7314_v7  ;;  %v10478_v5 = vld [vmem:[#allocation31_spill] sm:$0xff]  ;;  %v10483_v54 = vld [vmem:[#allocation34_spill] sm:$0xff] }
 0x21c   : > { %vm10471_vm15 = vnez %v10331_v51  ;;  %vm10475_vm10 = vcmp.lt.s32.totalorder %v9567_v24, 0  ;;  %v5959_v11 = vsel %vm9576_vm6, %v7314_v7, 0.0  ;;  %v6707_v50 = vpack.c.bf16 %v7317_v17, %v7315_v21 }
 0x21d   : > { %v10472_v40 = vsel %vm10471_vm15, %v9173_v62, %v9080_v34  ;;  %vm9692_vm11 = vmand %vm10475_vm10, %vm5758_vm4  ;;  %v5958_v51 = vsel %vm9585_vm12, %v7317_v17, 0.0  ;;  %v9700_v34 = vpop.f32.mrb[22].mxu1  ;;  %v5685_v62 = vmul.u32 18, %v5684_v3  ;;  %v6070_v38 = vadd.f32 %v6069_v4, %v6035_v43  ;;  %6778 = vst [vmem:[%s9541_s9 + $0x28] sm:$0xff] %v6712_v19   ;;  %v10488_v4 = vld [vmem:[#allocation44_spill] sm:$0xff] }
 0x21e   : > { %vm9684_vm7 = vcmp.lt.s32.totalorder %v10472_v40, 16  ;;  %v5993_v42 = vadd.f32 %v5992_v2, %v5958_v51  ;;  %v6036_v20 = vmul.f32 %v5958_v51, %v5958_v51  ;;  %v9703_v35 = vpop.f32.mrb[23].mxu1  ;;  %v5663_v23 = vmul.u32 18, %v5662_v10  ;;  %6777 = vst [vmem:[%s9541_s9 + $0x20] sm:$0xff] %v6707_v50   ;;  %v4881_v10 = vpop.f32.mrb[13].mxu0 }
 0x21f   : > { %v5960_v32 = vsel %vm9609_vm13, %v7316_v56, 0.0  ;;  %v5902_v27 = vsel %vm9692_vm11, %v9640_v14, %v9567_v24  ;;  %vm5763_vm12 = vcmp.ne.s32.totalorder %v9643_v46, 0  ;;  %vm5799_vm6 = vcmp.lt.s32.totalorder %v9643_v46, 0  ;;  %v7283_v61 = vpop.f32.mrb[14].mxu0  ;;  %v9752_v51 = vpop.f32.mrb[24].mxu1  ;;  %v10528_v56 = vld [vmem:[#allocation56_spill] sm:$0xff] }
 0x220   : > { %v6037_v3 = vmul.f32 %v5959_v11, %v5959_v11  ;;  %v5994_v7 = vadd.f32 %v5993_v42, %v5959_v11  ;;  %v6071_v21 = vadd.f32 %v6070_v38, %v6036_v20  ;;  %v7318_v37 = vadd.f32 %v7282_v44, %v10478_v5  ;;  %v9766_v20 = vpop.f32.mrb[25].mxu1  ;;  %v10497_v44 = vld [vmem:[#allocation49_spill] sm:$0xff] }
 0x221   : > { %v10479_v48 = vsel %vm9270_vm0, %v9261_v41, %v9207_v60  ;;  %v7319_v31 = vadd.f32 %v4881_v10, %v10482_v9  ;;  %v9726_v57 = vadd.s32 18, %v9643_v46  ;;  %vm5761_vm4 = vcmp.ne.s32.totalorder %v9646_v30, 0  ;;  %v4884_v60 = vpop.f32.mrb[15].mxu0  ;;  %v9789_v9 = vpop.f32.mrb[26].mxu1 }
 0x222   : > { %vm9720_vm13 = vcmp.lt.s32.totalorder %v10479_v48, 16  ;;  %v6038_v13 = vmul.f32 %v5960_v32, %v5960_v32  ;;  %v6072_v17 = vadd.f32 %v6071_v21, %v6037_v3  ;;  %v5995_v47 = vadd.f32 %v5994_v7, %v5960_v32  ;;  %v10495_v32 = vld [vmem:[#allocation50_spill] sm:$0xff]  ;;  %v10498_v3 = vld [vmem:[#allocation43_spill] sm:$0xff] }
 0x223   : > { %v7320_v2 = vadd.f32 %v7283_v61, %v10483_v54  ;;  %vm10484_vm0 = vnez %v10339_v18  ;;  %v10489_v19 = vsel %vm9303_vm14, %v9278_v45, %v10488_v4  ;;  %v5961_v11 = vsel %vm9634_vm5, %v7319_v31, 0.0  ;;  %v10492_v18 = vld [vmem:[#allocation36_spill] sm:$0xff]  ;;  %v9795_v54 = vpop.f32.mrb[27].mxu1 }
 0x224   : > { %v10485_v41 = vsel %vm10484_vm0, %v9189_v36, %v9096_v26  ;;  %vm9745_vm15 = vcmp.lt.s32.totalorder %v10489_v19, 16  ;;  %v7321_v50 = vadd.f32 %v4884_v60, %v10492_v18  ;;  %vm9758_vm0 = vmand %vm5799_vm6, %vm5763_vm12  ;;  %v9763_v26 = vadd.s32 18, %v9646_v30  ;;  %v10505_v19 = vld [vmem:[#allocation39_spill] sm:$0xff] }
 0x225   : > { %vm9736_vm10 = vcmp.lt.s32.totalorder %v10485_v41, 16  ;;  %v5717_v45 = vshrl.u32 %v9531_v8, 4  ;;  %v5996_v29 = vadd.f32 %v5995_v47, %v5961_v11  ;;  %v6039_v12 = vmul.f32 %v5961_v11, %v5961_v11 }
 0x226   : > { %v6073_v38 = vadd.f32 %v6072_v17, %v6038_v13  ;;  %v6722_v42 = vpack.c.bf16 %v7320_v2, %v7318_v37  ;;  %vm10496_vm14 = vnez %v10495_v32  ;;  %vm10502_vm12 = vcmp.lt.s32.totalorder %v9646_v30, 0 }
 0x227   : > { %v10499_v7 = vsel %vm10496_vm14, %v10497_v44, %v10498_v3  ;;  %vm9781_vm6 = vmand %vm10502_vm12, %vm5761_vm4  ;;  %v5963_v5 = vsel %vm9654_vm9, %v7318_v37, 0.0  ;;  %v6717_v10 = vpack.c.bf16 %v7321_v50, %v7319_v31  ;;  %v5962_v48 = vsel %vm9663_vm1, %v7321_v50, 0.0  ;;  %v7286_v37 = vpop.f32.mrb[16].mxu0 }
 0x228   : > { %vm9773_vm5 = vcmp.lt.s32.totalorder %v10499_v7, 16  ;;  %v9792_v61 = vsub.s32 %v9418_v49, %v5685_v62  ;;  %v6074_v13 = vadd.f32 %v6073_v38, %v6039_v12  ;;  %6780 = vst [vmem:[%s9541_s9 + $0x38] sm:$0xff] %v6722_v42   ;;  %v5997_v17 = vadd.f32 %v5996_v29, %v5962_v48  ;;  %v4897_v18 = vpop.f32.mrb[17].mxu0  ;;  %v10510_v29 = vld [vmem:[#allocation40_spill] sm:$0xff] }
 0x229   : > { %v6040_v47 = vmul.f32 %v5962_v48, %v5962_v48  ;;  %v5907_v58 = vsel %vm9758_vm0, %v9726_v57, %v9643_v46  ;;  %v5964_v53 = vsel %vm9684_vm7, %v7320_v2, 0.0  ;;  %6779 = vst [vmem:[%s9541_s9 + $0x30] sm:$0xff] %v6717_v10   ;;  %v5905_v49 = vsel %vm9781_vm6, %v9763_v26, %v9646_v30  ;;  %v10514_v10 = vld [vmem:[#allocation54_spill] sm:$0xff]  ;;  %v10515_v48 = vld [vmem:[#allocation45_spill] sm:$0xff] }
 0x22a   : > { %v9809_v62 = vsub.s32 %v9455_v16, %v5663_v23  ;;  %v5718_v31 = vmul.u32 18, %v5717_v45  ;;  %v6041_v60 = vmul.f32 %v5963_v5, %v5963_v5  ;;  %v5998_v41 = vadd.f32 %v5997_v17, %v5963_v5  ;;  %v7287_v16 = vpop.f32.mrb[18].mxu0  ;;  %v10511_v45 = vld [vmem:[#allocation20_spill] sm:$0xff] }
 0x22b   : > { %v6075_v4 = vadd.f32 %v6074_v13, %v6040_v47  ;;  %v7322_v11 = vadd.f32 %v7286_v37, %v10505_v19  ;;  %v10507_v2 = vsel %vm9357_vm2, %v9362_v59, %v10506_v1  ;;  %v7323_v12 = vadd.f32 %v4897_v18, %v10510_v29  ;;  %v4900_v5 = vpop.f32.mrb[19].mxu0  ;;  %v10520_v47 = vld [vmem:[#allocation57_spill] sm:$0xff]  ;;  %v10521_v37 = vld [vmem:[#allocation48_spill] sm:$0xff]  ;;  %v9849_v18 = vpop.f32.mrb[28].mxu1 }
 0x22c   : > { %vm9817_vm1 = vcmp.lt.s32.totalorder %v10507_v2, 16  ;;  %v5695_v23 = vshrl.u32 %v9674_v39, 4  ;;  %v9824_v38 = vmul.u32.u64.low 3817748708, %v10511_v45  ;;  %v9825_v42 = vmul.u32.u64.high 3817748708, %v10511_v45, %v9824_v38  ;;  %v9855_v59 = vpop.f32.mrb[29].mxu1 }
 0x22d   : > { %v6042_v32 = vmul.f32 %v5964_v53, %v5964_v53  ;;  %v6076_v44 = vadd.f32 %v6075_v4, %v6041_v60  ;;  %v5999_v3 = vadd.f32 %v5998_v41, %v5964_v53  ;;  %v7324_v7 = vadd.f32 %v7287_v16, %v10512_v55  ;;  %v10525_v41 = vld [vmem:[#allocation42_spill] sm:$0xff] }
 0x22e   : > { %v10516_v13 = vsel %vm9319_vm3, %v10514_v10, %v10515_v48  ;;  %v10522_v19 = vsel %vm9401_vm8, %v10520_v47, %v10521_v37  ;;  %v5965_v53 = vsel %vm9720_vm13, %v7323_v12, 0.0  ;;  %v7325_v4 = vadd.f32 %v4900_v5, %v10525_v41  ;;  %v10526_v10 = vld [vmem:[#allocation55_spill] sm:$0xff] }
 0x22f   : > { %vm9833_vm2 = vcmp.lt.s32.totalorder %v10516_v13, 16  ;;  %vm9842_vm9 = vcmp.lt.s32.totalorder %v10522_v19, 16  ;;  %v9852_v1 = vmul.u32.u64.low 3817748708, %v9602_v25  ;;  %v9853_v2 = vmul.u32.u64.high 3817748708, %v9602_v25, %v9852_v1  ;;  %v10529_v48 = vld [vmem:[#allocation47_spill] sm:$0xff] }
 0x230   : > { %v6000_v29 = vadd.f32 %v5999_v3, %v5965_v53  ;;  %v6043_v16 = vmul.f32 %v5965_v53, %v5965_v53  ;;  %v6077_v38 = vadd.f32 %v6076_v44, %v6042_v32  ;;  %v6732_v55 = vpack.c.bf16 %v7324_v7, %v7322_v11  ;;  %v9870_v44 = vpop.f32.mrb[30].mxu1 }
 0x231   : > { %vm10527_vm3 = vnez %v10526_v10  ;;  %v5967_v39 = vsel %vm9736_vm10, %v7322_v11, 0.0  ;;  %v6727_v47 = vpack.c.bf16 %v7325_v4, %v7323_v12  ;;  %v5966_v32 = vsel %vm9745_vm15, %v7325_v4, 0.0  ;;  %v9874_v53 = vpop.f32.mrb[31].mxu1  ;;  %v7290_v11 = vpop.f32.mrb[20].mxu0  ;;  %v10536_v10 = vld [vmem:[#allocation52_spill] sm:$0xff] }
 0x232   : > { %v10530_v13 = vsel %vm10527_vm3, %v10528_v56, %v10529_v48  ;;  %vm5764_vm7 = vcmp.ne.s32.totalorder %v9792_v61, 0  ;;  %v6078_v3 = vadd.f32 %v6077_v38, %v6043_v16  ;;  %6782 = vst [vmem:[%s9541_s9 + $0x48] sm:$0xff] %v6732_v55   ;;  %v6001_v37 = vadd.f32 %v6000_v29, %v5966_v32  ;;  %v4913_v16 = vpop.f32.mrb[21].mxu0  ;;  %v10533_v38 = vld [vmem:[#allocation62_spill] sm:$0xff]  ;;  %v10535_v55 = vld [vmem:[#allocation61_spill] sm:$0xff] }
 0x233   : > { %vm9862_vm8 = vcmp.lt.s32.totalorder %v10530_v13, 16  ;;  %v6044_v19 = vmul.f32 %v5966_v32, %v5966_v32  ;;  %vm5800_vm13 = vcmp.lt.s32.totalorder %v9792_v61, 0  ;;  %v5968_v43 = vsel %vm9773_vm5, %v7324_v7, 0.0  ;;  %6781 = vst [vmem:[%s9541_s9 + $0x40] sm:$0xff] %v6727_v47   ;;  %v7291_v48 = vpop.f32.mrb[22].mxu0  ;;  %v10540_v13 = vld [vmem:[#allocation63_spill] sm:$0xff] }
 0x234   : > { %v9881_v40 = vadd.s32 18, %v9792_v61  ;;  %vm5762_vm4 = vcmp.ne.s32.totalorder %v9809_v62, 0  ;;  %v5696_v12 = vmul.u32 18, %v5695_v23  ;;  %v6045_v41 = vmul.f32 %v5967_v39, %v5967_v39 }
 0x235   : > { %v6002_v4 = vadd.f32 %v6001_v37, %v5967_v39  ;;  %v6079_v1 = vadd.f32 %v6078_v3, %v6044_v19  ;;  %v7326_v29 = vadd.f32 %v7290_v11, %v9670_v63  ;;  %vm10534_vm15 = vnez %v10533_v38  ;;  %v4916_v37 = vpop.f32.mrb[23].mxu0  ;;  %v10541_v19 = vld [vmem:[#allocation60_spill] sm:$0xff]  ;;  %v10543_v11 = vld [vmem:[#allocation59_spill] sm:$0xff] }
 0x236   : > { %v10537_v21 = vsel %vm10534_vm15, %v10535_v55, %v10536_v10  ;;  %v7327_v56 = vadd.f32 %v4913_v16, %v9677_v6  ;;  %vm5798_vm14 = vcmp.lt.s32.totalorder %v9809_v62, 0  ;;  %v5870_v23 = vadd.s32 18, %v9809_v62  ;;  %v10544_v38 = vld [vmem:[#allocation51_spill] sm:$0xff]  ;;  %vm9928_vm15 = vmand %vm5800_vm13, %vm5764_vm7  ;;  %v7294_v60 = vpop.f32.mrb[24].mxu0 }
 0x237   : > { %vm9890_vm10 = vcmp.lt.s32.totalorder %v10537_v21, 16  ;;  %v9898_v39 = vsub.s32 %v10540_v13, %v5718_v31  ;;  %v6046_v63 = vmul.f32 %v5968_v43, %v5968_v43  ;;  %v6080_v47 = vadd.f32 %v6079_v1, %v6045_v41  ;;  %v9922_v41 = vpop.f32.mrb[32].mxu1  ;;  %vm9951_vm7 = vmand %vm5798_vm14, %vm5762_vm4 }
 0x238   : > { %v6003_v32 = vadd.f32 %v6002_v4, %v5968_v43  ;;  %v7328_v3 = vadd.f32 %v7291_v48, %v9700_v34  ;;  %vm10542_vm5 = vnez %v10541_v19  ;;  %vm9915_vm3 = vcmp.lt.s32.totalorder %v5902_v27, 16  ;;  %v9936_v1 = vpop.f32.mrb[33].mxu1 }
 0x239   : > { %v10545_v55 = vsel %vm10542_vm5, %v10543_v11, %v10544_v38  ;;  %v5969_v34 = vsel %vm9817_vm1, %v7327_v56, 0.0  ;;  %v7329_v43 = vadd.f32 %v4916_v37, %v9703_v35  ;;  %v9933_v24 = vsub.s32 %v9511_v28, %v5696_v12  ;;  %v9959_v0 = vpop.f32.mrb[34].mxu1  ;;  %v4929_v37 = vpop.f32.mrb[25].mxu0 }
 0x23a   : > { %vm9906_vm12 = vcmp.lt.s32.totalorder %v10545_v55, 16  ;;  %v5706_v14 = vshrl.u32 %v9853_v2, 4  ;;  %v6004_v27 = vadd.f32 %v6003_v32, %v5969_v34  ;;  %v6047_v50 = vmul.f32 %v5969_v34, %v5969_v34  ;;  %v9963_v48 = vpop.f32.mrb[35].mxu1  ;;  %v7295_v5 = vpop.f32.mrb[26].mxu0 }
 0x23b   : > { %v6081_v4 = vadd.f32 %v6080_v47, %v6046_v63  ;;  %v6742_v35 = vpack.c.bf16 %v7328_v3, %v7326_v29  ;;  %vm9943_vm1 = vcmp.lt.s32.totalorder %v5904_v52, 16  ;;  %v5971_v2 = vsel %vm9833_vm2, %v7326_v29, 0.0  ;;  %v4932_v19 = vpop.f32.mrb[27].mxu0 }
 0x23c   : > { %v6737_v12 = vpack.c.bf16 %v7329_v43, %v7327_v56  ;;  %v5970_v33 = vsel %vm9842_vm9, %v7329_v43, 0.0  ;;  %v5728_v15 = vshrl.u32 %v9825_v42, 4  ;;  %v5908_v17 = vsel %vm9928_vm15, %v9881_v40, %v9792_v61 }
 0x23d   : > { %v6082_v52 = vadd.f32 %v6081_v4, %v6047_v50  ;;  %6784 = vst [vmem:[%s9541_s9 + $0x58] sm:$0xff] %v6742_v35   ;;  %v6005_v10 = vadd.f32 %v6004_v27, %v5970_v33  ;;  %v6048_v21 = vmul.f32 %v5970_v33, %v5970_v33  ;;  %v5972_v29 = vsel %vm9862_vm8, %v7328_v3, 0.0  ;;  %v7298_v27 = vpop.f32.mrb[28].mxu0 }
 0x23e   : > { %6783 = vst [vmem:[%s9541_s9 + $0x50] sm:$0xff] %v6737_v12   ;;  %v5906_v42 = vsel %vm9951_vm7, %v5870_v23, %v9809_v62  ;;  %vm5767_vm2 = vcmp.ne.s32.totalorder %v9898_v39, 0  ;;  %v5707_v56 = vmul.u32 18, %v5706_v14  ;;  %v6049_v13 = vmul.f32 %v5971_v2, %v5971_v2  ;;  %v4945_v35 = vpop.f32.mrb[29].mxu0 }
 0x23f   : > { %v6006_v63 = vadd.f32 %v6005_v10, %v5971_v2  ;;  %v6083_v47 = vadd.f32 %v6082_v52, %v6048_v21  ;;  %v7330_v32 = vadd.f32 %v7294_v60, %v9752_v51  ;;  %vm9982_vm9 = vcmp.lt.s32.totalorder %v5905_v49, 16  ;;  %v7299_v2 = vpop.f32.mrb[30].mxu0 }
 0x240   : > { %v7331_v62 = vadd.f32 %v4929_v37, %v9766_v20  ;;  %vm5803_vm8 = vcmp.lt.s32.totalorder %v9898_v39, 0  ;;  %vm5765_vm13 = vcmp.ne.s32.totalorder %v9933_v24, 0  ;;  %v5729_v40 = vmul.u32 18, %v5728_v15  ;;  %v4948_v10 = vpop.f32.mrb[31].mxu0 }
 0x241   : > { %v6050_v23 = vmul.f32 %v5972_v29, %v5972_v29  ;;  %v6084_v51 = vadd.f32 %v6083_v47, %v6049_v13  ;;  %v6007_v3 = vadd.f32 %v6006_v63, %v5972_v29  ;;  %v7332_v8 = vadd.f32 %v7295_v5, %v9789_v9  ;;  %vm10047_vm11 = vmand %vm5803_vm8, %vm5767_vm2 }
 0x242   : > { %vm9995_vm6 = vcmp.lt.s32.totalorder %v5907_v58, 16  ;;  %vm9999_vm4 = vcmp.lt.s32.totalorder %v5906_v42, 16  ;;  %v5973_v20 = vsel %vm9890_vm10, %v7331_v62, 0.0  ;;  %v7333_v9 = vadd.f32 %v4932_v19, %v9795_v54 }
 0x243   : > { %vm5801_vm14 = vcmp.lt.s32.totalorder %v9933_v24, 0  ;;  %v10008_v36 = vsub.s32 %v9602_v25, %v5707_v56  ;;  %v6008_v46 = vadd.f32 %v6007_v3, %v5973_v20  ;;  %v6051_v57 = vmul.f32 %v5973_v20, %v5973_v20 }
 0x244   : > { %v6085_v58 = vadd.f32 %v6084_v51, %v6050_v23  ;;  %v6752_v49 = vpack.c.bf16 %v7332_v8, %v7330_v32  ;;  %vm10010_vm0 = vcmp.lt.s32.totalorder %v5908_v17, 16  ;;  %v5975_v7 = vsel %vm9906_vm12, %v7330_v32, 0.0  ;;  %vm10034_vm12 = vmand %vm5801_vm14, %vm5765_vm13  ;;  %v7302_v51 = vpop.f32.mrb[32].mxu0 }
 0x245   : > { %v6747_v38 = vpack.c.bf16 %v7333_v9, %v7331_v62  ;;  %v5974_v54 = vsel %vm9915_vm3, %v7333_v9, 0.0  ;;  %v10019_v55 = vsub.s32 %v10511_v45, %v5729_v40  ;;  %v5875_v22 = vadd.s32 18, %v9898_v39  ;;  %v4961_v20 = vpop.f32.mrb[33].mxu0 }
 0x246   : > { %v6086_v25 = vadd.f32 %v6085_v58, %v6051_v57  ;;  %6786 = vst [vmem:[%s9541_s9 + $0x68] sm:$0xff] %v6752_v49   ;;  %v6009_v34 = vadd.f32 %v6008_v46, %v5974_v54  ;;  %v6052_v43 = vmul.f32 %v5974_v54, %v5974_v54  ;;  %v5976_v14 = vsel %vm9943_vm1, %v7332_v8, 0.0  ;;  %v7303_v46 = vpop.f32.mrb[34].mxu0 }
 0x247   : > { %6785 = vst [vmem:[%s9541_s9 + $0x60] sm:$0xff] %v6747_v38   ;;  %v5873_v6 = vadd.s32 18, %v9933_v24  ;;  %vm5766_vm10 = vcmp.ne.s32.totalorder %v10008_v36, 0  ;;  %vm5802_vm5 = vcmp.lt.s32.totalorder %v10008_v36, 0  ;;  %v6053_v31 = vmul.f32 %v5975_v7, %v5975_v7 }
 0x248   : > { %v6010_v45 = vadd.f32 %v6009_v34, %v5975_v7  ;;  %v6087_v50 = vadd.f32 %v6086_v25, %v6052_v43  ;;  %v7334_v4 = vadd.f32 %v7298_v27, %v9849_v18  ;;  %v7335_v28 = vadd.f32 %v4945_v35, %v9855_v59  ;;  %vm10062_vm1 = vmand %vm5802_vm5, %vm5766_vm10  ;;  %v4964_v7 = vpop.f32.mrb[35].mxu0 }
 0x249   : > { %vm5768_vm3 = vcmp.ne.s32.totalorder %v10019_v55, 0  ;;  %vm5804_vm15 = vcmp.lt.s32.totalorder %v10019_v55, 0  ;;  %v5874_v12 = vadd.s32 18, %v10008_v36  ;;  %v6054_v33 = vmul.f32 %v5976_v14, %v5976_v14 }
 0x24a   : > { %v6088_v18 = vadd.f32 %v6087_v50, %v6053_v31  ;;  %v6011_v15 = vadd.f32 %v6010_v45, %v5976_v14  ;;  %v7336_v52 = vadd.f32 %v7299_v2, %v9870_v44  ;;  %v5977_v59 = vsel %vm9982_vm9, %v7335_v28, 0.0  ;;  %vm10070_vm7 = vmand %vm5804_vm15, %vm5768_vm3 }
 0x24b   : > { %v7337_v17 = vadd.f32 %v4948_v10, %v9874_v53  ;;  %v5909_v29 = vsel %vm10034_vm12, %v5873_v6, %v9933_v24  ;;  %v5876_v44 = vadd.s32 18, %v10019_v55  ;;  %v6055_v56 = vmul.f32 %v5977_v59, %v5977_v59 }
 0x24c   : > { %v6012_v42 = vadd.f32 %v6011_v15, %v5977_v59  ;;  %v6089_v13 = vadd.f32 %v6088_v18, %v6054_v33  ;;  %v6762_v63 = vpack.c.bf16 %v7336_v52, %v7334_v4  ;;  %v5979_v24 = vsel %vm9995_vm6, %v7334_v4, 0.0 }
 0x24d   : > { %v6757_v47 = vpack.c.bf16 %v7337_v17, %v7335_v28  ;;  %v5978_v32 = vsel %vm9999_vm4, %v7337_v17, 0.0  ;;  %v5911_v37 = vsel %vm10047_vm11, %v5875_v22, %v9898_v39  ;;  %v5910_v40 = vsel %vm10062_vm1, %v5874_v12, %v10008_v36 }
 0x24e   : > { %v6090_v61 = vadd.f32 %v6089_v13, %v6055_v56  ;;  %6788 = vst [vmem:[%s9541_s9 + $0x78] sm:$0xff] %v6762_v63   ;;  %v6013_v62 = vadd.f32 %v6012_v42, %v5978_v32  ;;  %v6056_v5 = vmul.f32 %v5978_v32, %v5978_v32  ;;  %v5980_v23 = vsel %vm10010_vm0, %v7336_v52, 0.0 }
 0x24f   : > { %6787 = vst [vmem:[%s9541_s9 + $0x70] sm:$0xff] %v6757_v47   ;;  %vm10088_vm2 = vcmp.lt.s32.totalorder %v5909_v29, 16  ;;  %v5912_v39 = vsel %vm10070_vm7, %v5876_v44, %v10019_v55  ;;  %v6057_v8 = vmul.f32 %v5979_v24, %v5979_v24  ;;  %v7338_v26 = vadd.f32 %v7302_v51, %v9922_v41 }
 0x250   : > { %v6014_v19 = vadd.f32 %v6013_v62, %v5979_v24  ;;  %v6091_v30 = vadd.f32 %v6090_v61, %v6056_v5  ;;  %vm10096_vm9 = vcmp.lt.s32.totalorder %v5911_v37, 16  ;;  %v7339_v36 = vadd.f32 %v4961_v20, %v9936_v1 }
 0x251   : > { %vm10101_vm8 = vcmp.lt.s32.totalorder %v5910_v40, 16  ;;  %v6058_v58 = vmul.f32 %v5980_v23, %v5980_v23  ;;  %v7340_v41 = vadd.f32 %v7303_v46, %v9959_v0  ;;  %vm5948_vm13 = vcmp.lt.s32.totalorder %v5912_v39, 16 }
 0x252   : > { %v6092_v49 = vadd.f32 %v6091_v30, %v6057_v8  ;;  %v6015_v11 = vadd.f32 %v6014_v19, %v5980_v23  ;;  %v5981_v38 = vsel %vm10088_vm2, %v7339_v36, 0.0  ;;  %v7341_v1 = vadd.f32 %v4964_v7, %v9963_v48 }
 0x253   : > { %v6059_v55 = vmul.f32 %v5981_v38, %v5981_v38  ;;  %v6772_v34 = vpack.c.bf16 %v7340_v41, %v7338_v26  ;;  %v5983_v0 = vsel %vm10096_vm9, %v7338_v26, 0.0  ;;  %v5984_v6 = vsel %vm5948_vm13, %v7340_v41, 0.0 }
 0x254   : > { %v6016_v54 = vadd.f32 %v6015_v11, %v5981_v38  ;;  %v6093_v25 = vadd.f32 %v6092_v49, %v6058_v58  ;;  %v6767_v43 = vpack.c.bf16 %v7341_v1, %v7339_v36  ;;  %v5982_v22 = vsel %vm10101_vm8, %v7341_v1, 0.0 }
 0x255   : > { %6790 = vst [vmem:[%s9541_s9 + $0x88] sm:$0xff] %v6772_v34   ;;  %v6060_v27 = vmul.f32 %v5982_v22, %v5982_v22  ;;  %v6061_v31 = vmul.f32 %v5983_v0, %v5983_v0 }
 0x256   : > { %v6094_v48 = vadd.f32 %v6093_v25, %v6059_v55  ;;  %v6017_v14 = vadd.f32 %v6016_v54, %v5982_v22  ;;  %6789 = vst [vmem:[%s9541_s9 + $0x80] sm:$0xff] %v6767_v43  }
 0x258   : > { %v6018_v45 = vadd.f32 %v6017_v14, %v5983_v0  ;;  %v6095_v50 = vadd.f32 %v6094_v48, %v6060_v27 }
 0x259   : > { %7925 = shalt.err (!%p7922_p5)
}
 0x25a   : > { %s7926_s30 = scalar_lea.hbm %s10120_s21, 2304  ;;  %s7930_s6 = scalar_lea.hbm %s10203_s2, 4608 }
 0x25b   : > { %p7927_p6 = scmp.ne.s32.totalorder %s10120_s21, %s7926_s30  ;;  %p7931_p10 = scmp.lt.u32.totalorder %s10120_s21, %s10203_s2 }
 0x25c   : > { %p7932_p11 = scmp.lt.u32.totalorder %s7930_s6, %s7926_s30  ;;  %p7934_p13 = scmp.lt.u32.totalorder %s7926_s30, %s10120_s21 }
 0x25d   : > { %p7928_p7 = pnand %p7927_p6, %p8088_p4 }
 0x25e   : > { %p7933_p12 = por %p7932_p11, %p7931_p10 }
 0x25f   : > { %p7929_p9 = pneg %p7928_p7 }
 0x260   : > { %p7935_p0 = por %p7934_p13, %p7933_p12 }
 0x262   : > { %p7936_p1 = pnand %p7935_p0, %p7929_p9 }
 0x264   : > { %7939 = shalt.err (!%p7936_p1)
}
 0x265   : > { %s8025_s10 = smov 64   ;;  %s8026_s18 = smov 4   ;;  %v6062_v4 = vmul.f32 %v5984_v6, %v5984_v6  ;;  %v6019_v35 = vadd.f32 %v6018_v45, %v5984_v6  ;;  %v6096_v16 = vadd.f32 %v6095_v50, %v6061_v31 }
 0x266   : > { %7679 = dma.vmem_to_hbm [thread:$0]  (%p8088_p4), %s10111_s11, 2304, %s10120_s21, %s6106_s23, %s8025_s10, %s8025_s10, %s8026_s18  }
 0x267   : > { %v6020_v28 = vrot.slane %v6019_v35, 4  ;;  %v6097_v2 = vadd.f32 %v6096_v16, %v6062_v4  ;;  %s6265_s19 = sshll.u32 %s9382_s7, 1  ;;  %s6645_s26 = sshll.u32 %s8014_s15, 5 }
 0x268   : > { %s203_s27 = scalar_lea.vmem [#allocation5], %s6265_s19  ;;  %s10153_s23 = scalar_lea.hbm %s10204_s3, %s6645_s26 }
 0x269   : > { %v6021_v12 = vadd.f32 %v6020_v28, %v6019_v35  ;;  %v6098_v33 = vrot.slane %v6097_v2, 4  ;;  %s6142_s28 = sshll.u32 %s203_s27, 4  ;;  %s6111_s29 = scalar_lea.sflag [#allocation6], %s9382_s7  ;;  %s10155_s28 = int_to_ptr.vmem [resolvable:$true] %s6142_s28 }
 0x26a   : > { %s7940_s30 = scalar_lea.vmem %s10155_s28, 32  ;;  %s8027_s15 = smov [#allocation5]  }
 0x26b   : > { %v6022_v18 = vrot.slane %v6021_v12, 2  ;;  %v6099_v15 = vadd.f32 %v6098_v33, %v6097_v2  ;;  %p7941_p2 = scmp.ne.s32.totalorder %s10155_s28, %s7940_s30  ;;  %s7944_s4 = sshll.u32 %s8027_s15, 4  ;;  %s7945_s4 = int_to_ptr.vmem [resolvable:$false] %s7944_s4 }
 0x26c   : > { %s7946_s5 = scalar_lea.vmem %s7945_s4, 64  ;;  %p7947_p6 = scmp.lt.s32.totalorder %s10155_s28, %s7945_s4 }
 0x26d   : > { %v6023_v52 = vadd.f32 %v6022_v18, %v6021_v12  ;;  %v6100_v10 = vrot.slane %v6099_v15, 2  ;;  %p7942_p3 = pnand %p7941_p2, %p8088_p4  ;;  %p7948_p7 = scmp.lt.s32.totalorder %s7946_s5, %s7940_s30 }
 0x26f   : > { %v6024_v21 = vrot.slane %v6023_v52, 1  ;;  %v6101_v59 = vadd.f32 %v6100_v10, %v6099_v15  ;;  %p7943_p5 = pneg %p7942_p3  ;;  %p7949_p9 = por %p7948_p7, %p7947_p6 }
 0x271   : > { %v6025_v17 = vadd.f32 %v6024_v21, %v6023_v52  ;;  %v6102_v29 = vrot.slane %v6101_v59, 1  ;;  %p7950_p10 = pnand %p7949_p9, %p7943_p5 }
 0x273   : > { %6026 = vst [vmem:[%s203_s27] sm:$0x1] %v6025_v17  ;;  %v6103_v44 = vadd.f32 %v6102_v29, %v6101_v59 }
 0x275   : > { %6104 = vst [vmem:[%s203_s27 + $0x1] sm:$0x1] %v6103_v44 }
 0x276   : > { %7953 = shalt.err (!%p7950_p10)
}
 0x277   : > { %s7954_s7 = scalar_lea.hbm %s10153_s23, 32  ;;  %s7958_s9 = scalar_lea.hbm %s10204_s3, 64 }
 0x278   : > { %p7955_p11 = scmp.ne.s32.totalorder %s10153_s23, %s7954_s7  ;;  %p7959_p0 = scmp.lt.u32.totalorder %s10153_s23, %s10204_s3 }
 0x279   : > { %p7960_p1 = scmp.lt.u32.totalorder %s7958_s9, %s7954_s7  ;;  %p7962_p3 = scmp.lt.u32.totalorder %s7954_s7, %s10153_s23 }
 0x27a   : > { %p7956_p12 = pnand %p7955_p11, %p8088_p4 }
 0x27b   : > { %p7961_p2 = por %p7960_p1, %p7959_p0 }
 0x27c   : > { %p7957_p13 = pneg %p7956_p12 }
 0x27d   : > { %p7963_p5 = por %p7962_p3, %p7961_p2 }
 0x27f   : > { %p7964_p6 = pnand %p7963_p5, %p7957_p13 }
 0x281   : > { %7967 = shalt.err (!%p7964_p6)
}
 0x282   : > { %7680 = dma.vmem_to_hbm [thread:$0]  (%p8088_p4), %s10155_s28, 32, %s10153_s23, %s6111_s29  }
 0x283 PF: > { %p7690_p7 = scmp.ge.s32.totalorder %s8022_s17, 2  ;;  %s6154_s19 = sand.u32 1, %s8002_s12  }
 0x284   : > { %s6155_s26 = scalar_lea.sflag [#allocation4], %s6154_s19 }
 0x285   : > { %p7684_p9 = pnand %p7690_p7, %p8095_p8 }
 0x287   : > { %7993 = dma.done.wait (!%p7684_p9), %s6155_s26, 2304  }
 0x288   : > { %7995 = vsyncadd (!%p7684_p9), %s6155_s26, 4294964992  ;;  %s6164_s27 = scalar_lea.sflag [#allocation6], %s6154_s19 }
 0x289   : > { %7997 = dma.done.wait (!%p7684_p9), %s6164_s27, 32  }
 0x28a   : > { %7999 = vsyncadd (!%p7684_p9), %s6164_s27, 4294967264  ;;  %s20_s17 = sadd.s32 1, %s8022_s17   ;;  %s10579_s12 = smov %s8006_s13 }
 0x28b   : > { %p17_p10 = scmp.ge.s32.totalorder %s20_s17, 4   ;;  %s10580_s13 = smov %s8010_s14 }
 0x28c   : > { %s10581_s14 = smov %s8101_s25  ;;  %s10582_s15 = smov %s8018_s16 }
 0x28d   : > { %s10583_s16 = smov %s10585_s20  ;;  %19 = sbr.rel (!%p17_p10) target bundleno = 6 (0x6), region = 91 }
 0x294   :  { %6169 = vsyncpa [#allocation4], 1 }
 0x295   :  { %6171 = vsyncpa [#allocation4 + $0x1], 1 }
 0x296   :  { %6172 = vsyncpa [#allocation6], 1 }
 0x297   :  { %6174 = vsyncpa [#allocation6 + $0x1], 1 }

</bundles_post_ra>
